<compile_context>
chip_gen: v5e
topology: v5e:2x2
jax: 0.10.0
libtpu: 0.0.40
codegen_flags: <defaults>
</compile_context>

<pallas_src>
import functools

import jax
import jax.numpy as jnp
from jax.experimental import pallas as pl
from jax.experimental.pallas import tpu as pltpu


# ----------------------------- small helpers --------------------------------

_VMEM_LIMIT = 64 * 1024 * 1024  # explicit scoped-VMEM budget (safe on v5e/v6e/v7x)


def _round_up(x, m):
    return ((x + m - 1) // m) * m


def _gelu(x):
    # TODO(synk): PyTorch nn.GELU defaults to the exact erf form; the tanh
    # approximation is used here (EUP-friendly, tiny numeric difference).
    return 0.5 * x * (1.0 + jnp.tanh(0.7978845608028654 * (x + 0.044715 * x * x * x)))


def _layernorm(x, g, b, eps=1e-5):
    mu = jnp.mean(x, axis=-1, keepdims=True)
    xc = x - mu
    var = jnp.mean(xc * xc, axis=-1, keepdims=True)
    return xc * jax.lax.rsqrt(var + eps) * g + b


def _full_spec(shape):
    """BlockSpec covering the whole array, constant across the grid."""
    nd = len(shape)
    return pl.BlockSpec(shape, lambda *_, _nd=nd: (0,) * _nd)


def _cparams(sems):
    return pltpu.CompilerParams(dimension_semantics=sems,
                                vmem_limit_bytes=_VMEM_LIMIT)


def _row_tiling(n, cap=512):
    """Row-tile size (multiple of 16 so bf16 blocks are legal) + padded rows."""
    tn = min(cap, _round_up(n, 16))
    return tn, _round_up(n, tn)


def _pad_rows(x, n_pad):
    n = x.shape[0]
    if n_pad == n:
        return x
    return jnp.pad(x, ((0, n_pad - n), (0, 0)))


# ------------- kernel 1: fused log-mel front-end + feature projection -------

def _frontend_kernel(frames_ref, trig_ref, mel_ref,
                     wc_ref, bc_ref, wp_ref, bp_ref, out_ref, *, n_freq_pad):
    # One fused windowed-DFT matmul: trig = window * [cos | -sin].
    spec = jnp.dot(frames_ref[...], trig_ref[...],
                   preferred_element_type=jnp.float32)         # (TN, 2*nfp) f32
    re = spec[:, :n_freq_pad]
    im = spec[:, n_freq_pad:]
    power = re * re + im * im                                  # (TN, nfp) f32
    # Keep the mel matmul in f32: power spans many orders of magnitude.
    mel = jnp.dot(power, mel_ref[...], preferred_element_type=jnp.float32)
    logmel = jnp.log(mel + 1e-6)                               # (TN, n_mels) f32
    h = jnp.dot(logmel.astype(jnp.bfloat16), wc_ref[...],
                preferred_element_type=jnp.float32) + bc_ref[...]
    h = _gelu(h)                                               # (TN, conv_dim)
    out_ref[...] = jnp.dot(h.astype(jnp.bfloat16), wp_ref[...],
                           preferred_element_type=jnp.float32) + bp_ref[...]


def frontend(frames2d, params, row_tile=512):
    """Fused log-mel + feature projection, row-tiled over N = B*T frames."""
    N, n_fft = frames2d.shape
    p = params["proj"]
    D = p["wp"].shape[1]
    n_freq_pad = params["trig"].shape[1] // 2
    tn, n_pad = _row_tiling(N, row_tile)
    frames2d = _pad_rows(frames2d, n_pad)
    weights = [params["trig"], params["mel_fb"], p["wc"], p["bc"], p["wp"], p["bp"]]
    out = pl.pallas_call(
        functools.partial(_frontend_kernel, n_freq_pad=n_freq_pad),
        out_shape=jax.ShapeDtypeStruct((n_pad, D), jnp.float32),
        grid=(n_pad // tn,),
        in_specs=[pl.BlockSpec((tn, n_fft), lambda i: (i, 0))]
                 + [_full_spec(w.shape) for w in weights],
        out_specs=pl.BlockSpec((tn, D), lambda i: (i, 0)),
        compiler_params=_cparams(("parallel",)),
    )(frames2d, *weights)
    return out[:N]


# ------------------------ kernel 2: pre-LN + fused QKV ----------------------

def _qkv_kernel(x_ref, g_ref, b_ref, wqkv_ref, bqkv_ref, out_ref):
    xn = _layernorm(x_ref[...], g_ref[...], b_ref[...])        # (TN, D) f32
    qkv = jnp.dot(xn.astype(jnp.bfloat16), wqkv_ref[...],
                  preferred_element_type=jnp.float32) + bqkv_ref[...]
    out_ref[...] = qkv.astype(out_ref.dtype)                   # (TN, 3D) bf16


def qkv_proj(x2d, p, row_tile=512):
    # TODO(synk): at full MuQ scale (encoder_dim=1024) K-tile wqkv like the
    # FFN weights; at this scale the (D, 3D) weight fits VMEM comfortably.
    N, D = x2d.shape
    tn, n_pad = _row_tiling(N, row_tile)
    xp = _pad_rows(x2d, n_pad)
    weights = [p["ln1_g"], p["ln1_b"], p["wqkv"], p["bqkv"]]
    out = pl.pallas_call(
        _qkv_kernel,
        out_shape=jax.ShapeDtypeStruct((n_pad, 3 * D), jnp.bfloat16),
        grid=(n_pad // tn,),
        in_specs=[pl.BlockSpec((tn, D), lambda i: (i, 0))]
                 + [_full_spec(w.shape) for w in weights],
        out_specs=pl.BlockSpec((tn, 3 * D), lambda i: (i, 0)),
        compiler_params=_cparams(("parallel",)),
    )(xp, *weights)
    return out[:N]


# ---------- kernel 3: per-batch MHSA + fused out-proj + residual ------------

def _attn_kernel(x_ref, qkv_ref, wo_ref, bo_ref, o_ref, *, num_heads, scale):
    T, D3 = qkv_ref.shape
    D = D3 // 3
    dh = D // num_heads
    qkv = qkv_ref[...]                                         # (T, 3D) bf16
    wo = wo_ref[...]                                           # (D, D) bf16
    acc = jnp.zeros((T, D), jnp.float32)
    # TODO(synk): for long sequences switch to flash-style online softmax over
    # KV tiles instead of materializing the full (T, T) score block per head.
    for h in range(num_heads):
        q = qkv[:, h * dh:(h + 1) * dh] * scale                # scale folded into q
        k = qkv[:, D + h * dh:D + (h + 1) * dh]
        v = qkv[:, 2 * D + h * dh:2 * D + (h + 1) * dh]
        s = jax.lax.dot_general(q, k, (((1,), (1,)), ((), ())),
                                preferred_element_type=jnp.float32)      # (T, T)
        m = jnp.max(s, axis=-1, keepdims=True)
        e = jnp.exp(s - m)
        p = e * pl.reciprocal(jnp.sum(e, axis=-1, keepdims=True), approx=True)
        ctx = jnp.dot(p.astype(jnp.bfloat16), v,
                      preferred_element_type=jnp.float32)                # (T, dh)
        # fused output projection, accumulated per head (lane-dense in D)
        acc = acc + jnp.dot(ctx.astype(jnp.bfloat16), wo[h * dh:(h + 1) * dh, :],
                            preferred_element_type=jnp.float32)
    o_ref[...] = x_ref[...] + acc + bo_ref[...]                # residual 1


def attention(x3d, qkv3d, p, num_heads):
    """x3d: (B, T, D) f32 residual stream, qkv3d: (B, T, 3D) bf16 ->
    (B, T, D) f32 = x + MHSA(x) (output projection + residual fused)."""
    B, T, D = x3d.shape
    dh = D // num_heads
    scale = 1.0 / (dh ** 0.5)
    x_spec = pl.BlockSpec((None, T, D), lambda b: (b, 0, 0))
    qkv_spec = pl.BlockSpec((None, T, 3 * D), lambda b: (b, 0, 0))
    return pl.pallas_call(
        functools.partial(_attn_kernel, num_heads=num_heads, scale=scale),
        out_shape=jax.ShapeDtypeStruct((B, T, D), jnp.float32),
        grid=(B,),
        in_specs=[x_spec, qkv_spec,
                  _full_spec(p["wo"].shape), _full_spec(p["bo"].shape)],
        out_specs=x_spec,
        compiler_params=_cparams(("parallel",)),
    )(x3d, qkv3d, p["wo"], p["bo"])


# -------- kernel 4: pre-LN FFN (GELU), K-tiled over ffn_dim + residual ------

def _ffn_kernel(x_ref, g_ref, b_ref, w1_ref, b1_ref, w2_ref, b2_ref,
                out_ref, xn_ref, acc_ref):
    f = pl.program_id(1)

    @pl.when(f == 0)
    def _():
        xn = _layernorm(x_ref[...], g_ref[...], b_ref[...])
        xn_ref[...] = xn.astype(jnp.bfloat16)
        acc_ref[...] = jnp.zeros_like(acc_ref)

    h = _gelu(jnp.dot(xn_ref[...], w1_ref[...],
                      preferred_element_type=jnp.float32) + b1_ref[...])
    acc_ref[...] += jnp.dot(h.astype(jnp.bfloat16), w2_ref[...],
                            preferred_element_type=jnp.float32)

    @pl.when(f == pl.num_programs(1) - 1)
    def _():
        out_ref[...] = x_ref[...] + acc_ref[...] + b2_ref[...]   # residual 2


def ffn(x2d, p, row_tile=512, ffn_tile=512):
    N, D = x2d.shape
    F = p["w1"].shape[1]
    tn, n_pad = _row_tiling(N, row_tile)
    tf = F if F <= ffn_tile else ffn_tile
    if F % tf != 0:
        tf = F
    xp = _pad_rows(x2d, n_pad)
    out = pl.pallas_call(
        _ffn_kernel,
        out_shape=jax.ShapeDtypeStruct((n_pad, D), jnp.float32),
        grid=(n_pad // tn, F // tf),                            # reduction axis last
        in_specs=[pl.BlockSpec((tn, D), lambda i, f: (i, 0)),
                  _full_spec(p["ln2_g"].shape),
                  _full_spec(p["ln2_b"].shape),
                  pl.BlockSpec((D, tf), lambda i, f: (0, f)),
                  pl.BlockSpec((1, tf), lambda i, f: (0, f)),
                  pl.BlockSpec((tf, D), lambda i, f: (f, 0)),
                  _full_spec(p["b2"].shape)],
        out_specs=pl.BlockSpec((tn, D), lambda i, f: (i, 0)),
        scratch_shapes=[pltpu.VMEM((tn, D), jnp.bfloat16),      # LN(x) cache
                        pltpu.VMEM((tn, D), jnp.float32)],      # FFN accumulator
        compiler_params=_cparams(("parallel", "arbitrary")),
    )(xp, p["ln2_g"], p["ln2_b"], p["w1"], p["b1"], p["w2"], p["b2"])
    return out[:N]


# --------------------------- encoder layer glue ------------------------------

def encoder_layer(x, p, num_heads):
    """x: (B, T, D) -> (B, T, D)."""
    # TODO(synk): MuQ's encoder is a Conformer variant (conv module + relative
    # position bias); a standard pre-LN MHSA + GELU-FFN block is used here.
    B, T, D = x.shape
    N = B * T
    x2d = x.reshape(N, D)

    qkv = qkv_proj(x2d, p)                                     # (N, 3D) bf16
    # free reshape only (no head split/merge transposes through HBM)
    x_attn = attention(x, qkv.reshape(B, T, 3 * D), p, num_heads)   # (B,T,D) f32

    out2d = ffn(x_attn.reshape(N, D), p)                       # (N, D) f32
    return out2d.reshape(B, T, D)


# ----------------------------- parameter setup -------------------------------

def _init(key, shape, scale=0.02, dtype=jnp.bfloat16):
    return (scale * jax.random.normal(key, shape, dtype=jnp.float32)).astype(dtype)


def make_mel_filterbank(n_freq, n_mels, sr, n_fft):
    def hz_to_mel(f):
        return 2595.0 * jnp.log10(1.0 + f / 700.0)

    def mel_to_hz(m):
        return 700.0 * (10.0 ** (m / 2595.0) - 1.0)

    fmin, fmax = 0.0, sr / 2.0
    mels = jnp.linspace(hz_to_mel(fmin), hz_to_mel(fmax), n_mels + 2)
    pts = jnp.floor((n_fft + 1) * mel_to_hz(mels) / sr).astype(jnp.float32)
    left, center, right = pts[:-2][None, :], pts[1:-1][None, :], pts[2:][None, :]
    freqs = jnp.arange(n_freq, dtype=jnp.float32)[:, None]
    up = (freqs - left) / jnp.maximum(center - left, 1.0)
    down = (right - freqs) / jnp.maximum(right - center, 1.0)
    return jnp.clip(jnp.minimum(up, down), 0.0, 1.0)           # (n_freq, n_mels)


def build_muq_params(key, *, n_fft, n_mels, conv_dim, enc_dim, enc_depth,
                     ffn_dim, sr):
    n_freq = n_fft // 2 + 1
    n_freq_pad = _round_up(n_freq, 128)                        # lane-dense freq axis
    n = jnp.arange(n_fft, dtype=jnp.float32)
    f = jnp.arange(n_freq, dtype=jnp.float32)
    ang = 2.0 * jnp.pi * n[:, None] * f[None, :] / n_fft
    window = (0.5 - 0.5 * jnp.cos(2.0 * jnp.pi * n / n_fft))[:, None]
    pad = ((0, 0), (0, n_freq_pad - n_freq))
    # Hann window baked into the DFT bases; cos and -sin fused side by side so
    # the kernel needs a single MXU matmul for the whole complex spectrum.
    cos_w = jnp.pad(jnp.cos(ang) * window, pad)
    sin_w = jnp.pad(-jnp.sin(ang) * window, pad)
    trig = jnp.concatenate([cos_w, sin_w], axis=1).astype(jnp.bfloat16)
    mel_fb = make_mel_filterbank(n_freq, n_mels, sr, n_fft)
    mel_fb = jnp.pad(mel_fb, ((0, n_freq_pad - n_freq), (0, 0))).astype(jnp.float32)

    keys = jax.random.split(key, 2 + enc_depth)
    proj = {
        "wc": _init(keys[0], (n_mels, conv_dim)),
        "bc": jnp.zeros((1, conv_dim), jnp.float32),
        "wp": _init(keys[1], (conv_dim, enc_dim)),
        "bp": jnp.zeros((1, enc_dim), jnp.float32),
    }
    layers = []
    for li in range(enc_depth):
        lk = jax.random.split(keys[2 + li], 4)
        layers.append({
            "ln1_g": jnp.ones((1, enc_dim), jnp.float32),
            "ln1_b": jnp.zeros((1, enc_dim), jnp.float32),
            "wqkv": _init(lk[0], (enc_dim, 3 * enc_dim)),
            "bqkv": jnp.zeros((1, 3 * enc_dim), jnp.float32),
            "wo": _init(lk[1], (enc_dim, enc_dim)),
            "bo": jnp.zeros((1, enc_dim), jnp.float32),
            "ln2_g": jnp.ones((1, enc_dim), jnp.float32),
            "ln2_b": jnp.zeros((1, enc_dim), jnp.float32),
            "w1": _init(lk[2], (enc_dim, ffn_dim)),
            "b1": jnp.zeros((1, ffn_dim), jnp.float32),
            "w2": _init(lk[3], (ffn_dim, enc_dim)),
            "b2": jnp.zeros((1, enc_dim), jnp.float32),
        })
    return {"trig": trig, "mel_fb": mel_fb, "proj": proj, "layers": layers}


# ------------------------------- forward -------------------------------------

def muq_forward(x, params, *, n_fft, hop, num_heads, output_hidden_states=True):
    """x: (B, time) waveform -> (last_hidden_state, hidden_states tuple)."""
    B, time = x.shape
    T = (time - n_fft) // hop + 1
    # TODO(synk): the overlapping-frame gather could move inside the frontend
    # kernel (waveform passed via memory_space=pl.ANY) to avoid this 4x-inflated
    # HBM copy on bandwidth-limited chips; the Hann window is already folded
    # into the DFT bases so no wrapper-side elementwise pass remains.
    idx = jnp.arange(T)[:, None] * hop + jnp.arange(n_fft)[None, :]      # (T, n_fft)
    frames2d = x[:, idx].reshape(B * T, n_fft).astype(jnp.bfloat16)

    # Pallas: fused log-mel front-end + feature projection
    feat2d = frontend(frames2d, params)                                  # (B*T, D) f32
    D = feat2d.shape[-1]
    h = feat2d.reshape(B, T, D)

    hidden_states = [h]
    for layer_params in params["layers"]:
        h = encoder_layer(h, layer_params, num_heads)
        hidden_states.append(h)

    last_hidden_state = hidden_states[-1]
    if not output_hidden_states:
        return last_hidden_state, None
    return last_hidden_state, tuple(hidden_states)


# --------------------------------- main ---------------------------------------

if __name__ == "__main__":
    # Small, MuQ-consistent configuration (scaled down from the defaults:
    # n_mels=128, conv_dim=512, encoder_dim=1024, encoder_depth=12) with
    # lane-dense (multiple-of-128) feature axes.
    SR = 24000
    N_FFT = 128
    HOP = 32
    N_MELS = 128
    CONV_DIM = 128
    ENC_DIM = 128
    ENC_DEPTH = 2
    NUM_HEADS = 4
    FFN_DIM = 256

    B = 2
    TIME = N_FFT + 31 * HOP          # -> T = 32 frames

    key = jax.random.PRNGKey(0)
    k_wav, k_param = jax.random.split(key)
    wav = jax.random.normal(k_wav, (B, TIME), dtype=jnp.float32)

    params = build_muq_params(
        k_param, n_fft=N_FFT, n_mels=N_MELS, conv_dim=CONV_DIM,
        enc_dim=ENC_DIM, enc_depth=ENC_DEPTH, ffn_dim=FFN_DIM, sr=SR)

    fwd = jax.jit(functools.partial(
        muq_forward, n_fft=N_FFT, hop=HOP, num_heads=NUM_HEADS,
        output_hidden_states=True))

    last_hidden_state, hidden_states = fwd(wav, params)
    jax.block_until_ready(last_hidden_state)
    jax.block_until_ready(hidden_states)

    assert last_hidden_state.shape == (B, 32, ENC_DIM)
    assert len(hidden_states) == ENC_DEPTH + 1
    print("KERNEL_OK")
</pallas_src>

<mosaic_0001>
module attributes {stable_mosaic.version = 11 : i64} {
  func.func @_frontend_kernel(%arg0: i32, %arg1: memref<64x128xbf16, #tpu.memory_space<vmem>>, %arg2: memref<128x256xbf16, #tpu.memory_space<vmem>>, %arg3: memref<128x128xf32, #tpu.memory_space<vmem>>, %arg4: memref<128x128xbf16, #tpu.memory_space<vmem>>, %arg5: memref<1x128xf32, #tpu.memory_space<vmem>>, %arg6: memref<128x128xbf16, #tpu.memory_space<vmem>>, %arg7: memref<1x128xf32, #tpu.memory_space<vmem>>, %arg8: memref<64x128xf32, #tpu.memory_space<vmem>>) attributes {dimension_semantics = [#tpu.dimension_semantics<parallel>], iteration_bounds = array<i64: 1>, scalar_prefetch = 0 : i64, scratch_operands = 0 : i64, tpu.core_type = #tpu.core_type<tc>, window_params = [{transform_indices = @transform_0, window_bounds = array<i64: 64, 128>}, {pipeline_mode = #tpu.pipeline_mode<synchronous>, transform_indices = @transform_1, window_bounds = array<i64: 128, 256>}, {pipeline_mode = #tpu.pipeline_mode<synchronous>, transform_indices = @transform_2, window_bounds = array<i64: 128, 128>}, {pipeline_mode = #tpu.pipeline_mode<synchronous>, transform_indices = @transform_3, window_bounds = array<i64: 128, 128>}, {pipeline_mode = #tpu.pipeline_mode<synchronous>, transform_indices = @transform_4, window_bounds = array<i64: 1, 128>}, {pipeline_mode = #tpu.pipeline_mode<synchronous>, transform_indices = @transform_5, window_bounds = array<i64: 128, 128>}, {pipeline_mode = #tpu.pipeline_mode<synchronous>, transform_indices = @transform_6, window_bounds = array<i64: 1, 128>}, {transform_indices = @transform_7, window_bounds = array<i64: 64, 128>}]} {
    %c0 = arith.constant 0 : index
    %c0_0 = arith.constant 0 : index
    %0 = vector.load %arg1[%c0, %c0_0] : memref<64x128xbf16, #tpu.memory_space<vmem>>, vector<64x128xbf16>
    %c0_1 = arith.constant 0 : index
    %c0_2 = arith.constant 0 : index
    %1 = vector.load %arg2[%c0_1, %c0_2] : memref<128x256xbf16, #tpu.memory_space<vmem>>, vector<128x256xbf16>
    %cst = arith.constant dense<0.000000e+00> : vector<64x256xf32>
    %2 = tpu.matmul %0, %1, %cst {dimension_numbers = #tpu.dot_dimension_numbers<[1], [0], [0], [1], [0, 0, 1, 1], [], []>} : vector<64x128xbf16>, vector<128x256xbf16>, vector<64x256xf32> -> vector<64x256xf32>
    %3 = vector.extract_strided_slice %2 {offsets = [0, 0], sizes = [64, 128], strides = [1, 1]} : vector<64x256xf32> to vector<64x128xf32>
    %4 = vector.extract_strided_slice %2 {offsets = [0, 128], sizes = [64, 128], strides = [1, 1]} : vector<64x256xf32> to vector<64x128xf32>
    %5 = arith.mulf %3, %3 : vector<64x128xf32>
    %6 = arith.mulf %4, %4 : vector<64x128xf32>
    %7 = arith.addf %5, %6 : vector<64x128xf32>
    %c0_3 = arith.constant 0 : index
    %c0_4 = arith.constant 0 : index
    %8 = vector.load %arg3[%c0_3, %c0_4] : memref<128x128xf32, #tpu.memory_space<vmem>>, vector<128x128xf32>
    %cst_5 = arith.constant dense<0.000000e+00> : vector<64x128xf32>
    %9 = tpu.matmul %7, %8, %cst_5 {dimension_numbers = #tpu.dot_dimension_numbers<[1], [0], [0], [1], [0, 0, 1, 1], [], []>} : vector<64x128xf32>, vector<128x128xf32>, vector<64x128xf32> -> vector<64x128xf32>
    %cst_6 = arith.constant 9.99999997E-7 : f32
    %10 = vector.broadcast %cst_6 : f32 to vector<64x128xf32>
    %11 = arith.addf %9, %10 : vector<64x128xf32>
    %12 = math.log %11 : vector<64x128xf32>
    %13 = arith.truncf %12 : vector<64x128xf32> to vector<64x128xbf16>
    %c0_7 = arith.constant 0 : index
    %c0_8 = arith.constant 0 : index
    %14 = vector.load %arg4[%c0_7, %c0_8] : memref<128x128xbf16, #tpu.memory_space<vmem>>, vector<128x128xbf16>
    %cst_9 = arith.constant dense<0.000000e+00> : vector<64x128xf32>
    %15 = tpu.matmul %13, %14, %cst_9 {dimension_numbers = #tpu.dot_dimension_numbers<[1], [0], [0], [1], [0, 0, 1, 1], [], []>} : vector<64x128xbf16>, vector<128x128xbf16>, vector<64x128xf32> -> vector<64x128xf32>
    %c0_10 = arith.constant 0 : index
    %c0_11 = arith.constant 0 : index
    %16 = vector.load %arg5[%c0_10, %c0_11] : memref<1x128xf32, #tpu.memory_space<vmem>>, vector<1x128xf32>
    %17 = vector.broadcast %16 : vector<1x128xf32> to vector<64x128xf32>
    %18 = arith.addf %15, %17 : vector<64x128xf32>
    %cst_12 = arith.constant 5.000000e-01 : f32
    %19 = vector.broadcast %cst_12 : f32 to vector<64x128xf32>
    %20 = arith.mulf %19, %18 : vector<64x128xf32>
    %cst_13 = arith.constant 4.471500e-02 : f32
    %21 = vector.broadcast %cst_13 : f32 to vector<64x128xf32>
    %22 = arith.mulf %21, %18 : vector<64x128xf32>
    %23 = arith.mulf %22, %18 : vector<64x128xf32>
    %24 = arith.mulf %23, %18 : vector<64x128xf32>
    %25 = arith.addf %18, %24 : vector<64x128xf32>
    %cst_14 = arith.constant 0.797884583 : f32
    %26 = vector.broadcast %cst_14 : f32 to vector<64x128xf32>
    %27 = arith.mulf %26, %25 : vector<64x128xf32>
    %28 = math.tanh %27 : vector<64x128xf32>
    %cst_15 = arith.constant 1.000000e+00 : f32
    %29 = vector.broadcast %cst_15 : f32 to vector<64x128xf32>
    %30 = arith.addf %29, %28 : vector<64x128xf32>
    %31 = arith.mulf %20, %30 : vector<64x128xf32>
    %32 = arith.truncf %31 : vector<64x128xf32> to vector<64x128xbf16>
    %c0_16 = arith.constant 0 : index
    %c0_17 = arith.constant 0 : index
    %33 = vector.load %arg6[%c0_16, %c0_17] : memref<128x128xbf16, #tpu.memory_space<vmem>>, vector<128x128xbf16>
    %cst_18 = arith.constant dense<0.000000e+00> : vector<64x128xf32>
    %34 = tpu.matmul %32, %33, %cst_18 {dimension_numbers = #tpu.dot_dimension_numbers<[1], [0], [0], [1], [0, 0, 1, 1], [], []>} : vector<64x128xbf16>, vector<128x128xbf16>, vector<64x128xf32> -> vector<64x128xf32>
    %c0_19 = arith.constant 0 : index
    %c0_20 = arith.constant 0 : index
    %35 = vector.load %arg7[%c0_19, %c0_20] : memref<1x128xf32, #tpu.memory_space<vmem>>, vector<1x128xf32>
    %36 = vector.broadcast %35 : vector<1x128xf32> to vector<64x128xf32>
    %37 = arith.addf %34, %36 : vector<64x128xf32>
    %c0_21 = arith.constant 0 : index
    %c0_22 = arith.constant 0 : index
    %38 = vector.load %arg8[%c0_21, %c0_22] : memref<64x128xf32, #tpu.memory_space<vmem>>, vector<64x128xf32>
    tpu.vector_store %arg8[%c0_21, %c0_22], %37 {strides = array<i32>} : memref<64x128xf32, #tpu.memory_space<vmem>>, vector<64x128xf32>,
    return
  }
  func.func @transform_0(%arg0: i32) -> (i32, i32) {
    %c0_i32 = arith.constant 0 : i32
    %c0_i32_0 = arith.constant 0 : i32
    return %arg0, %c0_i32 : i32, i32
  }
  func.func @transform_1(%arg0: i32) -> (i32, i32) {
    %c0_i32 = arith.constant 0 : i32
    %c0_i32_0 = arith.constant 0 : i32
    %c0_i32_1 = arith.constant 0 : i32
    return %c0_i32, %c0_i32_0 : i32, i32
  }
  func.func @transform_2(%arg0: i32) -> (i32, i32) {
    %c0_i32 = arith.constant 0 : i32
    %c0_i32_0 = arith.constant 0 : i32
    %c0_i32_1 = arith.constant 0 : i32
    return %c0_i32, %c0_i32_0 : i32, i32
  }
  func.func @transform_3(%arg0: i32) -> (i32, i32) {
    %c0_i32 = arith.constant 0 : i32
    %c0_i32_0 = arith.constant 0 : i32
    %c0_i32_1 = arith.constant 0 : i32
    return %c0_i32, %c0_i32_0 : i32, i32
  }
  func.func @transform_4(%arg0: i32) -> (i32, i32) {
    %c0_i32 = arith.constant 0 : i32
    %c0_i32_0 = arith.constant 0 : i32
    %c0_i32_1 = arith.constant 0 : i32
    return %c0_i32, %c0_i32_0 : i32, i32
  }
  func.func @transform_5(%arg0: i32) -> (i32, i32) {
    %c0_i32 = arith.constant 0 : i32
    %c0_i32_0 = arith.constant 0 : i32
    %c0_i32_1 = arith.constant 0 : i32
    return %c0_i32, %c0_i32_0 : i32, i32
  }
  func.func @transform_6(%arg0: i32) -> (i32, i32) {
    %c0_i32 = arith.constant 0 : i32
    %c0_i32_0 = arith.constant 0 : i32
    %c0_i32_1 = arith.constant 0 : i32
    return %c0_i32, %c0_i32_0 : i32, i32
  }
  func.func @transform_7(%arg0: i32) -> (i32, i32) {
    %c0_i32 = arith.constant 0 : i32
    %c0_i32_0 = arith.constant 0 : i32
    return %arg0, %c0_i32 : i32, i32
  }
}

module attributes {stable_mosaic.version = 11 : i64} {
  func.func @_qkv_kernel(%arg0: i32, %arg1: memref<64x128xf32, #tpu.memory_space<vmem>>, %arg2: memref<1x128xf32, #tpu.memory_space<vmem>>, %arg3: memref<1x128xf32, #tpu.memory_space<vmem>>, %arg4: memref<128x384xbf16, #tpu.memory_space<vmem>>, %arg5: memref<1x384xf32, #tpu.memory_space<vmem>>, %arg6: memref<64x384xbf16, #tpu.memory_space<vmem>>) attributes {dimension_semantics = [#tpu.dimension_semantics<parallel>], iteration_bounds = array<i64: 1>, scalar_prefetch = 0 : i64, scratch_operands = 0 : i64, tpu.core_type = #tpu.core_type<tc>, window_params = [{transform_indices = @transform_0, window_bounds = array<i64: 64, 128>}, {pipeline_mode = #tpu.pipeline_mode<synchronous>, transform_indices = @transform_1, window_bounds = array<i64: 1, 128>}, {pipeline_mode = #tpu.pipeline_mode<synchronous>, transform_indices = @transform_2, window_bounds = array<i64: 1, 128>}, {pipeline_mode = #tpu.pipeline_mode<synchronous>, transform_indices = @transform_3, window_bounds = array<i64: 128, 384>}, {pipeline_mode = #tpu.pipeline_mode<synchronous>, transform_indices = @transform_4, window_bounds = array<i64: 1, 384>}, {transform_indices = @transform_5, window_bounds = array<i64: 64, 384>}]} {
    %c0 = arith.constant 0 : index
    %c0_0 = arith.constant 0 : index
    %0 = vector.load %arg1[%c0, %c0_0] : memref<64x128xf32, #tpu.memory_space<vmem>>, vector<64x128xf32>
    %c0_1 = arith.constant 0 : index
    %c0_2 = arith.constant 0 : index
    %1 = vector.load %arg2[%c0_1, %c0_2] : memref<1x128xf32, #tpu.memory_space<vmem>>, vector<1x128xf32>
    %c0_3 = arith.constant 0 : index
    %c0_4 = arith.constant 0 : index
    %2 = vector.load %arg3[%c0_3, %c0_4] : memref<1x128xf32, #tpu.memory_space<vmem>>, vector<1x128xf32>
    %cst = arith.constant dense<0.000000e+00> : vector<64xf32>
    %3 = vector.multi_reduction <add>, %0, %cst [1] : vector<64x128xf32> to vector<64xf32>
    %4 = vector.shape_cast %3 : vector<64xf32> to vector<64x1xf32>
    %cst_5 = arith.constant 1.280000e+02 : f32
    %5 = vector.broadcast %cst_5 : f32 to vector<64x1xf32>
    %6 = arith.divf %4, %5 : vector<64x1xf32>
    %7 = vector.broadcast %6 : vector<64x1xf32> to vector<64x128xf32>
    %8 = arith.subf %0, %7 : vector<64x128xf32>
    %9 = arith.mulf %8, %8 : vector<64x128xf32>
    %cst_6 = arith.constant dense<0.000000e+00> : vector<64xf32>
    %10 = vector.multi_reduction <add>, %9, %cst_6 [1] : vector<64x128xf32> to vector<64xf32>
    %11 = vector.shape_cast %10 : vector<64xf32> to vector<64x1xf32>
    %cst_7 = arith.constant 1.280000e+02 : f32
    %12 = vector.broadcast %cst_7 : f32 to vector<64x1xf32>
    %13 = arith.divf %11, %12 : vector<64x1xf32>
    %cst_8 = arith.constant 9.99999974E-6 : f32
    %14 = vector.broadcast %cst_8 : f32 to vector<64x1xf32>
    %15 = arith.addf %13, %14 : vector<64x1xf32>
    %16 = math.rsqrt %15 : vector<64x1xf32>
    %17 = vector.broadcast %16 : vector<64x1xf32> to vector<64x128xf32>
    %18 = arith.mulf %8, %17 : vector<64x128xf32>
    %19 = vector.broadcast %1 : vector<1x128xf32> to vector<64x128xf32>
    %20 = arith.mulf %18, %19 : vector<64x128xf32>
    %21 = vector.broadcast %2 : vector<1x128xf32> to vector<64x128xf32>
    %22 = arith.addf %20, %21 : vector<64x128xf32>
    %23 = arith.truncf %22 : vector<64x128xf32> to vector<64x128xbf16>
    %c0_9 = arith.constant 0 : index
    %c0_10 = arith.constant 0 : index
    %24 = vector.load %arg4[%c0_9, %c0_10] : memref<128x384xbf16, #tpu.memory_space<vmem>>, vector<128x384xbf16>
    %cst_11 = arith.constant dense<0.000000e+00> : vector<64x384xf32>
    %25 = tpu.matmul %23, %24, %cst_11 {dimension_numbers = #tpu.dot_dimension_numbers<[1], [0], [0], [1], [0, 0, 1, 1], [], []>} : vector<64x128xbf16>, vector<128x384xbf16>, vector<64x384xf32> -> vector<64x384xf32>
    %c0_12 = arith.constant 0 : index
    %c0_13 = arith.constant 0 : index
    %26 = vector.load %arg5[%c0_12, %c0_13] : memref<1x384xf32, #tpu.memory_space<vmem>>, vector<1x384xf32>
    %27 = vector.broadcast %26 : vector<1x384xf32> to vector<64x384xf32>
    %28 = arith.addf %25, %27 : vector<64x384xf32>
    %29 = arith.truncf %28 : vector<64x384xf32> to vector<64x384xbf16>
    %c0_14 = arith.constant 0 : index
    %c0_15 = arith.constant 0 : index
    %30 = vector.load %arg6[%c0_14, %c0_15] : memref<64x384xbf16, #tpu.memory_space<vmem>>, vector<64x384xbf16>
    tpu.vector_store %arg6[%c0_14, %c0_15], %29 {strides = array<i32>} : memref<64x384xbf16, #tpu.memory_space<vmem>>, vector<64x384xbf16>,
    return
  }
  func.func @transform_0(%arg0: i32) -> (i32, i32) {
    %c0_i32 = arith.constant 0 : i32
    %c0_i32_0 = arith.constant 0 : i32
    return %arg0, %c0_i32 : i32, i32
  }
  func.func @transform_1(%arg0: i32) -> (i32, i32) {
    %c0_i32 = arith.constant 0 : i32
    %c0_i32_0 = arith.constant 0 : i32
    %c0_i32_1 = arith.constant 0 : i32
    return %c0_i32, %c0_i32_0 : i32, i32
  }
  func.func @transform_2(%arg0: i32) -> (i32, i32) {
    %c0_i32 = arith.constant 0 : i32
    %c0_i32_0 = arith.constant 0 : i32
    %c0_i32_1 = arith.constant 0 : i32
    return %c0_i32, %c0_i32_0 : i32, i32
  }
  func.func @transform_3(%arg0: i32) -> (i32, i32) {
    %c0_i32 = arith.constant 0 : i32
    %c0_i32_0 = arith.constant 0 : i32
    %c0_i32_1 = arith.constant 0 : i32
    return %c0_i32, %c0_i32_0 : i32, i32
  }
  func.func @transform_4(%arg0: i32) -> (i32, i32) {
    %c0_i32 = arith.constant 0 : i32
    %c0_i32_0 = arith.constant 0 : i32
    %c0_i32_1 = arith.constant 0 : i32
    return %c0_i32, %c0_i32_0 : i32, i32
  }
  func.func @transform_5(%arg0: i32) -> (i32, i32) {
    %c0_i32 = arith.constant 0 : i32
    %c0_i32_0 = arith.constant 0 : i32
    return %arg0, %c0_i32 : i32, i32
  }
}

module attributes {stable_mosaic.version = 11 : i64} {
  func.func @_attn_kernel(%arg0: i32, %arg1: memref<1x32x128xf32, #tpu.memory_space<vmem>>, %arg2: memref<1x32x384xbf16, #tpu.memory_space<vmem>>, %arg3: memref<128x128xbf16, #tpu.memory_space<vmem>>, %arg4: memref<1x128xf32, #tpu.memory_space<vmem>>, %arg5: memref<1x32x128xf32, #tpu.memory_space<vmem>>) attributes {dimension_semantics = [#tpu.dimension_semantics<parallel>], iteration_bounds = array<i64: 2>, scalar_prefetch = 0 : i64, scratch_operands = 0 : i64, tpu.core_type = #tpu.core_type<tc>, window_params = [{transform_indices = @transform_0, window_bounds = array<i64: 1, 32, 128>}, {transform_indices = @transform_1, window_bounds = array<i64: 1, 32, 384>}, {pipeline_mode = #tpu.pipeline_mode<synchronous>, transform_indices = @transform_2, window_bounds = array<i64: 128, 128>}, {pipeline_mode = #tpu.pipeline_mode<synchronous>, transform_indices = @transform_3, window_bounds = array<i64: 1, 128>}, {transform_indices = @transform_4, window_bounds = array<i64: 1, 32, 128>}]} {
    %c0 = arith.constant 0 : index
    %c0_0 = arith.constant 0 : index
    %c0_1 = arith.constant 0 : index
    %0 = vector.load %arg2[%c0, %c0_0, %c0_1] : memref<1x32x384xbf16, #tpu.memory_space<vmem>>, vector<1x32x384xbf16>
    %1 = vector.shape_cast %0 : vector<1x32x384xbf16> to vector<32x384xbf16>
    %c0_2 = arith.constant 0 : index
    %c0_3 = arith.constant 0 : index
    %2 = vector.load %arg3[%c0_2, %c0_3] : memref<128x128xbf16, #tpu.memory_space<vmem>>, vector<128x128xbf16>
    %cst = arith.constant 0.000000e+00 : f32
    %3 = vector.broadcast %cst : f32 to vector<32x128xf32>
    %4 = vector.extract_strided_slice %1 {offsets = [0, 0], sizes = [32, 32], strides = [1, 1]} : vector<32x384xbf16> to vector<32x32xbf16>
    %cst_4 = arith.constant 1.767580e-01 : bf16
    %5 = vector.broadcast %cst_4 : bf16 to vector<32x32xbf16>
    %6 = arith.mulf %4, %5 : vector<32x32xbf16>
    %7 = vector.extract_strided_slice %1 {offsets = [0, 128], sizes = [32, 32], strides = [1, 1]} : vector<32x384xbf16> to vector<32x32xbf16>
    %8 = vector.extract_strided_slice %1 {offsets = [0, 256], sizes = [32, 32], strides = [1, 1]} : vector<32x384xbf16> to vector<32x32xbf16>
    %cst_5 = arith.constant dense<0.000000e+00> : vector<32x32xf32>
    %9 = tpu.matmul %6, %7, %cst_5 {dimension_numbers = #tpu.dot_dimension_numbers<[1], [1], [0], [0], [0, 0, 1, 0], [], []>} : vector<32x32xbf16>, vector<32x32xbf16>, vector<32x32xf32> -> vector<32x32xf32>
    %cst_6 = arith.constant dense<0xFF800000> : vector<32xf32>
    %10 = vector.multi_reduction <maximumf>, %9, %cst_6 [1] : vector<32x32xf32> to vector<32xf32>
    %11 = vector.shape_cast %10 : vector<32xf32> to vector<32x1xf32>
    %12 = vector.broadcast %11 : vector<32x1xf32> to vector<32x32xf32>
    %13 = arith.subf %9, %12 : vector<32x32xf32>
    %14 = math.exp %13 : vector<32x32xf32>
    %cst_7 = arith.constant dense<0.000000e+00> : vector<32xf32>
    %15 = vector.multi_reduction <add>, %14, %cst_7 [1] : vector<32x32xf32> to vector<32xf32>
    %16 = vector.shape_cast %15 : vector<32xf32> to vector<32x1xf32>
    %17 = tpu.reciprocal %16 {approx = true} : vector<32x1xf32> -> vector<32x1xf32>
    %18 = vector.broadcast %17 : vector<32x1xf32> to vector<32x32xf32>
    %19 = arith.mulf %14, %18 : vector<32x32xf32>
    %20 = arith.truncf %19 : vector<32x32xf32> to vector<32x32xbf16>
    %cst_8 = arith.constant dense<0.000000e+00> : vector<32x32xf32>
    %21 = tpu.matmul %20, %8, %cst_8 {dimension_numbers = #tpu.dot_dimension_numbers<[1], [0], [0], [1], [0, 0, 1, 1], [], []>} : vector<32x32xbf16>, vector<32x32xbf16>, vector<32x32xf32> -> vector<32x32xf32>
    %22 = arith.truncf %21 : vector<32x32xf32> to vector<32x32xbf16>
    %23 = vector.extract_strided_slice %2 {offsets = [0, 0], sizes = [32, 128], strides = [1, 1]} : vector<128x128xbf16> to vector<32x128xbf16>
    %cst_9 = arith.constant dense<0.000000e+00> : vector<32x128xf32>
    %24 = tpu.matmul %22, %23, %cst_9 {dimension_numbers = #tpu.dot_dimension_numbers<[1], [0], [0], [1], [0, 0, 1, 1], [], []>} : vector<32x32xbf16>, vector<32x128xbf16>, vector<32x128xf32> -> vector<32x128xf32>
    %25 = arith.addf %3, %24 : vector<32x128xf32>
    %26 = vector.extract_strided_slice %1 {offsets = [0, 32], sizes = [32, 32], strides = [1, 1]} : vector<32x384xbf16> to vector<32x32xbf16>
    %cst_10 = arith.constant 1.767580e-01 : bf16
    %27 = vector.broadcast %cst_10 : bf16 to vector<32x32xbf16>
    %28 = arith.mulf %26, %27 : vector<32x32xbf16>
    %29 = vector.extract_strided_slice %1 {offsets = [0, 160], sizes = [32, 32], strides = [1, 1]} : vector<32x384xbf16> to vector<32x32xbf16>
    %30 = vector.extract_strided_slice %1 {offsets = [0, 288], sizes = [32, 32], strides = [1, 1]} : vector<32x384xbf16> to vector<32x32xbf16>
    %cst_11 = arith.constant dense<0.000000e+00> : vector<32x32xf32>
    %31 = tpu.matmul %28, %29, %cst_11 {dimension_numbers = #tpu.dot_dimension_numbers<[1], [1], [0], [0], [0, 0, 1, 0], [], []>} : vector<32x32xbf16>, vector<32x32xbf16>, vector<32x32xf32> -> vector<32x32xf32>
    %cst_12 = arith.constant dense<0xFF800000> : vector<32xf32>
    %32 = vector.multi_reduction <maximumf>, %31, %cst_12 [1] : vector<32x32xf32> to vector<32xf32>
    %33 = vector.shape_cast %32 : vector<32xf32> to vector<32x1xf32>
    %34 = vector.broadcast %33 : vector<32x1xf32> to vector<32x32xf32>
    %35 = arith.subf %31, %34 : vector<32x32xf32>
    %36 = math.exp %35 : vector<32x32xf32>
    %cst_13 = arith.constant dense<0.000000e+00> : vector<32xf32>
    %37 = vector.multi_reduction <add>, %36, %cst_13 [1] : vector<32x32xf32> to vector<32xf32>
    %38 = vector.shape_cast %37 : vector<32xf32> to vector<32x1xf32>
    %39 = tpu.reciprocal %38 {approx = true} : vector<32x1xf32> -> vector<32x1xf32>
    %40 = vector.broadcast %39 : vector<32x1xf32> to vector<32x32xf32>
    %41 = arith.mulf %36, %40 : vector<32x32xf32>
    %42 = arith.truncf %41 : vector<32x32xf32> to vector<32x32xbf16>
    %cst_14 = arith.constant dense<0.000000e+00> : vector<32x32xf32>
    %43 = tpu.matmul %42, %30, %cst_14 {dimension_numbers = #tpu.dot_dimension_numbers<[1], [0], [0], [1], [0, 0, 1, 1], [], []>} : vector<32x32xbf16>, vector<32x32xbf16>, vector<32x32xf32> -> vector<32x32xf32>
    %44 = arith.truncf %43 : vector<32x32xf32> to vector<32x32xbf16>
    %45 = vector.extract_strided_slice %2 {offsets = [32, 0], sizes = [32, 128], strides = [1, 1]} : vector<128x128xbf16> to vector<32x128xbf16>
    %cst_15 = arith.constant dense<0.000000e+00> : vector<32x128xf32>
    %46 = tpu.matmul %44, %45, %cst_15 {dimension_numbers = #tpu.dot_dimension_numbers<[1], [0], [0], [1], [0, 0, 1, 1], [], []>} : vector<32x32xbf16>, vector<32x128xbf16>, vector<32x128xf32> -> vector<32x128xf32>
    %47 = arith.addf %25, %46 : vector<32x128xf32>
    %48 = vector.extract_strided_slice %1 {offsets = [0, 64], sizes = [32, 32], strides = [1, 1]} : vector<32x384xbf16> to vector<32x32xbf16>
    %cst_16 = arith.constant 1.767580e-01 : bf16
    %49 = vector.broadcast %cst_16 : bf16 to vector<32x32xbf16>
    %50 = arith.mulf %48, %49 : vector<32x32xbf16>
    %51 = vector.extract_strided_slice %1 {offsets = [0, 192], sizes = [32, 32], strides = [1, 1]} : vector<32x384xbf16> to vector<32x32xbf16>
    %52 = vector.extract_strided_slice %1 {offsets = [0, 320], sizes = [32, 32], strides = [1, 1]} : vector<32x384xbf16> to vector<32x32xbf16>
    %cst_17 = arith.constant dense<0.000000e+00> : vector<32x32xf32>
    %53 = tpu.matmul %50, %51, %cst_17 {dimension_numbers = #tpu.dot_dimension_numbers<[1], [1], [0], [0], [0, 0, 1, 0], [], []>} : vector<32x32xbf16>, vector<32x32xbf16>, vector<32x32xf32> -> vector<32x32xf32>
    %cst_18 = arith.constant dense<0xFF800000> : vector<32xf32>
    %54 = vector.multi_reduction <maximumf>, %53, %cst_18 [1] : vector<32x32xf32> to vector<32xf32>
    %55 = vector.shape_cast %54 : vector<32xf32> to vector<32x1xf32>
    %56 = vector.broadcast %55 : vector<32x1xf32> to vector<32x32xf32>
    %57 = arith.subf %53, %56 : vector<32x32xf32>
    %58 = math.exp %57 : vector<32x32xf32>
    %cst_19 = arith.constant dense<0.000000e+00> : vector<32xf32>
    %59 = vector.multi_reduction <add>, %58, %cst_19 [1] : vector<32x32xf32> to vector<32xf32>
    %60 = vector.shape_cast %59 : vector<32xf32> to vector<32x1xf32>
    %61 = tpu.reciprocal %60 {approx = true} : vector<32x1xf32> -> vector<32x1xf32>
    %62 = vector.broadcast %61 : vector<32x1xf32> to vector<32x32xf32>
    %63 = arith.mulf %58, %62 : vector<32x32xf32>
    %64 = arith.truncf %63 : vector<32x32xf32> to vector<32x32xbf16>
    %cst_20 = arith.constant dense<0.000000e+00> : vector<32x32xf32>
    %65 = tpu.matmul %64, %52, %cst_20 {dimension_numbers = #tpu.dot_dimension_numbers<[1], [0], [0], [1], [0, 0, 1, 1], [], []>} : vector<32x32xbf16>, vector<32x32xbf16>, vector<32x32xf32> -> vector<32x32xf32>
    %66 = arith.truncf %65 : vector<32x32xf32> to vector<32x32xbf16>
    %67 = vector.extract_strided_slice %2 {offsets = [64, 0], sizes = [32, 128], strides = [1, 1]} : vector<128x128xbf16> to vector<32x128xbf16>
    %cst_21 = arith.constant dense<0.000000e+00> : vector<32x128xf32>
    %68 = tpu.matmul %66, %67, %cst_21 {dimension_numbers = #tpu.dot_dimension_numbers<[1], [0], [0], [1], [0, 0, 1, 1], [], []>} : vector<32x32xbf16>, vector<32x128xbf16>, vector<32x128xf32> -> vector<32x128xf32>
    %69 = arith.addf %47, %68 : vector<32x128xf32>
    %70 = vector.extract_strided_slice %1 {offsets = [0, 96], sizes = [32, 32], strides = [1, 1]} : vector<32x384xbf16> to vector<32x32xbf16>
    %cst_22 = arith.constant 1.767580e-01 : bf16
    %71 = vector.broadcast %cst_22 : bf16 to vector<32x32xbf16>
    %72 = arith.mulf %70, %71 : vector<32x32xbf16>
    %73 = vector.extract_strided_slice %1 {offsets = [0, 224], sizes = [32, 32], strides = [1, 1]} : vector<32x384xbf16> to vector<32x32xbf16>
    %74 = vector.extract_strided_slice %1 {offsets = [0, 352], sizes = [32, 32], strides = [1, 1]} : vector<32x384xbf16> to vector<32x32xbf16>
    %cst_23 = arith.constant dense<0.000000e+00> : vector<32x32xf32>
    %75 = tpu.matmul %72, %73, %cst_23 {dimension_numbers = #tpu.dot_dimension_numbers<[1], [1], [0], [0], [0, 0, 1, 0], [], []>} : vector<32x32xbf16>, vector<32x32xbf16>, vector<32x32xf32> -> vector<32x32xf32>
    %cst_24 = arith.constant dense<0xFF800000> : vector<32xf32>
    %76 = vector.multi_reduction <maximumf>, %75, %cst_24 [1] : vector<32x32xf32> to vector<32xf32>
    %77 = vector.shape_cast %76 : vector<32xf32> to vector<32x1xf32>
    %78 = vector.broadcast %77 : vector<32x1xf32> to vector<32x32xf32>
    %79 = arith.subf %75, %78 : vector<32x32xf32>
    %80 = math.exp %79 : vector<32x32xf32>
    %cst_25 = arith.constant dense<0.000000e+00> : vector<32xf32>
    %81 = vector.multi_reduction <add>, %80, %cst_25 [1] : vector<32x32xf32> to vector<32xf32>
    %82 = vector.shape_cast %81 : vector<32xf32> to vector<32x1xf32>
    %83 = tpu.reciprocal %82 {approx = true} : vector<32x1xf32> -> vector<32x1xf32>
    %84 = vector.broadcast %83 : vector<32x1xf32> to vector<32x32xf32>
    %85 = arith.mulf %80, %84 : vector<32x32xf32>
    %86 = arith.truncf %85 : vector<32x32xf32> to vector<32x32xbf16>
    %cst_26 = arith.constant dense<0.000000e+00> : vector<32x32xf32>
    %87 = tpu.matmul %86, %74, %cst_26 {dimension_numbers = #tpu.dot_dimension_numbers<[1], [0], [0], [1], [0, 0, 1, 1], [], []>} : vector<32x32xbf16>, vector<32x32xbf16>, vector<32x32xf32> -> vector<32x32xf32>
    %88 = arith.truncf %87 : vector<32x32xf32> to vector<32x32xbf16>
    %89 = vector.extract_strided_slice %2 {offsets = [96, 0], sizes = [32, 128], strides = [1, 1]} : vector<128x128xbf16> to vector<32x128xbf16>
    %cst_27 = arith.constant dense<0.000000e+00> : vector<32x128xf32>
    %90 = tpu.matmul %88, %89, %cst_27 {dimension_numbers = #tpu.dot_dimension_numbers<[1], [0], [0], [1], [0, 0, 1, 1], [], []>} : vector<32x32xbf16>, vector<32x128xbf16>, vector<32x128xf32> -> vector<32x128xf32>
    %91 = arith.addf %69, %90 : vector<32x128xf32>
    %c0_28 = arith.constant 0 : index
    %c0_29 = arith.constant 0 : index
    %c0_30 = arith.constant 0 : index
    %92 = vector.load %arg1[%c0_28, %c0_29, %c0_30] : memref<1x32x128xf32, #tpu.memory_space<vmem>>, vector<1x32x128xf32>
    %93 = vector.shape_cast %92 : vector<1x32x128xf32> to vector<32x128xf32>
    %94 = arith.addf %93, %91 : vector<32x128xf32>
    %c0_31 = arith.constant 0 : index
    %c0_32 = arith.constant 0 : index
    %95 = vector.load %arg4[%c0_31, %c0_32] : memref<1x128xf32, #tpu.memory_space<vmem>>, vector<1x128xf32>
    %96 = vector.broadcast %95 : vector<1x128xf32> to vector<32x128xf32>
    %97 = arith.addf %94, %96 : vector<32x128xf32>
    %c0_33 = arith.constant 0 : index
    %c0_34 = arith.constant 0 : index
    %c0_35 = arith.constant 0 : index
    %98 = vector.load %arg5[%c0_33, %c0_34, %c0_35] : memref<1x32x128xf32, #tpu.memory_space<vmem>>, vector<1x32x128xf32>
    %99 = vector.shape_cast %98 : vector<1x32x128xf32> to vector<32x128xf32>
    %100 = vector.shape_cast %97 : vector<32x128xf32> to vector<1x32x128xf32>
    tpu.vector_store %arg5[%c0_33, %c0_34, %c0_35], %100 {strides = array<i32>} : memref<1x32x128xf32, #tpu.memory_space<vmem>>, vector<1x32x128xf32>,
    return
  }
  func.func @transform_0(%arg0: i32) -> (i32, i32, i32) {
    %c0_i32 = arith.constant 0 : i32
    %c0_i32_0 = arith.constant 0 : i32
    %c0_i32_1 = arith.constant 0 : i32
    return %arg0, %c0_i32, %c0_i32_0 : i32, i32, i32
  }
  func.func @transform_1(%arg0: i32) -> (i32, i32, i32) {
    %c0_i32 = arith.constant 0 : i32
    %c0_i32_0 = arith.constant 0 : i32
    %c0_i32_1 = arith.constant 0 : i32
    return %arg0, %c0_i32, %c0_i32_0 : i32, i32, i32
  }
  func.func @transform_2(%arg0: i32) -> (i32, i32) {
    %c0_i32 = arith.constant 0 : i32
    %c0_i32_0 = arith.constant 0 : i32
    %c0_i32_1 = arith.constant 0 : i32
    return %c0_i32, %c0_i32_0 : i32, i32
  }
  func.func @transform_3(%arg0: i32) -> (i32, i32) {
    %c0_i32 = arith.constant 0 : i32
    %c0_i32_0 = arith.constant 0 : i32
    %c0_i32_1 = arith.constant 0 : i32
    return %c0_i32, %c0_i32_0 : i32, i32
  }
  func.func @transform_4(%arg0: i32) -> (i32, i32, i32) {
    %c0_i32 = arith.constant 0 : i32
    %c0_i32_0 = arith.constant 0 : i32
    %c0_i32_1 = arith.constant 0 : i32
    return %arg0, %c0_i32, %c0_i32_0 : i32, i32, i32
  }
}

module attributes {stable_mosaic.version = 11 : i64} {
  func.func @_ffn_kernel(%arg0: i32, %arg1: i32, %arg2: memref<64x128xf32, #tpu.memory_space<vmem>>, %arg3: memref<1x128xf32, #tpu.memory_space<vmem>>, %arg4: memref<1x128xf32, #tpu.memory_space<vmem>>, %arg5: memref<128x256xbf16, #tpu.memory_space<vmem>>, %arg6: memref<1x256xf32, #tpu.memory_space<vmem>>, %arg7: memref<256x128xbf16, #tpu.memory_space<vmem>>, %arg8: memref<1x128xf32, #tpu.memory_space<vmem>>, %arg9: memref<64x128xf32, #tpu.memory_space<vmem>>, %arg10: memref<64x128xbf16, #tpu.memory_space<vmem>>, %arg11: memref<64x128xf32, #tpu.memory_space<vmem>>) attributes {dimension_semantics = [#tpu.dimension_semantics<parallel>, #tpu.dimension_semantics<arbitrary>], iteration_bounds = array<i64: 1, 1>, scalar_prefetch = 0 : i64, scratch_operands = 2 : i64, tpu.core_type = #tpu.core_type<tc>, window_params = [{transform_indices = @transform_0, window_bounds = array<i64: 64, 128>}, {pipeline_mode = #tpu.pipeline_mode<synchronous>, transform_indices = @transform_1, window_bounds = array<i64: 1, 128>}, {pipeline_mode = #tpu.pipeline_mode<synchronous>, transform_indices = @transform_2, window_bounds = array<i64: 1, 128>}, {transform_indices = @transform_3, window_bounds = array<i64: 128, 256>}, {transform_indices = @transform_4, window_bounds = array<i64: 1, 256>}, {transform_indices = @transform_5, window_bounds = array<i64: 256, 128>}, {pipeline_mode = #tpu.pipeline_mode<synchronous>, transform_indices = @transform_6, window_bounds = array<i64: 1, 128>}, {transform_indices = @transform_7, window_bounds = array<i64: 64, 128>}]} {
    %c0_i32 = arith.constant 0 : i32
    %0 = arith.cmpi eq, %arg1, %c0_i32 : i32
    %1 = arith.extui %0 : i1 to i32
    %c0_i32_0 = arith.constant 0 : i32
    %2 = arith.cmpi ne, %1, %c0_i32_0 : i32
    scf.if %2 {
      %c0_19 = arith.constant 0 : index
      %c0_20 = arith.constant 0 : index
      %31 = vector.load %arg2[%c0_19, %c0_20] : memref<64x128xf32, #tpu.memory_space<vmem>>, vector<64x128xf32>
      %c0_21 = arith.constant 0 : index
      %c0_22 = arith.constant 0 : index
      %32 = vector.load %arg3[%c0_21, %c0_22] : memref<1x128xf32, #tpu.memory_space<vmem>>, vector<1x128xf32>
      %c0_23 = arith.constant 0 : index
      %c0_24 = arith.constant 0 : index
      %33 = vector.load %arg4[%c0_23, %c0_24] : memref<1x128xf32, #tpu.memory_space<vmem>>, vector<1x128xf32>
      %cst_25 = arith.constant dense<0.000000e+00> : vector<64xf32>
      %34 = vector.multi_reduction <add>, %31, %cst_25 [1] : vector<64x128xf32> to vector<64xf32>
      %35 = vector.shape_cast %34 : vector<64xf32> to vector<64x1xf32>
      %cst_26 = arith.constant 1.280000e+02 : f32
      %36 = vector.broadcast %cst_26 : f32 to vector<64x1xf32>
      %37 = arith.divf %35, %36 : vector<64x1xf32>
      %38 = vector.broadcast %37 : vector<64x1xf32> to vector<64x128xf32>
      %39 = arith.subf %31, %38 : vector<64x128xf32>
      %40 = arith.mulf %39, %39 : vector<64x128xf32>
      %cst_27 = arith.constant dense<0.000000e+00> : vector<64xf32>
      %41 = vector.multi_reduction <add>, %40, %cst_27 [1] : vector<64x128xf32> to vector<64xf32>
      %42 = vector.shape_cast %41 : vector<64xf32> to vector<64x1xf32>
      %cst_28 = arith.constant 1.280000e+02 : f32
      %43 = vector.broadcast %cst_28 : f32 to vector<64x1xf32>
      %44 = arith.divf %42, %43 : vector<64x1xf32>
      %cst_29 = arith.constant 9.99999974E-6 : f32
      %45 = vector.broadcast %cst_29 : f32 to vector<64x1xf32>
      %46 = arith.addf %44, %45 : vector<64x1xf32>
      %47 = math.rsqrt %46 : vector<64x1xf32>
      %48 = vector.broadcast %47 : vector<64x1xf32> to vector<64x128xf32>
      %49 = arith.mulf %39, %48 : vector<64x128xf32>
      %50 = vector.broadcast %32 : vector<1x128xf32> to vector<64x128xf32>
      %51 = arith.mulf %49, %50 : vector<64x128xf32>
      %52 = vector.broadcast %33 : vector<1x128xf32> to vector<64x128xf32>
      %53 = arith.addf %51, %52 : vector<64x128xf32>
      %54 = arith.truncf %53 : vector<64x128xf32> to vector<64x128xbf16>
      %c0_30 = arith.constant 0 : index
      %c0_31 = arith.constant 0 : index
      %55 = vector.load %arg10[%c0_30, %c0_31] : memref<64x128xbf16, #tpu.memory_space<vmem>>, vector<64x128xbf16>
      tpu.vector_store %arg10[%c0_30, %c0_31], %54 {strides = array<i32>} : memref<64x128xbf16, #tpu.memory_space<vmem>>, vector<64x128xbf16>,
      %cst_32 = arith.constant 0.000000e+00 : f32
      %56 = vector.broadcast %cst_32 : f32 to vector<64x128xf32>
      %c0_33 = arith.constant 0 : index
      %c0_34 = arith.constant 0 : index
      %57 = vector.load %arg11[%c0_33, %c0_34] : memref<64x128xf32, #tpu.memory_space<vmem>>, vector<64x128xf32>
      tpu.vector_store %arg11[%c0_33, %c0_34], %56 {strides = array<i32>} : memref<64x128xf32, #tpu.memory_space<vmem>>, vector<64x128xf32>,
    } else {
    }
    %c0 = arith.constant 0 : index
    %c0_1 = arith.constant 0 : index
    %3 = vector.load %arg10[%c0, %c0_1] : memref<64x128xbf16, #tpu.memory_space<vmem>>, vector<64x128xbf16>
    %c0_2 = arith.constant 0 : index
    %c0_3 = arith.constant 0 : index
    %4 = vector.load %arg5[%c0_2, %c0_3] : memref<128x256xbf16, #tpu.memory_space<vmem>>, vector<128x256xbf16>
    %cst = arith.constant dense<0.000000e+00> : vector<64x256xf32>
    %5 = tpu.matmul %3, %4, %cst {dimension_numbers = #tpu.dot_dimension_numbers<[1], [0], [0], [1], [0, 0, 1, 1], [], []>} : vector<64x128xbf16>, vector<128x256xbf16>, vector<64x256xf32> -> vector<64x256xf32>
    %c0_4 = arith.constant 0 : index
    %c0_5 = arith.constant 0 : index
    %6 = vector.load %arg6[%c0_4, %c0_5] : memref<1x256xf32, #tpu.memory_space<vmem>>, vector<1x256xf32>
    %7 = vector.broadcast %6 : vector<1x256xf32> to vector<64x256xf32>
    %8 = arith.addf %5, %7 : vector<64x256xf32>
    %cst_6 = arith.constant 5.000000e-01 : f32
    %9 = vector.broadcast %cst_6 : f32 to vector<64x256xf32>
    %10 = arith.mulf %9, %8 : vector<64x256xf32>
    %cst_7 = arith.constant 4.471500e-02 : f32
    %11 = vector.broadcast %cst_7 : f32 to vector<64x256xf32>
    %12 = arith.mulf %11, %8 : vector<64x256xf32>
    %13 = arith.mulf %12, %8 : vector<64x256xf32>
    %14 = arith.mulf %13, %8 : vector<64x256xf32>
    %15 = arith.addf %8, %14 : vector<64x256xf32>
    %cst_8 = arith.constant 0.797884583 : f32
    %16 = vector.broadcast %cst_8 : f32 to vector<64x256xf32>
    %17 = arith.mulf %16, %15 : vector<64x256xf32>
    %18 = math.tanh %17 : vector<64x256xf32>
    %cst_9 = arith.constant 1.000000e+00 : f32
    %19 = vector.broadcast %cst_9 : f32 to vector<64x256xf32>
    %20 = arith.addf %19, %18 : vector<64x256xf32>
    %21 = arith.mulf %10, %20 : vector<64x256xf32>
    %c0_10 = arith.constant 0 : index
    %c0_11 = arith.constant 0 : index
    %22 = vector.load %arg11[%c0_10, %c0_11] : memref<64x128xf32, #tpu.memory_space<vmem>>, vector<64x128xf32>
    %23 = arith.truncf %21 : vector<64x256xf32> to vector<64x256xbf16>
    %c0_12 = arith.constant 0 : index
    %c0_13 = arith.constant 0 : index
    %24 = vector.load %arg7[%c0_12, %c0_13] : memref<256x128xbf16, #tpu.memory_space<vmem>>, vector<256x128xbf16>
    %cst_14 = arith.constant dense<0.000000e+00> : vector<64x128xf32>
    %25 = tpu.matmul %23, %24, %cst_14 {dimension_numbers = #tpu.dot_dimension_numbers<[1], [0], [0], [1], [0, 0, 1, 1], [], []>} : vector<64x256xbf16>, vector<256x128xbf16>, vector<64x128xf32> -> vector<64x128xf32>
    %26 = arith.addf %22, %25 : vector<64x128xf32>
    %c0_15 = arith.constant 0 : index
    %c0_16 = arith.constant 0 : index
    %27 = vector.load %arg11[%c0_15, %c0_16] : memref<64x128xf32, #tpu.memory_space<vmem>>, vector<64x128xf32>
    tpu.vector_store %arg11[%c0_15, %c0_16], %26 {strides = array<i32>} : memref<64x128xf32, #tpu.memory_space<vmem>>, vector<64x128xf32>,
    %c0_i32_17 = arith.constant 0 : i32
    %28 = arith.cmpi eq, %arg1, %c0_i32_17 : i32
    %29 = arith.extui %28 : i1 to i32
    %c0_i32_18 = arith.constant 0 : i32
    %30 = arith.cmpi ne, %29, %c0_i32_18 : i32
    scf.if %30 {
      %c0_19 = arith.constant 0 : index
      %c0_20 = arith.constant 0 : index
      %31 = vector.load %arg2[%c0_19, %c0_20] : memref<64x128xf32, #tpu.memory_space<vmem>>, vector<64x128xf32>
      %c0_21 = arith.constant 0 : index
      %c0_22 = arith.constant 0 : index
      %32 = vector.load %arg11[%c0_21, %c0_22] : memref<64x128xf32, #tpu.memory_space<vmem>>, vector<64x128xf32>
      %33 = arith.addf %31, %32 : vector<64x128xf32>
      %c0_23 = arith.constant 0 : index
      %c0_24 = arith.constant 0 : index
      %34 = vector.load %arg8[%c0_23, %c0_24] : memref<1x128xf32, #tpu.memory_space<vmem>>, vector<1x128xf32>
      %35 = vector.broadcast %34 : vector<1x128xf32> to vector<64x128xf32>
      %36 = arith.addf %33, %35 : vector<64x128xf32>
      %c0_25 = arith.constant 0 : index
      %c0_26 = arith.constant 0 : index
      %37 = vector.load %arg9[%c0_25, %c0_26] : memref<64x128xf32, #tpu.memory_space<vmem>>, vector<64x128xf32>
      tpu.vector_store %arg9[%c0_25, %c0_26], %36 {strides = array<i32>} : memref<64x128xf32, #tpu.memory_space<vmem>>, vector<64x128xf32>,
    } else {
    }
    return
  }
  func.func @transform_0(%arg0: i32, %arg1: i32) -> (i32, i32) {
    %c0_i32 = arith.constant 0 : i32
    %c0_i32_0 = arith.constant 0 : i32
    return %arg0, %c0_i32 : i32, i32
  }
  func.func @transform_1(%arg0: i32, %arg1: i32) -> (i32, i32) {
    %c0_i32 = arith.constant 0 : i32
    %c0_i32_0 = arith.constant 0 : i32
    %c0_i32_1 = arith.constant 0 : i32
    return %c0_i32, %c0_i32_0 : i32, i32
  }
  func.func @transform_2(%arg0: i32, %arg1: i32) -> (i32, i32) {
    %c0_i32 = arith.constant 0 : i32
    %c0_i32_0 = arith.constant 0 : i32
    %c0_i32_1 = arith.constant 0 : i32
    return %c0_i32, %c0_i32_0 : i32, i32
  }
  func.func @transform_3(%arg0: i32, %arg1: i32) -> (i32, i32) {
    %c0_i32 = arith.constant 0 : i32
    %c0_i32_0 = arith.constant 0 : i32
    return %c0_i32, %arg1 : i32, i32
  }
  func.func @transform_4(%arg0: i32, %arg1: i32) -> (i32, i32) {
    %c0_i32 = arith.constant 0 : i32
    %c0_i32_0 = arith.constant 0 : i32
    return %c0_i32, %arg1 : i32, i32
  }
  func.func @transform_5(%arg0: i32, %arg1: i32) -> (i32, i32) {
    %c0_i32 = arith.constant 0 : i32
    %c0_i32_0 = arith.constant 0 : i32
    return %arg1, %c0_i32 : i32, i32
  }
  func.func @transform_6(%arg0: i32, %arg1: i32) -> (i32, i32) {
    %c0_i32 = arith.constant 0 : i32
    %c0_i32_0 = arith.constant 0 : i32
    %c0_i32_1 = arith.constant 0 : i32
    return %c0_i32, %c0_i32_0 : i32, i32
  }
  func.func @transform_7(%arg0: i32, %arg1: i32) -> (i32, i32) {
    %c0_i32 = arith.constant 0 : i32
    %c0_i32_0 = arith.constant 0 : i32
    return %arg0, %c0_i32 : i32, i32
  }
}

</mosaic_0001>

<bundles_post_ra>
// kernel: muq_forward.7
= control target key start
LH: loop header
LB: loop body
LE: loop exit
PB: predicated region body
PF: predicated region fallthrough
CT: control target
= control target key end

     0   :  { %s1109_s1 = inlined_call_operand.vmem [shape: bf16[128,256], index: 1, kind: input, shape index: {}]   ;;  %s1110_s0 = inlined_call_operand.vmem [shape: bf16[64,128], index: 0, kind: input, shape index: {}]   ;;  %s1111_s2 = inlined_call_operand.vmem [shape: f32[128,128], index: 2, kind: input, shape index: {}]   ;;  %s1112_s3 = inlined_call_operand.vmem [shape: bf16[128,128], index: 3, kind: input, shape index: {}]   ;;  %s1113_s4 = inlined_call_operand.vmem [shape: f32[1,128], index: 4, kind: input, shape index: {}]   ;;  %s1114_s6 = inlined_call_operand.vmem [shape: f32[1,128], index: 6, kind: input, shape index: {}]   ;;  %s1115_s5 = inlined_call_operand.vmem [shape: bf16[128,128], index: 5, kind: input, shape index: {}]   ;;  %s1116_s7 = inlined_call_operand.vmem [shape: f32[64,128], index: 7, kind: output, shape index: {}]  }
   0x1   :  { %v669_v0 = vld [vmem:[%s1109_s1 + $0x70] sm:$0xf]  ;;  %v758_v1 = vld [vmem:[%s1109_s1 + $0x74] sm:$0xf0]  ;;  %v661_v2 = vld [vmem:[%s1109_s1 + $0x60] sm:$0xf] }
   0x2   :  { %v670_v3 = vor.u32 %v758_v1, %v669_v0  ;;  %v756_v4 = vld [vmem:[%s1109_s1 + $0x64] sm:$0xf0]  ;;  %v653_v6 = vld [vmem:[%s1109_s1 + $0x50] sm:$0xf]  ;;  %v754_v7 = vld [vmem:[%s1109_s1 + $0x54] sm:$0xf0] }
   0x3   :  { %v662_v5 = vor.u32 %v756_v4, %v661_v2  ;;  %v654_v8 = vor.u32 %v754_v7, %v653_v6  ;;  %v645_v9 = vld [vmem:[%s1109_s1 + $0x40] sm:$0xf]  ;;  %v752_v10 = vld [vmem:[%s1109_s1 + $0x44] sm:$0xf0]  ;;  %v637_v12 = vld [vmem:[%s1109_s1 + $0x30] sm:$0xf] }
   0x4   :  { %775 = vmatpush.bf16.msra.mxu1 %v670_v3  ;;  %154 = vmatpush.bf16.msra.mxu0 %v670_v3  ;;  %v646_v11 = vor.u32 %v752_v10, %v645_v9  ;;  %v750_v13 = vld [vmem:[%s1109_s1 + $0x34] sm:$0xf0]  ;;  %v629_v15 = vld [vmem:[%s1109_s1 + $0x20] sm:$0xf]  ;;  %v748_v16 = vld [vmem:[%s1109_s1 + $0x24] sm:$0xf0] }
   0x5   :  { %v638_v14 = vor.u32 %v750_v13, %v637_v12  ;;  %v630_v17 = vor.u32 %v748_v16, %v629_v15  ;;  %v621_v18 = vld [vmem:[%s1109_s1 + $0x10] sm:$0xf]  ;;  %v746_v19 = vld [vmem:[%s1109_s1 + $0x14] sm:$0xf0]  ;;  %v613_v21 = vld [vmem:[%s1109_s1] sm:$0xf] }
   0x6   :  { %v622_v20 = vor.u32 %v746_v19, %v621_v18  ;;  %v744_v22 = vld [vmem:[%s1109_s1 + $0x4] sm:$0xf0]  ;;  %v757_v23 = vld [vmem:[%s1109_s1 + $0x74] sm:$0xf]  ;;  %v671_v24 = vld [vmem:[%s1109_s1 + $0x78] sm:$0xf0] }
   0x7   :  { %v614_v25 = vor.u32 %v744_v22, %v613_v21  ;;  %v674_v26 = vor.u32 %v757_v23, %v671_v24  ;;  %v755_v27 = vld [vmem:[%s1109_s1 + $0x64] sm:$0xf]  ;;  %v663_v28 = vld [vmem:[%s1109_s1 + $0x68] sm:$0xf0]  ;;  %v741_v29 = vld [vmem:[%s1110_s0 + $0x10] sm:$0xff] }
   0x8   :  { %776 = vmatpush.bf16.msra.mxu1 %v662_v5  ;;  %155 = vmatpush.bf16.msra.mxu0 %v662_v5  ;;  %v739_v30 = vld [vmem:[%s1110_s0] sm:$0xff]  ;;  %v666_v31 = vor.u32 %v755_v27, %v663_v28  ;;  %v753_v32 = vld [vmem:[%s1109_s1 + $0x54] sm:$0xf]  ;;  %v655_v33 = vld [vmem:[%s1109_s1 + $0x58] sm:$0xf0] }
   0x9   :  { %v658_v34 = vor.u32 %v753_v32, %v655_v33  ;;  %v751_v35 = vld [vmem:[%s1109_s1 + $0x44] sm:$0xf]  ;;  %v647_v36 = vld [vmem:[%s1109_s1 + $0x48] sm:$0xf0]  ;;  %v749_v38 = vld [vmem:[%s1109_s1 + $0x34] sm:$0xf] }
   0xa   :  { %v650_v37 = vor.u32 %v751_v35, %v647_v36  ;;  %v639_v39 = vld [vmem:[%s1109_s1 + $0x38] sm:$0xf0]  ;;  %v747_v41 = vld [vmem:[%s1109_s1 + $0x24] sm:$0xf]  ;;  %v631_v42 = vld [vmem:[%s1109_s1 + $0x28] sm:$0xf0] }
   0xb   :  { %v642_v40 = vor.u32 %v749_v38, %v639_v39  ;;  %v742_v43 = vld [vmem:[%s1110_s0 + $0x18] sm:$0xff]  ;;  %v740_v44 = vld [vmem:[%s1110_s0 + $0x8] sm:$0xff]  ;;  %v634_v45 = vor.u32 %v747_v41, %v631_v42  ;;  %v745_v46 = vld [vmem:[%s1109_s1 + $0x14] sm:$0xf] }
   0xc   :  { %777 = vmatpush.bf16.msra.mxu1 %v654_v8  ;;  %156 = vmatpush.bf16.msra.mxu0 %v654_v8  ;;  %v623_v47 = vld [vmem:[%s1109_s1 + $0x18] sm:$0xf0]  ;;  %v743_v49 = vld [vmem:[%s1109_s1 + $0x4] sm:$0xf]  ;;  %v615_v50 = vld [vmem:[%s1109_s1 + $0x8] sm:$0xf0] }
   0xd   :  { %v626_v48 = vor.u32 %v745_v46, %v623_v47  ;;  %v618_v51 = vor.u32 %v743_v49, %v615_v50  ;;  %v251_v52 = vld [vmem:[%s1111_s2 + $0x78] sm:$0xff]  ;;  %v250_v53 = vld [vmem:[%s1111_s2 + $0x70] sm:$0xff]  ;;  %v249_v54 = vld [vmem:[%s1111_s2 + $0x68] sm:$0xff] }
   0xe   :  { %252 = vmatpush.msra.mxu2 %v251_v52  ;;  %v248_v55 = vld [vmem:[%s1111_s2 + $0x60] sm:$0xff]  ;;  %v247_v56 = vld [vmem:[%s1111_s2 + $0x58] sm:$0xff]  ;;  %v246_v57 = vld [vmem:[%s1111_s2 + $0x50] sm:$0xff] }
   0xf   :  { %v245_v58 = vld [vmem:[%s1111_s2 + $0x48] sm:$0xff]  ;;  %v244_v59 = vld [vmem:[%s1111_s2 + $0x40] sm:$0xff]  ;;  %v243_v60 = vld [vmem:[%s1111_s2 + $0x38] sm:$0xff] }
  0x10   :  { %778 = vmatpush.bf16.msra.mxu1 %v646_v11  ;;  %157 = vmatpush.bf16.msra.mxu0 %v646_v11  ;;  %v242_v61 = vld [vmem:[%s1111_s2 + $0x30] sm:$0xff]  ;;  %v241_v62 = vld [vmem:[%s1111_s2 + $0x28] sm:$0xff]  ;;  %v240_v63 = vld [vmem:[%s1111_s2 + $0x20] sm:$0xff] }
  0x11   :  { %253 = vmatpush.msra.mxu2 %v250_v53  ;;  %v239_v0 = vld [vmem:[%s1111_s2 + $0x18] sm:$0xff]  ;;  %v238_v1 = vld [vmem:[%s1111_s2 + $0x10] sm:$0xff]  ;;  %v237_v3 = vld [vmem:[%s1111_s2 + $0x8] sm:$0xff] }
  0x12   :  { %v236_v4 = vld [vmem:[%s1111_s2] sm:$0xff]  ;;  %v766_v28 = vld [vmem:[%s1112_s3 + $0x38] sm:$0xff]  ;;  %v761_v49 = vld [vmem:[%s1112_s3 + $0x10] sm:$0xff] }
  0x13   :  { %254 = vmatpush.msra.mxu2 %v249_v54  ;;  %381 = vmatpush.bf16.msra.mxu3 %v766_v28  ;;  %v763_v47 = vld [vmem:[%s1112_s3 + $0x20] sm:$0xff]  ;;  %v760_v50 = vld [vmem:[%s1112_s3 + $0x8] sm:$0xff]  ;;  %v770_v28 = vld [vmem:[%s1115_s5 + $0x18] sm:$0xff] }
  0x14   :  { %779 = vmatpush.bf16.msra.mxu1 %v638_v14  ;;  %158 = vmatpush.bf16.msra.mxu0 %v638_v14 }
  0x15   :  { %255 = vmatpush.msra.mxu2 %v248_v55 }
  0x17   :  { %256 = vmatpush.msra.mxu2 %v247_v56 }
  0x18   :  { %780 = vmatpush.bf16.msra.mxu1 %v630_v17  ;;  %159 = vmatpush.bf16.msra.mxu0 %v630_v17 }
  0x19   :  { %257 = vmatpush.msra.mxu2 %v246_v57 }
  0x1b   :  { %258 = vmatpush.msra.mxu2 %v245_v58 }
  0x1c   :  { %781 = vmatpush.bf16.msra.mxu1 %v622_v20  ;;  %160 = vmatpush.bf16.msra.mxu0 %v622_v20 }
  0x1d   :  { %259 = vmatpush.msra.mxu2 %v244_v59 }
  0x1f   :  { %260 = vmatpush.msra.mxu2 %v243_v60 }
  0x20   :  { %782 = vmatpush.bf16.msra.mxu1 %v614_v25  ;;  %161 = vmatpush.bf16.msra.mxu0 %v614_v25 }
  0x21   :  { %261 = vmatpush.msra.mxu2 %v242_v61 }
  0x23   :  { %172 = vmatmul.bf16.vlgmr.msra.gmra.mxu1 %v741_v29  ;;  %162 = vmatmul.bf16.vlgmr.msra.gmra.mxu0 %v739_v30 }
  0x24   :  { %183 = vmatpush.bf16.msrb.mxu1 %v674_v26  ;;  %262 = vmatpush.msra.mxu2 %v241_v62 }
  0x26   :  { %263 = vmatpush.msra.mxu2 %v240_v63 }
  0x28   :  { %184 = vmatpush.bf16.msrb.mxu1 %v666_v31  ;;  %264 = vmatpush.msra.mxu2 %v239_v0 }
  0x2a   :  { %265 = vmatpush.msra.mxu2 %v238_v1 }
  0x2c   :  { %185 = vmatpush.bf16.msrb.mxu1 %v658_v34  ;;  %266 = vmatpush.msra.mxu2 %v237_v3  ;;  %v764_v34 = vld [vmem:[%s1112_s3 + $0x28] sm:$0xff] }
  0x2e   :  { %267 = vmatpush.msra.mxu2 %v236_v4 }
  0x30   :  { %186 = vmatpush.bf16.msrb.mxu1 %v650_v37 }
  0x33   :  { %177 = vmatmul.bf16.gmra.mxu1 %v742_v43  ;;  %167 = vmatmul.bf16.gmra.mxu0 %v740_v44 }
  0x34   :  { %187 = vmatpush.bf16.msrb.mxu1 %v642_v40 }
  0x38   :  { %188 = vmatpush.bf16.msrb.mxu1 %v634_v45 }
  0x3c   :  { %189 = vmatpush.bf16.msrb.mxu1 %v626_v48  ;;  %v762_v48 = vld [vmem:[%s1112_s3 + $0x18] sm:$0xff] }
  0x40   :  { %190 = vmatpush.bf16.msrb.mxu1 %v618_v51  ;;  %v759_v51 = vld [vmem:[%s1112_s3] sm:$0xff] }
  0x43   :  { %191 = vmatmul.bf16.vlgmr.msrb.gmra.mxu1 %v739_v30 }
  0x53   :  { %196 = vmatmul.bf16.gmra.mxu1 %v740_v44 }
  0x63   :  { %201 = vmatmul.bf16.gmra.mxu1 %v741_v29  ;;  %v765_v29 = vld [vmem:[%s1112_s3 + $0x30] sm:$0xff] }
  0x64   :  { %382 = vmatpush.bf16.msra.mxu3 %v765_v29  ;;  %v769_v29 = vld [vmem:[%s1115_s5 + $0x10] sm:$0xff] }
  0x68   :  { %383 = vmatpush.bf16.msra.mxu3 %v764_v34 }
  0x6c   :  { %384 = vmatpush.bf16.msra.mxu3 %v763_v47 }
  0x70   :  { %385 = vmatpush.bf16.msra.mxu3 %v762_v48 }
  0x73   :  { %206 = vmatmul.bf16.gmra.mxu1 %v742_v43 }
  0x74   :  { %386 = vmatpush.bf16.msra.mxu3 %v761_v49 }
  0x78   :  { %387 = vmatpush.bf16.msra.mxu3 %v760_v50 }
  0x7c   :  { %388 = vmatpush.bf16.msra.mxu3 %v759_v51 }
  0xa0   :  { %v173_v2 = vpop.f32.mrf.mxu1  ;;  %v163_v7 = vpop.f32.mrf.mxu0 }
  0xa1   :  { %v212_v9 = vmul.f32 %v163_v7, %v163_v7  ;;  %v216_v31 = vmul.f32 %v173_v2, %v173_v2 }
  0xa8   :  { %v175_v5 = vpop.f32.mrf.mxu1  ;;  %v165_v12 = vpop.f32.mrf.mxu0 }
  0xa9   :  { %v213_v15 = vmul.f32 %v165_v12, %v165_v12  ;;  %v217_v36 = vmul.f32 %v175_v5, %v175_v5 }
  0xb0   :  { %v178_v6 = vpop.f32.mrf.mxu1  ;;  %v168_v18 = vpop.f32.mrf.mxu0 }
  0xb1   :  { %v214_v19 = vmul.f32 %v168_v18, %v168_v18  ;;  %v218_v40 = vmul.f32 %v178_v6, %v178_v6 }
  0xb8   :  { %v180_v8 = vpop.f32.mrf.mxu1  ;;  %v170_v23 = vpop.f32.mrf.mxu0 }
  0xb9   :  { %v215_v25 = vmul.f32 %v170_v23, %v170_v23  ;;  %v219_v44 = vmul.f32 %v180_v8, %v180_v8 }
  0xc0   :  { %v192_v10 = vpop.f32.mrf.mxu1 }
  0xc1   :  { %v220_v11 = vmul.f32 %v192_v10, %v192_v10 }
  0xc3   :  { %v228_v13 = vadd.f32 %v220_v11, %v212_v9 }
  0xc5   :  { %268 = vmatmul.f32.vlgmr.msra.gmra.mxu2 %v228_v13 }
  0xc8   :  { %v194_v14 = vpop.f32.mrf.mxu1 }
  0xc9   :  { %v221_v16 = vmul.f32 %v194_v14, %v194_v14 }
  0xcb   :  { %v229_v17 = vadd.f32 %v221_v16, %v213_v15 }
  0xcd   :  { %271 = vmatmul.f32.gmra.mxu2 %v229_v17 }
  0xd0   :  { %v197_v20 = vpop.f32.mrf.mxu1 }
  0xd1   :  { %v222_v21 = vmul.f32 %v197_v20, %v197_v20 }
  0xd3   :  { %v230_v22 = vadd.f32 %v222_v21, %v214_v19 }
  0xd5   :  { %274 = vmatmul.f32.gmra.mxu2 %v230_v22 }
  0xd8   :  { %v199_v24 = vpop.f32.mrf.mxu1 }
  0xd9   :  { %v223_v26 = vmul.f32 %v199_v24, %v199_v24  ;;  %v774_v24 = vld [vmem:[%s1115_s5 + $0x38] sm:$0xff] }
  0xda   :  { %554 = vmatpush.bf16.msrb.mxu0 %v774_v24  ;;  %783 = vmatpush.bf16.msrb.mxu2 %v774_v24 }
  0xdb   :  { %v231_v27 = vadd.f32 %v223_v26, %v215_v25  ;;  %v773_v25 = vld [vmem:[%s1115_s5 + $0x30] sm:$0xff]  ;;  %v772_v26 = vld [vmem:[%s1115_s5 + $0x28] sm:$0xff] }
  0xdd   :  { %277 = vmatmul.f32.gmra.mxu2 %v231_v27  ;;  %v771_v27 = vld [vmem:[%s1115_s5 + $0x20] sm:$0xff] }
  0xde   :  { %555 = vmatpush.bf16.msrb.mxu0 %v773_v25  ;;  %784 = vmatpush.bf16.msrb.mxu2 %v773_v25 }
  0xe0   :  { %v202_v30 = vpop.f32.mrf.mxu1 }
  0xe1   :  { %v224_v32 = vmul.f32 %v202_v30, %v202_v30  ;;  %v768_v30 = vld [vmem:[%s1115_s5 + $0x8] sm:$0xff] }
  0xe2   :  { %556 = vmatpush.bf16.msrb.mxu0 %v772_v26  ;;  %785 = vmatpush.bf16.msrb.mxu2 %v772_v26 }
  0xe3   :  { %v232_v33 = vadd.f32 %v224_v32, %v216_v31  ;;  %v767_v31 = vld [vmem:[%s1115_s5] sm:$0xff] }
  0xe4   :  { %v1072_v32 = vld [vmem:[%s1113_s4] ss:$0 sm:$0xff] }
  0xe5   :  { %280 = vmatmul.f32.gmra.mxu2 %v232_v33 }
  0xe6   :  { %557 = vmatpush.bf16.msrb.mxu0 %v771_v27  ;;  %786 = vmatpush.bf16.msrb.mxu2 %v771_v27 }
  0xe8   :  { %v204_v35 = vpop.f32.mrf.mxu1 }
  0xe9   :  { %v225_v37 = vmul.f32 %v204_v35, %v204_v35 }
  0xea   :  { %558 = vmatpush.bf16.msrb.mxu0 %v770_v28  ;;  %787 = vmatpush.bf16.msrb.mxu2 %v770_v28 }
  0xeb   :  { %v233_v38 = vadd.f32 %v225_v37, %v217_v36 }
  0xed   :  { %283 = vmatmul.f32.gmra.mxu2 %v233_v38 }
  0xee   :  { %559 = vmatpush.bf16.msrb.mxu0 %v769_v29  ;;  %788 = vmatpush.bf16.msrb.mxu2 %v769_v29 }
  0xf0   :  { %v207_v39 = vpop.f32.mrf.mxu1 }
  0xf1   :  { %v226_v41 = vmul.f32 %v207_v39, %v207_v39 }
  0xf2   :  { %560 = vmatpush.bf16.msrb.mxu0 %v768_v30  ;;  %789 = vmatpush.bf16.msrb.mxu2 %v768_v30 }
  0xf3   :  { %v234_v42 = vadd.f32 %v226_v41, %v218_v40 }
  0xf5   :  { %286 = vmatmul.f32.gmra.mxu2 %v234_v42 }
  0xf6   :  { %561 = vmatpush.bf16.msrb.mxu0 %v767_v31  ;;  %790 = vmatpush.bf16.msrb.mxu2 %v767_v31 }
  0xf8   :  { %v209_v43 = vpop.f32.mrf.mxu1 }
  0xf9   :  { %v227_v45 = vmul.f32 %v209_v43, %v209_v43 }
  0xfb   :  { %v235_v46 = vadd.f32 %v227_v45, %v219_v44 }
  0xfd   :  { %289 = vmatmul.f32.gmra.mxu2 %v235_v46 }
 0x148   :  { %v269_v52 = vpop.f32.mrf.mxu2 }
 0x149   :  { %v270_v53 = vadd.f32 1e-06, %v269_v52 }
 0x14b   :  { %793 = vlog2.f32 %v270_v53 }
 0x150   :  { %v272_v54 = vpop.f32.mrf.mxu2 }
 0x151   :  { %v273_v55 = vadd.f32 1e-06, %v272_v54  ;;  %v794_v56 = vpop.eup %793 }
 0x152   :  { %v294_v59 = vmul.f32 0.6931472, %v794_v56 }
 0x153   :  { %795 = vlog2.f32 %v273_v55 }
 0x158   :  { %v275_v57 = vpop.f32.mrf.mxu2 }
 0x159   :  { %v796_v58 = vpop.eup %795  ;;  %v276_v62 = vadd.f32 1e-06, %v275_v57 }
 0x15a   :  { %v296_v60 = vmul.f32 0.6931472, %v796_v58 }
 0x15b   :  { %797 = vlog2.f32 %v276_v62 }
 0x15c   :  { %v309_v61 = vpack.c.bf16 %v296_v60, %v294_v59 }
 0x15e   :  { %389 = vmatmul.bf16.vlgmr.msra.gmra.mxu3 %v309_v61 }
 0x160   :  { %v278_v63 = vpop.f32.mrf.mxu2 }
 0x161   :  { %v279_v0 = vadd.f32 1e-06, %v278_v63  ;;  %v798_v1 = vpop.eup %797 }
 0x162   :  { %v298_v4 = vmul.f32 0.6931472, %v798_v1 }
 0x163   :  { %799 = vlog2.f32 %v279_v0 }
 0x168   :  { %v281_v2 = vpop.f32.mrf.mxu2 }
 0x169   :  { %v800_v3 = vpop.eup %799  ;;  %v282_v7 = vadd.f32 1e-06, %v281_v2 }
 0x16a   :  { %v300_v5 = vmul.f32 0.6931472, %v800_v3 }
 0x16b   :  { %801 = vlog2.f32 %v282_v7 }
 0x16c   :  { %v310_v6 = vpack.c.bf16 %v300_v5, %v298_v4 }
 0x16e   :  { %394 = vmatmul.bf16.gmra.mxu3 %v310_v6 }
 0x170   :  { %v284_v8 = vpop.f32.mrf.mxu2 }
 0x171   :  { %v285_v9 = vadd.f32 1e-06, %v284_v8  ;;  %v802_v10 = vpop.eup %801 }
 0x172   :  { %v302_v13 = vmul.f32 0.6931472, %v802_v10 }
 0x173   :  { %803 = vlog2.f32 %v285_v9 }
 0x178   :  { %v287_v11 = vpop.f32.mrf.mxu2 }
 0x179   :  { %v804_v12 = vpop.eup %803  ;;  %v288_v16 = vadd.f32 1e-06, %v287_v11 }
 0x17a   :  { %v304_v14 = vmul.f32 0.6931472, %v804_v12 }
 0x17b   :  { %805 = vlog2.f32 %v288_v16 }
 0x17c   :  { %v311_v15 = vpack.c.bf16 %v304_v14, %v302_v13 }
 0x17e   :  { %399 = vmatmul.bf16.gmra.mxu3 %v311_v15 }
 0x180   :  { %v290_v17 = vpop.f32.mrf.mxu2 }
 0x181   :  { %v291_v18 = vadd.f32 1e-06, %v290_v17  ;;  %v806_v19 = vpop.eup %805 }
 0x182   :  { %v306_v21 = vmul.f32 0.6931472, %v806_v19 }
 0x183   :  { %807 = vlog2.f32 %v291_v18 }
 0x189   :  { %v808_v20 = vpop.eup %807 }
 0x18a   :  { %v308_v22 = vmul.f32 0.6931472, %v808_v20 }
 0x18c   :  { %v312_v23 = vpack.c.bf16 %v308_v22, %v306_v21 }
 0x18e   :  { %404 = vmatmul.bf16.gmra.mxu3 %v312_v23 }
 0x1e1   :  { %v390_v33 = vpop.f32.mrf.mxu3 }
 0x1e2   :  { %v391_v34 = vadd.f32 %v1072_v32, %v390_v33 }
 0x1e4   :  { %v418_v35 = vmul.f32 0.044715, %v391_v34  ;;  %v410_v59 = vmul.f32 0.5, %v391_v34 }
 0x1e6   :  { %v426_v36 = vmul.f32 %v418_v35, %v391_v34 }
 0x1e8   :  { %v434_v37 = vmul.f32 %v426_v36, %v391_v34 }
 0x1e9   :  { %v392_v38 = vpop.f32.mrf.mxu3 }
 0x1ea   :  { %v393_v39 = vadd.f32 %v1072_v32, %v392_v38  ;;  %v442_v40 = vadd.f32 %v434_v37, %v391_v34 }
 0x1ec   :  { %v419_v41 = vmul.f32 0.044715, %v393_v39  ;;  %v450_v43 = vmul.f32 0.7978846, %v442_v40  ;;  %v411_v60 = vmul.f32 0.5, %v393_v39 }
 0x1ee   :  { %v427_v42 = vmul.f32 %v419_v41, %v393_v39  ;;  %809 = vtanh.f32 %v450_v43 }
 0x1f0   :  { %v435_v44 = vmul.f32 %v427_v42, %v393_v39 }
 0x1f1   :  { %v395_v45 = vpop.f32.mrf.mxu3 }
 0x1f2   :  { %v396_v46 = vadd.f32 %v1072_v32, %v395_v45  ;;  %v443_v47 = vadd.f32 %v435_v44, %v393_v39 }
 0x1f4   :  { %v420_v48 = vmul.f32 0.044715, %v396_v46  ;;  %v451_v49 = vmul.f32 0.7978846, %v443_v47  ;;  %v810_v51 = vpop.eup %809  ;;  %v412_v18 = vmul.f32 0.5, %v396_v46 }
 0x1f5   :  { %v466_v56 = vadd.f32 1.0, %v810_v51 }
 0x1f6   :  { %811 = vtanh.f32 %v451_v49  ;;  %v428_v50 = vmul.f32 %v420_v48, %v396_v46 }
 0x1f7   :  { %v474_v0 = vmul.f32 %v466_v56, %v410_v59 }
 0x1f8   :  { %v436_v52 = vmul.f32 %v428_v50, %v396_v46 }
 0x1f9   :  { %v397_v53 = vpop.f32.mrf.mxu3 }
 0x1fa   :  { %v398_v54 = vadd.f32 %v1072_v32, %v397_v53  ;;  %v444_v55 = vadd.f32 %v436_v52, %v396_v46 }
 0x1fc   :  { %v812_v57 = vpop.eup %811  ;;  %v421_v58 = vmul.f32 0.044715, %v398_v54  ;;  %v452_v63 = vmul.f32 0.7978846, %v444_v55  ;;  %v413_v19 = vmul.f32 0.5, %v398_v54 }
 0x1fd   :  { %v467_v61 = vadd.f32 1.0, %v812_v57 }
 0x1fe   :  { %v429_v62 = vmul.f32 %v421_v58, %v398_v54  ;;  %813 = vtanh.f32 %v452_v63 }
 0x1ff   :  { %v475_v1 = vmul.f32 %v467_v61, %v411_v60  ;;  %v792_v61 = vld [vmem:[%s1114_s6] ss:$0 sm:$0xff] }
 0x200   :  { %v437_v2 = vmul.f32 %v429_v62, %v398_v54 }
 0x201   :  { %v400_v3 = vpop.f32.mrf.mxu3  ;;  %v482_v4 = vpack.c.bf16 %v475_v1, %v474_v0 }
 0x202   :  { %v401_v5 = vadd.f32 %v1072_v32, %v400_v3  ;;  %v445_v6 = vadd.f32 %v437_v2, %v398_v54 }
 0x203   :  { %562 = vmatmul.bf16.vlgmr.msrb.gmra.mxu0 %v482_v4 }
 0x204   :  { %v422_v7 = vmul.f32 0.044715, %v401_v5  ;;  %v453_v8 = vmul.f32 0.7978846, %v445_v6  ;;  %v814_v10 = vpop.eup %813  ;;  %v414_v42 = vmul.f32 0.5, %v401_v5 }
 0x205   :  { %v468_v15 = vadd.f32 1.0, %v814_v10 }
 0x206   :  { %815 = vtanh.f32 %v453_v8  ;;  %v430_v9 = vmul.f32 %v422_v7, %v401_v5 }
 0x207   :  { %v476_v23 = vmul.f32 %v468_v15, %v412_v18 }
 0x208   :  { %v438_v11 = vmul.f32 %v430_v9, %v401_v5 }
 0x209   :  { %v402_v12 = vpop.f32.mrf.mxu3 }
 0x20a   :  { %v403_v13 = vadd.f32 %v1072_v32, %v402_v12  ;;  %v446_v14 = vadd.f32 %v438_v11, %v401_v5 }
 0x20c   :  { %v816_v16 = vpop.eup %815  ;;  %v423_v17 = vmul.f32 0.044715, %v403_v13  ;;  %v454_v22 = vmul.f32 0.7978846, %v446_v14  ;;  %v415_v43 = vmul.f32 0.5, %v403_v13 }
 0x20d   :  { %v469_v20 = vadd.f32 1.0, %v816_v16 }
 0x20e   :  { %v431_v21 = vmul.f32 %v423_v17, %v403_v13  ;;  %817 = vtanh.f32 %v454_v22 }
 0x20f   :  { %v477_v24 = vmul.f32 %v469_v20, %v413_v19 }
 0x210   :  { %v439_v25 = vmul.f32 %v431_v21, %v403_v13 }
 0x211   :  { %v405_v26 = vpop.f32.mrf.mxu3  ;;  %v483_v27 = vpack.c.bf16 %v477_v24, %v476_v23 }
 0x212   :  { %v406_v28 = vadd.f32 %v1072_v32, %v405_v26  ;;  %v447_v29 = vadd.f32 %v439_v25, %v403_v13 }
 0x213   :  { %567 = vmatmul.bf16.gmra.mxu0 %v483_v27 }
 0x214   :  { %v424_v30 = vmul.f32 0.044715, %v406_v28  ;;  %v455_v31 = vmul.f32 0.7978846, %v447_v29  ;;  %v818_v34 = vpop.eup %817  ;;  %v416_v55 = vmul.f32 0.5, %v406_v28 }
 0x215   :  { %v470_v39 = vadd.f32 1.0, %v818_v34 }
 0x216   :  { %v432_v33 = vmul.f32 %v424_v30, %v406_v28  ;;  %819 = vtanh.f32 %v455_v31 }
 0x217   :  { %v478_v47 = vmul.f32 %v470_v39, %v414_v42 }
 0x218   :  { %v440_v35 = vmul.f32 %v432_v33, %v406_v28 }
 0x219   :  { %v407_v36 = vpop.f32.mrf.mxu3 }
 0x21a   :  { %v408_v37 = vadd.f32 %v1072_v32, %v407_v36  ;;  %v448_v38 = vadd.f32 %v440_v35, %v406_v28 }
 0x21c   :  { %v820_v40 = vpop.eup %819  ;;  %v425_v41 = vmul.f32 0.044715, %v408_v37  ;;  %v456_v46 = vmul.f32 0.7978846, %v448_v38  ;;  %v417_v56 = vmul.f32 0.5, %v408_v37 }
 0x21d   :  { %v471_v44 = vadd.f32 1.0, %v820_v40 }
 0x21e   :  { %v433_v45 = vmul.f32 %v425_v41, %v408_v37  ;;  %821 = vtanh.f32 %v456_v46 }
 0x21f   :  { %v479_v48 = vmul.f32 %v471_v44, %v415_v43 }
 0x220   :  { %v441_v49 = vmul.f32 %v433_v45, %v408_v37 }
 0x221   :  { %v484_v50 = vpack.c.bf16 %v479_v48, %v478_v47 }
 0x222   :  { %v449_v51 = vadd.f32 %v441_v49, %v408_v37 }
 0x223   :  { %572 = vmatmul.bf16.gmra.mxu0 %v484_v50 }
 0x224   :  { %v457_v52 = vmul.f32 0.7978846, %v449_v51  ;;  %v822_v53 = vpop.eup %821 }
 0x225   :  { %v472_v32 = vadd.f32 1.0, %v822_v53 }
 0x226   :  { %823 = vtanh.f32 %v457_v52 }
 0x227   :  { %v480_v58 = vmul.f32 %v472_v32, %v416_v55 }
 0x22c   :  { %v824_v54 = vpop.eup %823 }
 0x22d   :  { %v473_v57 = vadd.f32 1.0, %v824_v54 }
 0x22f   :  { %v481_v59 = vmul.f32 %v473_v57, %v417_v56 }
 0x231   :  { %v485_v60 = vpack.c.bf16 %v481_v59, %v480_v58 }
 0x233   :  { %577 = vmatmul.bf16.vlgmr.msrb.gmra.mxu2 %v485_v60 }
 0x280   :  { %v563_v62 = vpop.f32.mrf.mxu0 }
 0x281   :  { %v564_v63 = vadd.f32 %v792_v61, %v563_v62 }
 0x283   :  { %583 = vst [vmem:[%s1116_s7] sm:$0xff] %v564_v63 }
 0x288   :  { %v565_v0 = vpop.f32.mrf.mxu0 }
 0x289   :  { %v566_v1 = vadd.f32 %v792_v61, %v565_v0 }
 0x28b   :  { %584 = vst [vmem:[%s1116_s7 + $0x8] sm:$0xff] %v566_v1 }
 0x290   :  { %v568_v2 = vpop.f32.mrf.mxu0 }
 0x291   :  { %v569_v3 = vadd.f32 %v792_v61, %v568_v2 }
 0x293   :  { %585 = vst [vmem:[%s1116_s7 + $0x10] sm:$0xff] %v569_v3 }
 0x298   :  { %v570_v4 = vpop.f32.mrf.mxu0 }
 0x299   :  { %v571_v5 = vadd.f32 %v792_v61, %v570_v4 }
 0x29b   :  { %586 = vst [vmem:[%s1116_s7 + $0x18] sm:$0xff] %v571_v5 }
 0x2a0   :  { %v573_v6 = vpop.f32.mrf.mxu0 }
 0x2a1   :  { %v574_v7 = vadd.f32 %v792_v61, %v573_v6 }
 0x2a3   :  { %587 = vst [vmem:[%s1116_s7 + $0x20] sm:$0xff] %v574_v7 }
 0x2a8   :  { %v575_v8 = vpop.f32.mrf.mxu0 }
 0x2a9   :  { %v576_v9 = vadd.f32 %v792_v61, %v575_v8 }
 0x2ab   :  { %588 = vst [vmem:[%s1116_s7 + $0x28] sm:$0xff] %v576_v9 }
 0x2b6   :  { %v578_v10 = vpop.f32.mrf.mxu2 }
 0x2b7   :  { %v579_v11 = vadd.f32 %v792_v61, %v578_v10 }
 0x2b9   :  { %589 = vst [vmem:[%s1116_s7 + $0x30] sm:$0xff] %v579_v11 }
 0x2be   :  { %v580_v12 = vpop.f32.mrf.mxu2 }
 0x2bf   :  { %v581_v13 = vadd.f32 %v792_v61, %v580_v12 }
 0x2c1   :  { %590 = vst [vmem:[%s1116_s7 + $0x38] sm:$0xff] %v581_v13 }

// kernel: muq_forward.8
= control target key start
LH: loop header
LB: loop body
LE: loop exit
PB: predicated region body
PF: predicated region fallthrough
CT: control target
= control target key end

     0   :  { %v663_v7 = vmov 128.0   ;;  %s1036_s0 = inlined_call_operand.vmem [shape: f32[64,128], index: 0, kind: input, shape index: {}]   ;;  %s1037_s1 = inlined_call_operand.vmem [shape: f32[1,128], index: 1, kind: input, shape index: {}]   ;;  %s1038_s2 = inlined_call_operand.vmem [shape: f32[1,128], index: 2, kind: input, shape index: {}]   ;;  %s1039_s3 = inlined_call_operand.vmem [shape: bf16[128,384], index: 3, kind: input, shape index: {}]   ;;  %s1040_s4 = inlined_call_operand.vmem [shape: f32[1,384], index: 4, kind: input, shape index: {}]   ;;  %s1041_s5 = inlined_call_operand.vmem [shape: bf16[64,384], index: 5, kind: output, shape index: {}]  }
   0x1   :  { %v24_v0 = vld [vmem:[%s1036_s0 + $0x20] sm:$0xff]  ;;  %v22_v1 = vld [vmem:[%s1036_s0 + $0x10] sm:$0xff]  ;;  %v25_v3 = vld [vmem:[%s1036_s0 + $0x28] sm:$0xff]  ;;  %645 = vrcp.f32 %v663_v7 }
   0x2   :  { %v20_v2 = vld [vmem:[%s1036_s0] sm:$0xff]  ;;  %38 = vadd.xlane.f32.xlu2 %v24_v0  ;;  %34 = vadd.xlane.f32.xlu1 %v22_v1  ;;  %v23_v4 = vld [vmem:[%s1036_s0 + $0x18] sm:$0xff]  ;;  %v21_v5 = vld [vmem:[%s1036_s0 + $0x8] sm:$0xff] }
   0x3   :  { %30 = vadd.xlane.f32.xlu0 %v20_v2  ;;  %v26_v6 = vld [vmem:[%s1036_s0 + $0x30] sm:$0xff]  ;;  %v735_v30 = vld [vmem:[%s1036_s0 + $0x38] sm:$0xff]  ;;  %v600_v43 = vld [vmem:[%s1039_s3 + $0xa8] sm:$0xf] }
   0x4   :  { %v632_v44 = vld [vmem:[%s1039_s3 + $0xb0] sm:$0xf0]  ;;  %v631_v45 = vld [vmem:[%s1039_s3 + $0xac] sm:$0xf]  ;;  %v602_v47 = vld [vmem:[%s1039_s3 + $0xb4] sm:$0xf0] }
   0x5   :  { %v601_v46 = vor.u32 %v632_v44, %v600_v43  ;;  %v608_v48 = vld [vmem:[%s1039_s3 + $0xb0] sm:$0xf]  ;;  %v633_v49 = vld [vmem:[%s1039_s3 + $0xb8] sm:$0xf0]  ;;  %v605_v50 = vor.u32 %v631_v45, %v602_v47  ;;  %v628_v54 = vld [vmem:[%s1039_s3 + $0x94] sm:$0xf] }
   0x6   :  { %v609_v51 = vor.u32 %v633_v49, %v608_v48  ;;  %v588_v52 = vld [vmem:[%s1039_s3 + $0x90] sm:$0xf]  ;;  %v629_v53 = vld [vmem:[%s1039_s3 + $0x98] sm:$0xf0]  ;;  %v590_v56 = vld [vmem:[%s1039_s3 + $0x9c] sm:$0xf0] }
   0x7   :  { %v646_v8 = vpop.eup %645  ;;  %391 = vmatpush.bf16.msra.mxu0 %v601_v46  ;;  %634 = vmatpush.bf16.msra.mxu3 %v601_v46  ;;  %v589_v55 = vor.u32 %v629_v53, %v588_v52  ;;  %v596_v57 = vld [vmem:[%s1039_s3 + $0x98] sm:$0xf]  ;;  %v630_v58 = vld [vmem:[%s1039_s3 + $0xa0] sm:$0xf0]  ;;  %v593_v59 = vor.u32 %v628_v54, %v590_v56  ;;  %v625_v63 = vld [vmem:[%s1039_s3 + $0x7c] sm:$0xf] }
   0x8   :  { %v47_v9 = vmul.f32 128.0, %v646_v8  ;;  %vm51_vm0 = vweird.f32 %v646_v8  ;;  %420 = vmatpush.bf16.msra.mxu1 %v605_v50  ;;  %449 = vmatpush.bf16.msra.mxu2 %v609_v51  ;;  %v597_v60 = vor.u32 %v630_v58, %v596_v57  ;;  %v576_v61 = vld [vmem:[%s1039_s3 + $0x78] sm:$0xf]  ;;  %v626_v62 = vld [vmem:[%s1039_s3 + $0x80] sm:$0xf0] }
   0x9   :  { %v623_v7 = vld [vmem:[%s1039_s3 + $0x68] sm:$0xf0]  ;;  %v614_v43 = vld [vmem:[%s1039_s3 + $0x20] sm:$0xf0]  ;;  %v613_v44 = vld [vmem:[%s1039_s3 + $0x1c] sm:$0xf] }
   0xa   :  { %40 = vadd.xlane.f32.xlu2 %v25_v3  ;;  %36 = vadd.xlane.f32.xlu1 %v23_v4  ;;  %v48_v10 = vsub.f32 1.0, %v47_v9  ;;  %v530_v46 = vld [vmem:[%s1039_s3 + $0x24] sm:$0xf0]  ;;  %v536_v47 = vld [vmem:[%s1039_s3 + $0x20] sm:$0xf] }
   0xb   :  { %32 = vadd.xlane.f32.xlu0 %v21_v5  ;;  %392 = vmatpush.bf16.msra.mxu0 %v589_v55  ;;  %v615_v48 = vld [vmem:[%s1039_s3 + $0x28] sm:$0xf0]  ;;  %v533_v50 = vor.u32 %v613_v44, %v530_v46  ;;  %v516_v53 = vld [vmem:[%s1039_s3] sm:$0xf]  ;;  %v518_v58 = vld [vmem:[%s1039_s3 + $0xc] sm:$0xf0] }
   0xc   :  { %v49_v11 = vmul.f32 %v646_v8, %v48_v10  ;;  %635 = vmatpush.bf16.msra.mxu3 %v589_v55  ;;  %421 = vmatpush.bf16.msra.mxu1 %v593_v59  ;;  %v566_v10 = vld [vmem:[%s1039_s3 + $0x6c] sm:$0xf0]  ;;  %v537_v51 = vor.u32 %v615_v48, %v536_v47  ;;  %v611_v54 = vld [vmem:[%s1039_s3 + $0x8] sm:$0xf0]  ;;  %v610_v55 = vld [vmem:[%s1039_s3 + $0x4] sm:$0xf] }
   0xd   :  { %450 = vmatpush.bf16.msra.mxu2 %v597_v60  ;;  %v517_v57 = vor.u32 %v611_v54, %v516_v53  ;;  %v524_v59 = vld [vmem:[%s1039_s3 + $0x8] sm:$0xf]  ;;  %v521_v60 = vor.u32 %v610_v55, %v518_v58 }
   0xe   :  { %v50_v12 = vadd.f32 %v646_v8, %v49_v11  ;;  %v572_v11 = vld [vmem:[%s1039_s3 + $0x68] sm:$0xf] }
  0x10   :  { %v715_v13 = vsel %vm51_vm0, %v646_v8, %v50_v12  ;;  %v622_v8 = vld [vmem:[%s1039_s3 + $0x64] sm:$0xf]  ;;  %v624_v12 = vld [vmem:[%s1039_s3 + $0x70] sm:$0xf0] }
  0x12   :  { %42 = vadd.xlane.f32.xlu2 %v26_v6 }
  0x75   :  { %v39_v14 = vpop.xlane.xlu2 %38  ;;  %v35_v15 = vpop.xlane.xlu1 %34 }
  0x76   :  { %v31_v16 = vpop.xlane.xlu0 %30  ;;  %v57_v26 = vmul.f32 %v715_v13, %v39_v14  ;;  %v55_v27 = vmul.f32 %v715_v13, %v35_v15  ;;  %v569_v14 = vor.u32 %v622_v8, %v566_v10  ;;  %v573_v15 = vor.u32 %v624_v12, %v572_v11 }
  0x77   :  { %v53_v17 = vmul.f32 %v715_v13, %v31_v16  ;;  %v552_v16 = vld [vmem:[%s1039_s3 + $0x48] sm:$0xf] }
  0x78   :  { %v739_v32 = vsub.f32 %v24_v0, %v57_v26  ;;  %v741_v33 = vsub.f32 %v22_v1, %v55_v27  ;;  %v577_v0 = vor.u32 %v626_v62, %v576_v61  ;;  %v578_v1 = vld [vmem:[%s1039_s3 + $0x84] sm:$0xf0]  ;;  %v540_v27 = vld [vmem:[%s1039_s3 + $0x30] sm:$0xf]  ;;  %v612_v61 = vld [vmem:[%s1039_s3 + $0x10] sm:$0xf0] }
  0x79   :  { %v718_v18 = vsub.f32 %v20_v2, %v53_v17  ;;  %v584_v2 = vld [vmem:[%s1039_s3 + $0x80] sm:$0xf]  ;;  %v620_v17 = vld [vmem:[%s1039_s3 + $0x50] sm:$0xf0]  ;;  %v525_v62 = vor.u32 %v612_v61, %v524_v59 }
  0x7a   :  { %v73_v38 = vmul.f32 %v739_v32, %v739_v32  ;;  %v71_v39 = vmul.f32 %v741_v33, %v741_v33  ;;  %393 = vmatpush.bf16.msra.mxu0 %v577_v0  ;;  %636 = vmatpush.bf16.msra.mxu3 %v577_v0 }
  0x7b   :  { %v69_v19 = vmul.f32 %v718_v18, %v718_v18 }
  0x7d   :  { %77 = vadd.xlane.f32.xlu0 %v69_v19  ;;  %v41_v20 = vpop.xlane.xlu2 %40  ;;  %v37_v21 = vpop.xlane.xlu1 %36  ;;  %v619_v19 = vld [vmem:[%s1039_s3 + $0x4c] sm:$0xf] }
  0x7e   :  { %v56_v22 = vmul.f32 %v715_v13, %v37_v21  ;;  %v33_v23 = vpop.xlane.xlu0 %32  ;;  %v58_v37 = vmul.f32 %v715_v13, %v41_v20  ;;  %v553_v20 = vor.u32 %v620_v17, %v552_v16  ;;  %v554_v21 = vld [vmem:[%s1039_s3 + $0x54] sm:$0xf0] }
  0x7f   :  { %v54_v24 = vmul.f32 %v715_v13, %v33_v23  ;;  %v621_v23 = vld [vmem:[%s1039_s3 + $0x58] sm:$0xf0] }
  0x80   :  { %v724_v25 = vsub.f32 %v23_v4, %v56_v22  ;;  %v754_v41 = vsub.f32 %v25_v3, %v58_v37  ;;  %v627_v3 = vld [vmem:[%s1039_s3 + $0x88] sm:$0xf0]  ;;  %v581_v4 = vor.u32 %v625_v63, %v578_v1  ;;  %v560_v22 = vld [vmem:[%s1039_s3 + $0x50] sm:$0xf]  ;;  %v548_v37 = vld [vmem:[%s1039_s3 + $0x38] sm:$0xf] }
  0x81   :  { %v728_v28 = vsub.f32 %v21_v5, %v54_v24  ;;  %v585_v5 = vor.u32 %v627_v3, %v584_v2  ;;  %v557_v24 = vor.u32 %v619_v19, %v554_v21  ;;  %v561_v26 = vor.u32 %v621_v23, %v560_v22 }
  0x82   :  { %v72_v29 = vmul.f32 %v724_v25, %v724_v25  ;;  %v74_v42 = vmul.f32 %v754_v41, %v754_v41  ;;  %422 = vmatpush.bf16.msra.mxu1 %v581_v4 }
  0x83   :  { %v70_v31 = vmul.f32 %v728_v28, %v728_v28  ;;  %451 = vmatpush.bf16.msra.mxu2 %v585_v5 }
  0x84   :  { %83 = vadd.xlane.f32.xlu2 %v72_v29  ;;  %v617_v29 = vld [vmem:[%s1039_s3 + $0x38] sm:$0xf0] }
  0x85   :  { %44 = vadd.xlane.f32.xlu0 %v735_v30  ;;  %79 = vadd.xlane.f32.xlu1 %v70_v31  ;;  %v43_v34 = vpop.xlane.xlu2 %42  ;;  %v616_v31 = vld [vmem:[%s1039_s3 + $0x34] sm:$0xf] }
  0x86   :  { %v59_v35 = vmul.f32 %v715_v13, %v43_v34  ;;  %423 = vmatpush.bf16.msra.mxu1 %v569_v14  ;;  %v541_v34 = vor.u32 %v617_v29, %v540_v27 }
  0x87   :  { %452 = vmatpush.bf16.msra.mxu2 %v573_v15 }
  0x88   :  { %v745_v36 = vsub.f32 %v26_v6, %v59_v35  ;;  %v564_v6 = vld [vmem:[%s1039_s3 + $0x60] sm:$0xf] }
  0x89   :  { %v565_v9 = vor.u32 %v623_v7, %v564_v6  ;;  %v542_v35 = vld [vmem:[%s1039_s3 + $0x3c] sm:$0xf0] }
  0x8a   :  { %v75_v40 = vmul.f32 %v745_v36, %v745_v36  ;;  %424 = vmatpush.bf16.msra.mxu1 %v557_v24 }
  0x8b   :  { %394 = vmatpush.bf16.msra.mxu0 %v565_v9  ;;  %637 = vmatpush.bf16.msra.mxu3 %v565_v9 }
  0x8c   :  { %89 = vadd.xlane.f32.xlu2 %v75_v40  ;;  %453 = vmatpush.bf16.msra.mxu2 %v561_v26 }
  0x8d   :  { %85 = vadd.xlane.f32.xlu0 %v73_v38  ;;  %81 = vadd.xlane.f32.xlu1 %v71_v39  ;;  %v618_v38 = vld [vmem:[%s1039_s3 + $0x40] sm:$0xf0]  ;;  %v545_v39 = vor.u32 %v616_v31, %v542_v35 }
  0x8e   :  { %v549_v40 = vor.u32 %v618_v38, %v548_v37 }
  0x8f   :  { %395 = vmatpush.bf16.msra.mxu0 %v553_v20  ;;  %638 = vmatpush.bf16.msra.mxu3 %v553_v20 }
  0x90   :  { %425 = vmatpush.bf16.msra.mxu1 %v545_v39  ;;  %454 = vmatpush.bf16.msra.mxu2 %v549_v40 }
  0x93   :  { %396 = vmatpush.bf16.msra.mxu0 %v541_v34  ;;  %639 = vmatpush.bf16.msra.mxu3 %v541_v34 }
  0x94   :  { %426 = vmatpush.bf16.msra.mxu1 %v533_v50  ;;  %455 = vmatpush.bf16.msra.mxu2 %v537_v51 }
  0x95   :  { %87 = vadd.xlane.f32.xlu1 %v74_v42  ;;  %v528_v42 = vld [vmem:[%s1039_s3 + $0x18] sm:$0xf] }
  0x96   :  { %v529_v45 = vor.u32 %v614_v43, %v528_v42 }
  0x98   :  { %397 = vmatpush.bf16.msra.mxu0 %v529_v45  ;;  %640 = vmatpush.bf16.msra.mxu3 %v529_v45  ;;  %v921_v45 = vld [vmem:[%s1037_s1] ss:$0 sm:$0xff] }
  0x99   :  { %427 = vmatpush.bf16.msra.mxu1 %v521_v60  ;;  %456 = vmatpush.bf16.msra.mxu2 %v525_v62 }
  0x9c   :  { %398 = vmatpush.bf16.msra.mxu0 %v517_v57  ;;  %641 = vmatpush.bf16.msra.mxu3 %v517_v57  ;;  %v929_v57 = vld [vmem:[%s1038_s2] ss:$0 sm:$0xff] }
  0xf0   :  { %v78_v49 = vpop.xlane.xlu0 %77 }
  0xf1   :  { %v93_v52 = vmul.f32 %v78_v49, %v715_v13 }
  0xf3   :  { %v101_v56 = vadd.f32 1e-05, %v93_v52 }
  0xf5   :  { %647 = vrsqrt.f32 %v101_v56  ;;  %vm115_vm2 = vweird.f32 %v101_v56 }
  0xf7   :  { %v84_v63 = vpop.xlane.xlu2 %83 }
  0xf8   :  { %v96_v0 = vmul.f32 %v84_v63, %v715_v13  ;;  %v80_v1 = vpop.xlane.xlu1 %79  ;;  %v45_v2 = vpop.xlane.xlu0 %44 }
  0xf9   :  { %v94_v3 = vmul.f32 %v80_v1, %v715_v13  ;;  %v60_v4 = vmul.f32 %v715_v13, %v45_v2 }
  0xfa   :  { %v104_v5 = vadd.f32 1e-05, %v96_v0 }
  0xfb   :  { %v648_v6 = vpop.eup %647  ;;  %v102_v7 = vadd.f32 1e-05, %v94_v3  ;;  %v907_v8 = vsub.f32 %v735_v30, %v60_v4 }
  0xfc   :  { %v110_v9 = vmul.f32 %v648_v6, %v101_v56  ;;  %649 = vrsqrt.f32 %v104_v5  ;;  %vm116_vm1 = vweird.f32 %v648_v6  ;;  %vm145_vm6 = vweird.f32 %v104_v5 }
  0xfd   :  { %651 = vrsqrt.f32 %v102_v7  ;;  %v76_v10 = vmul.f32 %v907_v8, %v907_v8  ;;  %vm117_vm3 = vmor %vm115_vm2, %vm116_vm1  ;;  %vm125_vm4 = vweird.f32 %v102_v7 }
  0xfe   :  { %v111_v11 = vmul.f32 %v648_v6, %v110_v9 }
  0xff   :  { %91 = vadd.xlane.f32.xlu0 %v76_v10 }
 0x100   :  { %v112_v12 = vmul.f32 0.5, %v111_v11  ;;  %v82_v14 = vpop.xlane.xlu1 %81  ;;  %v86_v15 = vpop.xlane.xlu0 %85 }
 0x101   :  { %v95_v16 = vmul.f32 %v82_v14, %v715_v13  ;;  %v97_v17 = vmul.f32 %v86_v15, %v715_v13 }
 0x102   :  { %v650_v19 = vpop.eup %649  ;;  %v113_v20 = vsub.f32 1.5, %v112_v12 }
 0x103   :  { %v652_v21 = vpop.eup %651  ;;  %v140_v30 = vmul.f32 %v650_v19, %v104_v5  ;;  %v103_v22 = vadd.f32 1e-05, %v95_v16  ;;  %v913_v23 = vadd.f32 1e-05, %v97_v17  ;;  %vm146_vm7 = vweird.f32 %v650_v19 }
 0x104   :  { %v114_v24 = vmul.f32 %v648_v6, %v113_v20  ;;  %v120_v26 = vmul.f32 %v652_v21, %v102_v7  ;;  %vm126_vm5 = vweird.f32 %v652_v21  ;;  %vm147_vm9 = vmor %vm145_vm6, %vm146_vm7 }
 0x105   :  { %v141_v27 = vmul.f32 %v650_v19, %v140_v30  ;;  %653 = vrsqrt.f32 %v103_v22  ;;  %vm127_vm8 = vmor %vm125_vm4, %vm126_vm5  ;;  %vm135_vm10 = vweird.f32 %v103_v22  ;;  %vm155_vm15 = vweird.f32 %v913_v23 }
 0x106   :  { %v121_v29 = vmul.f32 %v652_v21, %v120_v26  ;;  %655 = vrsqrt.f32 %v913_v23  ;;  %v118_v34 = vsel %vm117_vm3, %v648_v6, %v114_v24  ;;  %v90_v26 = vpop.xlane.xlu2 %89 }
 0x107   :  { %v142_v31 = vmul.f32 0.5, %v141_v27  ;;  %v189_v43 = vmul.f32 %v118_v34, %v718_v18  ;;  %v99_v27 = vmul.f32 %v90_v26, %v715_v13 }
 0x108   :  { %v122_v35 = vmul.f32 0.5, %v121_v29  ;;  %v88_v37 = vpop.xlane.xlu1 %87 }
 0x109   :  { %v143_v38 = vsub.f32 1.5, %v142_v31  ;;  %v98_v39 = vmul.f32 %v88_v37, %v715_v13  ;;  %v200_v18 = vmul.f32 %v921_v45, %v189_v43 }
 0x10a   :  { %v123_v40 = vsub.f32 1.5, %v122_v35 }
 0x10b   :  { %v654_v42 = vpop.eup %653  ;;  %v106_v44 = vadd.f32 1e-05, %v98_v39  ;;  %v144_v47 = vmul.f32 %v650_v19, %v143_v38  ;;  %v211_v0 = vadd.f32 %v929_v57, %v200_v18 }
 0x10c   :  { %v656_v46 = vpop.eup %655  ;;  %v124_v48 = vmul.f32 %v652_v21, %v123_v40  ;;  %v130_v49 = vmul.f32 %v654_v42, %v103_v22  ;;  %vm136_vm11 = vweird.f32 %v654_v42 }
 0x10d   :  { %v150_v50 = vmul.f32 %v656_v46, %v913_v23  ;;  %657 = vrsqrt.f32 %v106_v44  ;;  %v148_v54 = vsel %vm147_vm9, %v650_v19, %v144_v47  ;;  %vm137_vm12 = vmor %vm135_vm10, %vm136_vm11  ;;  %vm165_vm13 = vweird.f32 %v106_v44 }
 0x10e   :  { %v128_v51 = vsel %vm127_vm8, %v652_v21, %v124_v48  ;;  %v131_v52 = vmul.f32 %v654_v42, %v130_v49  ;;  %v192_v60 = vmul.f32 %v148_v54, %v724_v25  ;;  %vm156_vm0 = vweird.f32 %v656_v46 }
 0x10f   :  { %v190_v53 = vmul.f32 %v128_v51, %v728_v28  ;;  %v151_v56 = vmul.f32 %v656_v46, %v150_v50  ;;  %vm157_vm2 = vmor %vm155_vm15, %vm156_vm0 }
 0x110   :  { %v132_v55 = vmul.f32 0.5, %v131_v52  ;;  %v203_v6 = vmul.f32 %v921_v45, %v192_v60 }
 0x111   :  { %v201_v58 = vmul.f32 %v921_v45, %v190_v53  ;;  %v152_v63 = vmul.f32 0.5, %v151_v56  ;;  %v255_v56 = vld [vmem:[%s1040_s4] sm:$0x7] }
 0x112   :  { %v133_v59 = vsub.f32 1.5, %v132_v55 }
 0x113   :  { %v212_v28 = vadd.f32 %v929_v57, %v201_v58  ;;  %v658_v61 = vpop.eup %657  ;;  %v153_v7 = vsub.f32 1.5, %v152_v63  ;;  %v960_v58 = vperm.slane %v255_v56, 1 }
 0x114   :  { %v134_v62 = vmul.f32 %v654_v42, %v133_v59  ;;  %v160_v1 = vmul.f32 %v658_v61, %v106_v44  ;;  %vm166_vm14 = vweird.f32 %v658_v61 }
 0x115   :  { %v219_v3 = vpack.c.bf16 %v212_v28, %v211_v0  ;;  %v154_v12 = vmul.f32 %v656_v46, %v153_v7  ;;  %vm167_vm1 = vmor %vm165_vm13, %vm166_vm14 }
 0x116   :  { %v138_v2 = vsel %vm137_vm12, %v654_v42, %v134_v62  ;;  %v161_v5 = vmul.f32 %v658_v61, %v160_v1 }
 0x117   :  { %v191_v4 = vmul.f32 %v138_v2, %v741_v33  ;;  %399 = vmatmul.bf16.vlgmr.msra.gmra.mxu0 %v219_v3  ;;  %428 = vmatmul.bf16.vlgmr.msra.gmra.mxu1 %v219_v3  ;;  %v214_v33 = vadd.f32 %v929_v57, %v203_v6  ;;  %v158_v17 = vsel %vm157_vm2, %v656_v46, %v154_v12 }
 0x118   :  { %v162_v25 = vmul.f32 0.5, %v161_v5  ;;  %457 = vmatmul.bf16.vlgmr.msra.gmra.mxu2 %v219_v3  ;;  %v193_v20 = vmul.f32 %v158_v17, %v739_v32 }
 0x119   :  { %v202_v9 = vmul.f32 %v921_v45, %v191_v4 }
 0x11a   :  { %v163_v10 = vsub.f32 1.5, %v162_v25  ;;  %v204_v30 = vmul.f32 %v921_v45, %v193_v20 }
 0x11b   :  { %v213_v11 = vadd.f32 %v929_v57, %v202_v9 }
 0x11c   :  { %v164_v14 = vmul.f32 %v658_v61, %v163_v10  ;;  %v215_v23 = vadd.f32 %v929_v57, %v204_v30 }
 0x11d   :  { %v220_v15 = vpack.c.bf16 %v214_v33, %v213_v11 }
 0x11e   :  { %v168_v16 = vsel %vm167_vm1, %v658_v61, %v164_v14 }
 0x11f   :  { %404 = vmatmul.bf16.vlgmr.msra.gmra.mxu3 %v220_v15  ;;  %v194_v19 = vmul.f32 %v168_v16, %v754_v41  ;;  %v107_v41 = vadd.f32 1e-05, %v99_v27 }
 0x121   :  { %v205_v21 = vmul.f32 %v921_v45, %v194_v19  ;;  %659 = vrsqrt.f32 %v107_v41  ;;  %vm175_vm3 = vweird.f32 %v107_v41 }
 0x123   :  { %v216_v22 = vadd.f32 %v929_v57, %v205_v21 }
 0x125   :  { %v221_v24 = vpack.c.bf16 %v216_v22, %v215_v23 }
 0x127   :  { %433 = vmatmul.bf16.gmra.mxu1 %v220_v15  ;;  %v660_v32 = vpop.eup %659 }
 0x128   :  { %462 = vmatmul.bf16.gmra.mxu2 %v220_v15  ;;  %v170_v29 = vmul.f32 %v660_v32, %v107_v41  ;;  %vm176_vm4 = vweird.f32 %v660_v32 }
 0x129   :  { %vm177_vm5 = vmor %vm175_vm3, %vm176_vm4 }
 0x12a   :  { %v171_v31 = vmul.f32 %v660_v32, %v170_v29 }
 0x12c   :  { %v172_v38 = vmul.f32 0.5, %v171_v31 }
 0x12e   :  { %v173_v39 = vsub.f32 1.5, %v172_v38 }
 0x12f   :  { %409 = vmatmul.bf16.gmra.mxu3 %v221_v24 }
 0x130   :  { %v174_v42 = vmul.f32 %v660_v32, %v173_v39 }
 0x132   :  { %v178_v46 = vsel %vm177_vm5, %v660_v32, %v174_v42 }
 0x133   :  { %v195_v49 = vmul.f32 %v178_v46, %v745_v36  ;;  %v958_v36 = vperm.slane %v255_v56, 0 }
 0x135   :  { %v206_v52 = vmul.f32 %v921_v45, %v195_v49 }
 0x137   :  { %438 = vmatmul.bf16.gmra.mxu1 %v221_v24  ;;  %v217_v18 = vadd.f32 %v929_v57, %v206_v52 }
 0x138   :  { %467 = vmatmul.bf16.gmra.mxu2 %v221_v24 }
 0x172   :  { %v92_v34 = vpop.xlane.xlu0 %91 }
 0x173   :  { %v100_v35 = vmul.f32 %v92_v34, %v715_v13 }
 0x175   :  { %v108_v37 = vadd.f32 1e-05, %v100_v35 }
 0x177   :  { %661 = vrsqrt.f32 %v108_v37  ;;  %vm185_vm7 = vweird.f32 %v108_v37 }
 0x17d   :  { %v662_v40 = vpop.eup %661 }
 0x17e   :  { %v180_v43 = vmul.f32 %v662_v40, %v108_v37  ;;  %vm186_vm6 = vweird.f32 %v662_v40 }
 0x17f   :  { %vm187_vm8 = vmor %vm185_vm7, %vm186_vm6 }
 0x180   :  { %v181_v44 = vmul.f32 %v662_v40, %v180_v43 }
 0x182   :  { %v182_v47 = vmul.f32 0.5, %v181_v44 }
 0x184   :  { %v183_v48 = vsub.f32 1.5, %v182_v47 }
 0x186   :  { %v184_v50 = vmul.f32 %v662_v40, %v183_v48 }
 0x188   :  { %v188_v13 = vsel %vm187_vm8, %v662_v40, %v184_v50 }
 0x189   :  { %v196_v51 = vmul.f32 %v188_v13, %v907_v8 }
 0x18b   :  { %v207_v53 = vmul.f32 %v921_v45, %v196_v51 }
 0x18d   :  { %v218_v54 = vadd.f32 %v929_v57, %v207_v53  ;;  %v964_v57 = vperm.slane %v255_v56, 2 }
 0x18f   :  { %v222_v55 = vpack.c.bf16 %v218_v54, %v217_v18 }
 0x191   :  { %414 = vmatmul.bf16.gmra.mxu3 %v222_v55  ;;  %443 = vmatmul.bf16.gmra.mxu1 %v222_v55 }
 0x192   :  { %472 = vmatmul.bf16.gmra.mxu2 %v222_v55 }
 0x194   :  { %v400_v8 = vpop.f32.mrf.mxu0  ;;  %v429_v59 = vpop.f32.mrf.mxu1 }
 0x195   :  { %v401_v45 = vadd.f32 %v400_v8, %v958_v36  ;;  %v430_v60 = vadd.f32 %v429_v59, %v960_v58 }
 0x197   :  { %v478_v28 = vpack.c.bf16 %v430_v60, %v401_v45 }
 0x199   :  { %494 = vst [vmem:[%s1041_s5] sm:$0xff] %v478_v28 }
 0x19b   :  { %v458_v61 = vpop.f32.mrf.mxu2 }
 0x19c   :  { %v459_v62 = vadd.f32 %v458_v61, %v964_v57  ;;  %v402_v63 = vpop.f32.mrf.mxu0  ;;  %v431_v0 = vpop.f32.mrf.mxu1 }
 0x19d   :  { %v403_v1 = vadd.f32 %v402_v63, %v958_v36  ;;  %v432_v2 = vadd.f32 %v431_v0, %v960_v58 }
 0x19e   :  { %v479_v3 = vpack.c.bf16 %v459_v62, %v459_v62 }
 0x19f   :  { %v480_v4 = vpack.c.bf16 %v432_v2, %v403_v1 }
 0x1a0   :  { %495 = vst [vmem:[%s1041_s5 + $0x8] sm:$0xf] %v479_v3 }
 0x1a1   :  { %496 = vst [vmem:[%s1041_s5 + $0xc] sm:$0xff] %v480_v4 }
 0x1a2   :  { %v405_v5 = vpop.f32.mrf.mxu3 }
 0x1a3   :  { %v460_v6 = vpop.f32.mrf.mxu2  ;;  %v406_v9 = vadd.f32 %v405_v5, %v958_v36 }
 0x1a4   :  { %v461_v7 = vadd.f32 %v460_v6, %v964_v57  ;;  %v434_v25 = vpop.f32.mrf.mxu1 }
 0x1a5   :  { %v435_v10 = vadd.f32 %v434_v25, %v960_v58 }
 0x1a6   :  { %v481_v11 = vpack.c.bf16 %v461_v7, %v461_v7 }
 0x1a7   :  { %v482_v33 = vpack.c.bf16 %v435_v10, %v406_v9 }
 0x1a8   :  { %497 = vst [vmem:[%s1041_s5 + $0x14] sm:$0xf] %v481_v11 }
 0x1a9   :  { %498 = vst [vmem:[%s1041_s5 + $0x18] sm:$0xff] %v482_v33 }
 0x1aa   :  { %v407_v12 = vpop.f32.mrf.mxu3 }
 0x1ab   :  { %v463_v14 = vpop.f32.mrf.mxu2  ;;  %v408_v17 = vadd.f32 %v407_v12, %v958_v36 }
 0x1ac   :  { %v464_v15 = vadd.f32 %v463_v14, %v964_v57  ;;  %v436_v16 = vpop.f32.mrf.mxu1 }
 0x1ad   :  { %v437_v19 = vadd.f32 %v436_v16, %v960_v58 }
 0x1ae   :  { %v483_v20 = vpack.c.bf16 %v464_v15, %v464_v15 }
 0x1af   :  { %v484_v21 = vpack.c.bf16 %v437_v19, %v408_v17 }
 0x1b0   :  { %499 = vst [vmem:[%s1041_s5 + $0x20] sm:$0xf] %v483_v20 }
 0x1b1   :  { %500 = vst [vmem:[%s1041_s5 + $0x24] sm:$0xff] %v484_v21 }
 0x1b2   :  { %v410_v30 = vpop.f32.mrf.mxu3 }
 0x1b3   :  { %v465_v22 = vpop.f32.mrf.mxu2  ;;  %v411_v26 = vadd.f32 %v410_v30, %v958_v36 }
 0x1b4   :  { %v466_v23 = vadd.f32 %v465_v22, %v964_v57  ;;  %v439_v24 = vpop.f32.mrf.mxu1 }
 0x1b5   :  { %v440_v27 = vadd.f32 %v439_v24, %v960_v58 }
 0x1b6   :  { %v485_v41 = vpack.c.bf16 %v466_v23, %v466_v23 }
 0x1b7   :  { %v486_v32 = vpack.c.bf16 %v440_v27, %v411_v26 }
 0x1b8   :  { %501 = vst [vmem:[%s1041_s5 + $0x2c] sm:$0xf] %v485_v41 }
 0x1b9   :  { %502 = vst [vmem:[%s1041_s5 + $0x30] sm:$0xff] %v486_v32 }
 0x1ba   :  { %v412_v29 = vpop.f32.mrf.mxu3 }
 0x1bb   :  { %v468_v31 = vpop.f32.mrf.mxu2  ;;  %v413_v37 = vadd.f32 %v412_v29, %v958_v36 }
 0x1bc   :  { %v469_v34 = vadd.f32 %v468_v31, %v964_v57  ;;  %v441_v35 = vpop.f32.mrf.mxu1 }
 0x1bd   :  { %v442_v38 = vadd.f32 %v441_v35, %v960_v58 }
 0x1be   :  { %v487_v39 = vpack.c.bf16 %v469_v34, %v469_v34 }
 0x1bf   :  { %v488_v40 = vpack.c.bf16 %v442_v38, %v413_v37 }
 0x1c0   :  { %503 = vst [vmem:[%s1041_s5 + $0x38] sm:$0xf] %v487_v39 }
 0x1c1   :  { %504 = vst [vmem:[%s1041_s5 + $0x3c] sm:$0xff] %v488_v40 }
 0x1c3   :  { %v470_v42 = vpop.f32.mrf.mxu2 }
 0x1c4   :  { %v471_v43 = vadd.f32 %v470_v42, %v964_v57 }
 0x1c6   :  { %v489_v44 = vpack.c.bf16 %v471_v43, %v471_v43 }
 0x1c8   :  { %505 = vst [vmem:[%s1041_s5 + $0x44] sm:$0xf] %v489_v44 }
 0x20e   :  { %v444_v46 = vpop.f32.mrf.mxu1 }
 0x20f   :  { %v445_v48 = vadd.f32 %v444_v46, %v960_v58 }
 0x214   :  { %v415_v47 = vpop.f32.mrf.mxu3 }
 0x215   :  { %v416_v49 = vadd.f32 %v415_v47, %v958_v36  ;;  %v473_v50 = vpop.f32.mrf.mxu2 }
 0x216   :  { %v474_v13 = vadd.f32 %v473_v50, %v964_v57  ;;  %v446_v53 = vpop.f32.mrf.mxu1 }
 0x217   :  { %v490_v51 = vpack.c.bf16 %v445_v48, %v416_v49  ;;  %v447_v54 = vadd.f32 %v446_v53, %v960_v58 }
 0x218   :  { %v491_v52 = vpack.c.bf16 %v474_v13, %v474_v13 }
 0x219   :  { %506 = vst [vmem:[%s1041_s5 + $0x48] sm:$0xff] %v490_v51 }
 0x21a   :  { %507 = vst [vmem:[%s1041_s5 + $0x50] sm:$0xf] %v491_v52 }
 0x21c   :  { %v417_v18 = vpop.f32.mrf.mxu3 }
 0x21d   :  { %v418_v55 = vadd.f32 %v417_v18, %v958_v36  ;;  %v475_v56 = vpop.f32.mrf.mxu2 }
 0x21e   :  { %v476_v8 = vadd.f32 %v475_v56, %v964_v57 }
 0x21f   :  { %v492_v59 = vpack.c.bf16 %v447_v54, %v418_v55 }
 0x220   :  { %v493_v45 = vpack.c.bf16 %v476_v8, %v476_v8 }
 0x221   :  { %508 = vst [vmem:[%s1041_s5 + $0x54] sm:$0xff] %v492_v59 }
 0x222   :  { %509 = vst [vmem:[%s1041_s5 + $0x5c] sm:$0xf] %v493_v45 }

// kernel: muq_forward.9
= control target key start
LH: loop header
LB: loop body
LE: loop exit
PB: predicated region body
PF: predicated region fallthrough
CT: control target
= control target key end

     0   :  { %s1190_s15 = smov 0   ;;  %s1415_s0 = inlined_call_operand.vmem [shape: f32[2,32,128], index: 0, kind: input, shape index: {}]   ;;  %s1416_s1 = inlined_call_operand.vmem [shape: bf16[2,32,384], index: 1, kind: input, shape index: {}]   ;;  %s1417_s2 = inlined_call_operand.vmem [shape: bf16[128,128], index: 2, kind: input, shape index: {}]   ;;  %s1418_s3 = inlined_call_operand.vmem [shape: f32[1,128], index: 3, kind: input, shape index: {}]   ;;  %s1419_s4 = inlined_call_operand.vmem [shape: f32[2,32,128], index: 4, kind: output, shape index: {}]  }
   0x1 LB: > { %s979_s16 = sadd.s32 4294967295, %s1160_s15   ;;  %p983_p0 = scmp.ge.s32.totalorder %s1160_s15, 1  ;;  %s1160_s15 = sphi %s1190_s15, %s14_s15  }
   0x2   : > { %p172_p1 = scmp.lt.s32.totalorder %s1160_s15, 3 }
   0x4   : > { %p173_p2 = pnand %p983_p0, %p172_p1 }
   0x5   : > { %p203_p3 = scmp.lt.s32.totalorder (!%p173_p2), %s979_s16, 1  ;;  %s1162_s21 = smov (!%p173_p2), 96  }
   0x6   : > { %176 = sbr.rel (%p173_p2) target bundleno = 1394 (0x572), region = 36  ;;  %s1163_s22 = smov (!%p173_p2), 64  }
   0x7   : > { %s1164_s23 = smov (!%p173_p2), 32  }
   0xb   : > { %s1421_s16 = smov (!%p203_p3, %s979_s16), 1  ;;  %vm263_vm0 = vcmask 261120  }
   0xc   : > { %s1077_s17 = smul.u32 48, %s1421_s16  ;;  %s1063_s14 = sshll.u32 %s1421_s16, 5 }
   0xd   : > { %s1397_s19 = scalar_lea.vmem %s1415_s0, %s1063_s14 }
   0xe   : > { %s1204_s20 = scalar_lea.vmem %s1416_s1, %s1077_s17 }
   0xf   : > { %v1067_v0 = vld [vmem:[%s1204_s20 + $0x1c] sm:$0xf]  ;;  %v993_v1 = vld [vmem:[%s1204_s20 + $0x24] sm:$0xf0]  ;;  %v1065_v3 = vld [vmem:[%s1204_s20 + $0x4] sm:$0xf] }
  0x10   : > { %v1208_v2 = vor.u32 %v1067_v0, %v993_v1  ;;  %v219_v4 = vld [vmem:[%s1204_s20] sm:$0xf]  ;;  %v221_v5 = vld [vmem:[%s1204_s20 + $0xc] sm:$0xf]  ;;  %v989_v6 = vld [vmem:[%s1204_s20 + $0xc] sm:$0xf0] }
  0x11   : > { %v243_v7 = vunpack.c.l.bf16 %v219_v4  ;;  %v244_v8 = vunpack.c.l.bf16 %v221_v5  ;;  %v223_v9 = vld [vmem:[%s1204_s20 + $0x18] sm:$0xf]  ;;  %v225_v10 = vld [vmem:[%s1204_s20 + $0x24] sm:$0xf]  ;;  %v1220_v16 = vor.u32 %v1065_v3, %v989_v6  ;;  %v1005_v52 = vld [vmem:[%s1204_s20 + $0x20] sm:$0xf] }
  0x12   : > { %388 = vrot.lane.b32.xlu0 %v1208_v2, %s1162_s21  ;;  %v274_v11 = vsel %vm263_vm0, %v1208_v2, 0  ;;  %v245_v14 = vunpack.c.l.bf16 %v223_v9  ;;  %v246_v15 = vunpack.c.l.bf16 %v225_v10  ;;  %v1068_v53 = vld [vmem:[%s1204_s20 + $0x28] sm:$0xf0]  ;;  %v1001_v4 = vld [vmem:[%s1204_s20 + $0x8] sm:$0xf] }
  0x13   : > { %282 = vmatpush.bf16.xpose.msra.mxu0 %v274_v11  ;;  %v247_v12 = vmul.f32 0.17675781, %v243_v7  ;;  %v248_v13 = vmul.f32 0.17675781, %v244_v8  ;;  %v271_v20 = vsel %vm263_vm0, %v1220_v16, 0  ;;  %v1258_v55 = vor.u32 %v1068_v53, %v1005_v52  ;;  %v1066_v5 = vld [vmem:[%s1204_s20 + $0x10] sm:$0xf0] }
  0x14   : > { %v249_v18 = vmul.f32 0.17675781, %v245_v14  ;;  %v250_v19 = vmul.f32 0.17675781, %v246_v15  ;;  %v1281_v6 = vor.u32 %v1066_v5, %v1001_v4 }
  0x15   : > { %v1222_v17 = vpack.c.bf16 %v248_v13, %v247_v12  ;;  %365 = vmatpush.bf16.msra.mxu1 %v1258_v55 }
  0x16   : > { %v1230_v21 = vpack.c.bf16 %v250_v19, %v249_v18 }
  0x17   : > { %382 = vrot.lane.b32.xlu1 %v1222_v17, %s1162_s21 }
  0x19   : > { %366 = vmatpush.bf16.msra.mxu1 %v1281_v6 }
  0x1a   : > { %386 = vrot.lane.b32.xlu0 %v1220_v16, %s1162_s21 }
  0x1b   : > { %283 = vmatpush.bf16.xpose.msra.mxu0 %v271_v20 }
  0x1f   : > { %384 = vrot.lane.b32.xlu1 %v1230_v21, %s1162_s21 }
  0x22   : > { %997 = vmatmul.msk.bf16.vlgmr.msra.gmra.mxu0 %vm263_vm0, %v1222_v17 }
  0x32   : > { %998 = vmatmul.msk.bf16.gmra.mxu0 %vm263_vm0, %v1230_v21 }
  0x84   : > { %v389_v22 = vpop.permute.xlu0 %388 }
  0x85   : > { %v400_v23 = vsel %vm263_vm0, %v389_v22, 0 }
  0x86   : > { %408 = vmatpush.bf16.xpose.msra.mxu2 %v400_v23 }
  0x89   : > { %v383_v26 = vpop.permute.xlu1 %382 }
  0x8c   : > { %v387_v24 = vpop.permute.xlu0 %386 }
  0x8d   : > { %v397_v25 = vsel %vm263_vm0, %v387_v24, 0 }
  0x8e   : > { %409 = vmatpush.bf16.xpose.msra.mxu2 %v397_v25 }
  0x91   : > { %v385_v29 = vpop.permute.xlu1 %384 }
  0x95   : > { %1009 = vmatmul.msk.bf16.vlgmr.msra.gmra.mxu2 %vm263_vm0, %v383_v26 }
  0x9f   : > { %v285_v27 = vpop.f32.mrf.mxu0 }
  0xa0   : > { %v295_v28 = vsel %vm263_vm0, %v285_v27, -inf }
  0xa1   : > { %296 = vmax.xlane.f32.xlu2 %v295_v28 }
  0xa5   : > { %1010 = vmatmul.msk.bf16.gmra.mxu2 %vm263_vm0, %v385_v29 }
  0xa7   : > { %v287_v30 = vpop.f32.mrf.mxu0 }
  0xa8   : > { %v298_v31 = vsel %vm263_vm0, %v287_v30, -inf }
  0xa9   : > { %299 = vmax.xlane.f32.xlu2 %v298_v31 }
  0xaf   : > { %v290_v32 = vpop.f32.mrf.mxu0 }
  0xb0   : > { %v301_v33 = vsel %vm263_vm0, %v290_v32, -inf }
  0xb1   : > { %302 = vmax.xlane.f32.xlu0 %v301_v33 }
  0xb7   : > { %v292_v34 = vpop.f32.mrf.mxu0 }
  0xb8   : > { %v304_v35 = vsel %vm263_vm0, %v292_v34, -inf }
  0xb9   : > { %305 = vmax.xlane.f32.xlu1 %v304_v35 }
 0x114   : > { %v297_v36 = vpop.xlane.xlu2 %296 }
 0x115   : > { %v307_v37 = vsub.f32 %v285_v27, %v297_v36 }
 0x117   : > { %v311_v38 = vmul.f32 1.442695, %v307_v37 }
 0x118   : > { %v1246_v39 = vpop.f32.mrf.mxu2 }
 0x119   : > { %1090 = vpow2.f32 %v311_v38  ;;  %v421_v1 = vsel %vm263_vm0, %v1246_v39, -inf }
 0x11c   : > { %v300_v40 = vpop.xlane.xlu2 %299 }
 0x11d   : > { %v308_v41 = vsub.f32 %v287_v30, %v300_v40 }
 0x11f   : > { %v1091_v42 = vpop.eup %1090  ;;  %v313_v43 = vmul.f32 1.442695, %v308_v41 }
 0x120   : > { %v1248_v44 = vpop.f32.mrf.mxu2  ;;  %v319_v45 = vsel %vm263_vm0, %v1091_v42, 0.0 }
 0x121   : > { %1092 = vpow2.f32 %v313_v43  ;;  %320 = vadd.xlane.f32.xlu2 %v319_v45  ;;  %v424_v3 = vsel %vm263_vm0, %v1248_v44, -inf }
 0x124   : > { %v303_v46 = vpop.xlane.xlu0 %302 }
 0x125   : > { %v309_v47 = vsub.f32 %v290_v32, %v303_v46 }
 0x127   : > { %v1093_v48 = vpop.eup %1092  ;;  %v315_v49 = vmul.f32 1.442695, %v309_v47 }
 0x128   : > { %v1251_v50 = vpop.f32.mrf.mxu2  ;;  %v322_v51 = vsel %vm263_vm0, %v1093_v48, 0.0 }
 0x129   : > { %1094 = vpow2.f32 %v315_v49  ;;  %323 = vadd.xlane.f32.xlu2 %v322_v51  ;;  %v427_v54 = vsel %vm263_vm0, %v1251_v50, -inf  ;;  %v1070_v51 = vld [vmem:[%s1417_s2 + $0x8] sm:$0xff] }
 0x12a   : > { %428 = vmax.xlane.f32.xlu0 %v427_v54 }
 0x12c   : > { %v306_v56 = vpop.xlane.xlu1 %305 }
 0x12d   : > { %v310_v57 = vsub.f32 %v292_v34, %v306_v56 }
 0x12f   : > { %v1095_v58 = vpop.eup %1094  ;;  %v317_v59 = vmul.f32 1.442695, %v310_v57 }
 0x130   : > { %v1261_v60 = vpop.f32.mrf.mxu2  ;;  %v325_v61 = vsel %vm263_vm0, %v1095_v58, 0.0 }
 0x131   : > { %1096 = vpow2.f32 %v317_v59  ;;  %326 = vadd.xlane.f32.xlu2 %v325_v61  ;;  %v430_v62 = vsel %vm263_vm0, %v1261_v60, -inf }
 0x132   : > { %431 = vmax.xlane.f32.xlu1 %v430_v62 }
 0x137   : > { %v1097_v63 = vpop.eup %1096 }
 0x138   : > { %v328_v0 = vsel %vm263_vm0, %v1097_v63, 0.0 }
 0x139   : > { %329 = vadd.xlane.f32.xlu2 %v328_v0 }
 0x141   : > { %422 = vmax.xlane.f32.xlu2 %v421_v1 }
 0x149   : > { %425 = vmax.xlane.f32.xlu2 %v424_v3 }
 0x14b   : > { %469 = vrot.lane.b32.xlu1 %v1258_v55, %s1162_s21 }
 0x153   : > { %580 = vrot.lane.b32.xlu1 %v1208_v2, %s1163_s22 }
 0x15b   : > { %578 = vrot.lane.b32.xlu1 %v1220_v16, %s1163_s22 }
 0x163   : > { %574 = vrot.lane.b32.xlu1 %v1222_v17, %s1163_s22 }
 0x194   : > { %v321_v7 = vpop.xlane.xlu2 %320 }
 0x195   : > { %1098 = vrcp.f32 %v321_v7 }
 0x19b   : > { %v1099_v9 = vpop.eup %1098 }
 0x19c   : > { %v324_v8 = vpop.xlane.xlu2 %323  ;;  %v335_v12 = vmul.f32 %v1099_v9, %v1091_v42 }
 0x19d   : > { %1100 = vrcp.f32 %v324_v8  ;;  %v429_v28 = vpop.xlane.xlu0 %428 }
 0x19e   : > { %v435_v33 = vsub.f32 %v1251_v50, %v429_v28 }
 0x1a0   : > { %v441_v36 = vmul.f32 1.442695, %v435_v33 }
 0x1a3   : > { %v1101_v10 = vpop.eup %1100 }
 0x1a4   : > { %v327_v11 = vpop.xlane.xlu2 %326  ;;  %v336_v13 = vmul.f32 %v1101_v10, %v1093_v48 }
 0x1a5   : > { %1102 = vrcp.f32 %v327_v11  ;;  %v432_v24 = vpop.xlane.xlu1 %431 }
 0x1a6   : > { %v339_v14 = vpack.c.bf16 %v336_v13, %v335_v12  ;;  %v436_v40 = vsub.f32 %v1261_v60, %v432_v24 }
 0x1a8   : > { %1007 = vmatmul.msk.bf16.vlgmr.msra.gmra.mxu1 %vm263_vm0, %v339_v14  ;;  %v443_v42 = vmul.f32 1.442695, %v436_v40 }
 0x1ab   : > { %v1103_v18 = vpop.eup %1102 }
 0x1ac   : > { %v330_v15 = vpop.xlane.xlu2 %329  ;;  %v337_v22 = vmul.f32 %v1103_v18, %v1095_v58 }
 0x1ad   : > { %1104 = vrcp.f32 %v330_v15 }
 0x1b3   : > { %v1105_v19 = vpop.eup %1104 }
 0x1b4   : > { %v423_v20 = vpop.xlane.xlu2 %422  ;;  %v338_v23 = vmul.f32 %v1105_v19, %v1097_v63 }
 0x1b5   : > { %v433_v25 = vsub.f32 %v1246_v39, %v423_v20 }
 0x1b6   : > { %v340_v26 = vpack.c.bf16 %v338_v23, %v337_v22  ;;  %v1072_v22 = vld [vmem:[%s1417_s2 + $0x18] sm:$0xff]  ;;  %v1071_v23 = vld [vmem:[%s1417_s2 + $0x10] sm:$0xff] }
 0x1b7   : > { %v437_v27 = vmul.f32 1.442695, %v433_v25  ;;  %524 = vmatpush.bf16.msrb.mxu1 %v1072_v22 }
 0x1b8   : > { %1008 = vmatmul.msk.bf16.gmra.mxu1 %vm263_vm0, %v340_v26 }
 0x1b9   : > { %1106 = vpow2.f32 %v437_v27 }
 0x1bb   : > { %525 = vmatpush.bf16.msrb.mxu1 %v1071_v23 }
 0x1bc   : > { %v426_v29 = vpop.xlane.xlu2 %425 }
 0x1bd   : > { %v434_v30 = vsub.f32 %v1248_v44, %v426_v29  ;;  %v470_v31 = vpop.permute.xlu1 %469 }
 0x1be   : > { %485 = vmatpush.bf16.msra.mxu3 %v470_v31 }
 0x1bf   : > { %v1107_v32 = vpop.eup %1106  ;;  %v439_v34 = vmul.f32 1.442695, %v434_v30 }
 0x1c0   : > { %v445_v35 = vsel %vm263_vm0, %v1107_v32, 0.0 }
 0x1c1   : > { %1108 = vpow2.f32 %v439_v34  ;;  %446 = vadd.xlane.f32.xlu2 %v445_v35 }
 0x1c2   : > { %1110 = vpow2.f32 %v441_v36 }
 0x1c3   : > { %1112 = vpow2.f32 %v443_v42 }
 0x1c5   : > { %v581_v37 = vpop.permute.xlu1 %580 }
 0x1c6   : > { %v592_v38 = vsel %vm263_vm0, %v581_v37, 0 }
 0x1c7   : > { %v1109_v39 = vpop.eup %1108  ;;  %600 = vmatpush.bf16.xpose.msrb.mxu0 %v592_v38 }
 0x1c8   : > { %v448_v41 = vsel %vm263_vm0, %v1109_v39, 0.0  ;;  %v1111_v43 = vpop.eup %1110 }
 0x1c9   : > { %449 = vadd.xlane.f32.xlu0 %v448_v41  ;;  %v451_v46 = vsel %vm263_vm0, %v1111_v43, 0.0  ;;  %v1113_v47 = vpop.eup %1112 }
 0x1ca   : > { %v454_v49 = vsel %vm263_vm0, %v1113_v47, 0.0 }
 0x1cd   : > { %v579_v44 = vpop.permute.xlu1 %578 }
 0x1ce   : > { %v589_v45 = vsel %vm263_vm0, %v579_v44, 0 }
 0x1cf   : > { %601 = vmatpush.bf16.xpose.msrb.mxu0 %v589_v45 }
 0x1d1   : > { %452 = vadd.xlane.f32.xlu0 %v451_v46 }
 0x1d5   : > { %v575_v48 = vpop.permute.xlu1 %574 }
 0x1d6   : > { %1033 = vmatmul.msk.bf16.vlgmr.msrb.gmra.mxu0 %vm263_vm0, %v575_v48 }
 0x1d9   : > { %455 = vadd.xlane.f32.xlu0 %v454_v49  ;;  %467 = vrot.lane.b32.xlu2 %v1281_v6, %s1162_s21 }
 0x1e1   : > { %737 = vrot.lane.b32.xlu2 %v1220_v16, %s1164_s23 }
 0x1e9   : > { %733 = vrot.lane.b32.xlu2 %v1222_v17, %s1164_s23 }
 0x1ed   : > { %739 = vrot.lane.b32.xlu0 %v1208_v2, %s1164_s23  ;;  %v1069_v2 = vld [vmem:[%s1417_s2] sm:$0xff] }
 0x1f1   : > { %576 = vrot.lane.b32.xlu2 %v1230_v21, %s1163_s22 }
 0x1f5   : > { %735 = vrot.lane.b32.xlu0 %v1230_v21, %s1164_s23 }
 0x225   : > { %v368_v5 = vpop.f32.mrf.mxu1 }
 0x22d   : > { %v370_v10 = vpop.f32.mrf.mxu1 }
 0x22e   : > { %v378_v13 = vpack.c.bf16 %v370_v10, %v368_v5 }
 0x234   : > { %v447_v50 = vpop.xlane.xlu2 %446 }
 0x235   : > { %1114 = vrcp.f32 %v447_v50  ;;  %v373_v15 = vpop.f32.mrf.mxu1 }
 0x23b   : > { %v1115_v17 = vpop.eup %1114 }
 0x23c   : > { %v450_v52 = vpop.xlane.xlu0 %449  ;;  %v468_v16 = vpop.permute.xlu2 %467  ;;  %v461_v56 = vmul.f32 %v1115_v17, %v1107_v32 }
 0x23d   : > { %1116 = vrcp.f32 %v450_v52  ;;  %486 = vmatpush.bf16.msra.mxu3 %v468_v16  ;;  %v375_v18 = vpop.f32.mrf.mxu1 }
 0x23e   : > { %v379_v19 = vpack.c.bf16 %v375_v18, %v373_v15 }
 0x241   : > { %561 = vmatpush.bf16.msrb.mxu3 %v1070_v51 }
 0x243   : > { %v1117_v53 = vpop.eup %1116 }
 0x244   : > { %v453_v54 = vpop.xlane.xlu0 %452  ;;  %v738_v21 = vpop.permute.xlu2 %737  ;;  %v462_v57 = vmul.f32 %v1117_v53, %v1109_v39 }
 0x245   : > { %562 = vmatpush.bf16.msrb.mxu3 %v1069_v2  ;;  %1118 = vrcp.f32 %v453_v54  ;;  %v748_v14 = vsel %vm263_vm0, %v738_v21, 0 }
 0x246   : > { %v465_v58 = vpack.c.bf16 %v462_v57, %v461_v56 }
 0x248   : > { %1011 = vmatmul.msk.bf16.vlgmr.msra.gmra.mxu3 %vm263_vm0, %v465_v58 }
 0x24b   : > { %v1119_v61 = vpop.eup %1118 }
 0x24c   : > { %v734_v59 = vpop.permute.xlu2 %733  ;;  %v456_v60 = vpop.xlane.xlu0 %455  ;;  %v463_v3 = vmul.f32 %v1119_v61, %v1111_v43 }
 0x24d   : > { %1120 = vrcp.f32 %v456_v60 }
 0x253   : > { %v1121_v62 = vpop.eup %1120  ;;  %v603_v63 = vpop.f32.mrf.mxu0 }
 0x254   : > { %v577_v0 = vpop.permute.xlu2 %576  ;;  %v613_v1 = vsel %vm263_vm0, %v603_v63, -inf  ;;  %v464_v4 = vmul.f32 %v1121_v62, %v1113_v47 }
 0x255   : > { %1034 = vmatmul.msk.bf16.gmra.mxu0 %vm263_vm0, %v577_v0  ;;  %614 = vmax.xlane.f32.xlu1 %v613_v1 }
 0x256   : > { %v466_v7 = vpack.c.bf16 %v464_v4, %v463_v3 }
 0x258   : > { %1012 = vmatmul.msk.bf16.gmra.mxu3 %vm263_vm0, %v466_v7 }
 0x25b   : > { %v605_v8 = vpop.f32.mrf.mxu0 }
 0x25c   : > { %v616_v9 = vsel %vm263_vm0, %v605_v8, -inf }
 0x25d   : > { %617 = vmax.xlane.f32.xlu0 %v616_v9 }
 0x25f   : > { %v740_v11 = vpop.permute.xlu0 %739 }
 0x260   : > { %v751_v12 = vsel %vm263_vm0, %v740_v11, 0 }
 0x261   : > { %759 = vmatpush.bf16.xpose.msra.mxu3 %v751_v12 }
 0x267   : > { %v736_v20 = vpop.permute.xlu0 %735 }
 0x268   : > { %1031 = vmatmul.msk.bf16.vlgmr.msrb.gmra.mxu3 %vm263_vm0, %v378_v13 }
 0x269   : > { %760 = vmatpush.bf16.xpose.msra.mxu3 %v748_v14 }
 0x278   : > { %1032 = vmatmul.msk.bf16.gmra.mxu3 %vm263_vm0, %v379_v19 }
 0x288   : > { %1047 = vmatmul.msk.bf16.vlgmr.msra.gmra.mxu3 %vm263_vm0, %v734_v59 }
 0x298   : > { %1048 = vmatmul.msk.bf16.gmra.mxu3 %vm263_vm0, %v736_v20 }
 0x2c8   : > { %v615_v25 = vpop.xlane.xlu1 %614 }
 0x2c9   : > { %v625_v28 = vsub.f32 %v603_v63, %v615_v25 }
 0x2cb   : > { %v488_v24 = vpop.f32.mrf.mxu3  ;;  %v629_v34 = vmul.f32 1.442695, %v625_v28 }
 0x2d0   : > { %v618_v26 = vpop.xlane.xlu0 %617 }
 0x2d1   : > { %v626_v27 = vsub.f32 %v605_v8, %v618_v26 }
 0x2d2   : > { %v608_v29 = vpop.f32.mrf.mxu0 }
 0x2d3   : > { %v631_v30 = vmul.f32 1.442695, %v626_v27  ;;  %v490_v31 = vpop.f32.mrf.mxu3  ;;  %v619_v32 = vsel %vm263_vm0, %v608_v29, -inf }
 0x2d4   : > { %v498_v33 = vpack.c.bf16 %v490_v31, %v488_v24  ;;  %620 = vmax.xlane.f32.xlu0 %v619_v32 }
 0x2d5   : > { %1122 = vpow2.f32 %v631_v30 }
 0x2d6   : > { %1021 = vmatmul.msk.bf16.vlgmr.msrb.gmra.mxu1 %vm263_vm0, %v498_v33  ;;  %1124 = vpow2.f32 %v629_v34 }
 0x2da   : > { %v1334_v35 = vpop.f32.mrf.mxu0 }
 0x2db   : > { %v1123_v36 = vpop.eup %1122  ;;  %v493_v37 = vpop.f32.mrf.mxu3  ;;  %v622_v38 = vsel %vm263_vm0, %v1334_v35, -inf }
 0x2dc   : > { %623 = vmax.xlane.f32.xlu2 %v622_v38  ;;  %v640_v39 = vsel %vm263_vm0, %v1123_v36, 0.0  ;;  %v1125_v40 = vpop.eup %1124 }
 0x2dd   : > { %641 = vadd.xlane.f32.xlu1 %v640_v39  ;;  %v637_v42 = vsel %vm263_vm0, %v1125_v40, 0.0 }
 0x2e3   : > { %v495_v41 = vpop.f32.mrf.mxu3 }
 0x2e4   : > { %v499_v43 = vpack.c.bf16 %v495_v41, %v493_v37  ;;  %638 = vadd.xlane.f32.xlu2 %v637_v42 }
 0x2e6   : > { %1022 = vmatmul.msk.bf16.gmra.mxu1 %vm263_vm0, %v499_v43 }
 0x2e8   : > { %820 = vrot.lane.b32.xlu0 %v1258_v55, %s1164_s23 }
 0x2eb   : > { %v1343_v44 = vpop.f32.mrf.mxu3 }
 0x2f3   : > { %v1345_v45 = vpop.f32.mrf.mxu3 }
 0x2fb   : > { %v1347_v46 = vpop.f32.mrf.mxu3 }
 0x303   : > { %v1349_v47 = vpop.f32.mrf.mxu3 }
 0x30b   : > { %v762_v48 = vpop.f32.mrf.mxu3 }
 0x30c   : > { %v772_v49 = vsel %vm263_vm0, %v762_v48, -inf }
 0x30d   : > { %773 = vmax.xlane.f32.xlu2 %v772_v49 }
 0x313   : > { %v764_v50 = vpop.f32.mrf.mxu3 }
 0x314   : > { %v775_v51 = vsel %vm263_vm0, %v764_v50, -inf }
 0x315   : > { %776 = vmax.xlane.f32.xlu1 %v775_v51 }
 0x31b   : > { %v767_v52 = vpop.f32.mrf.mxu3 }
 0x31c   : > { %v778_v16 = vsel %vm263_vm0, %v767_v52, -inf }
 0x31d   : > { %779 = vmax.xlane.f32.xlu1 %v778_v16 }
 0x323   : > { %v769_v2 = vpop.f32.mrf.mxu3 }
 0x324   : > { %v781_v17 = vsel %vm263_vm0, %v769_v2, -inf }
 0x325   : > { %782 = vmax.xlane.f32.xlu0 %v781_v17 }
 0x336   : > { %661 = vrot.lane.b32.xlu1 %v1258_v55, %s1163_s22 }
 0x347   : > { %v621_v53 = vpop.xlane.xlu0 %620 }
 0x348   : > { %v627_v54 = vsub.f32 %v608_v29, %v621_v53 }
 0x34a   : > { %v633_v56 = vmul.f32 1.442695, %v627_v54 }
 0x34c   : > { %1126 = vpow2.f32 %v633_v56  ;;  %v1074_v56 = vld [vmem:[%s1417_s2 + $0x28] sm:$0xff] }
 0x34d   : > { %716 = vmatpush.bf16.msra.mxu1 %v1074_v56 }
 0x34f   : > { %v624_v21 = vpop.xlane.xlu2 %623 }
 0x350   : > { %v642_v57 = vpop.xlane.xlu1 %641  ;;  %v628_v26 = vsub.f32 %v1334_v35, %v624_v21  ;;  %v1076_v21 = vld [vmem:[%s1417_s2 + $0x38] sm:$0xff] }
 0x351   : > { %1128 = vrcp.f32 %v642_v57  ;;  %v1075_v57 = vld [vmem:[%s1417_s2 + $0x30] sm:$0xff] }
 0x352   : > { %v1357_v59 = vpop.eup %1126  ;;  %v635_v28 = vmul.f32 1.442695, %v628_v26 }
 0x353   : > { %v643_v0 = vsel %vm263_vm0, %v1357_v59, 0.0 }
 0x357   : > { %v639_v58 = vpop.xlane.xlu2 %638  ;;  %v1129_v60 = vpop.eup %1128 }
 0x358   : > { %1130 = vrcp.f32 %v639_v58  ;;  %v654_v62 = vmul.f32 %v1129_v60, %v1123_v36  ;;  %v1073_v58 = vld [vmem:[%s1417_s2 + $0x20] sm:$0xff] }
 0x359   : > { %717 = vmatpush.bf16.msra.mxu1 %v1073_v58 }
 0x35a   : > { %v821_v1 = vpop.permute.xlu0 %820 }
 0x35b   : > { %836 = vmatpush.bf16.msra.mxu0 %v821_v1 }
 0x35e   : > { %v1131_v61 = vpop.eup %1130 }
 0x35f   : > { %v653_v63 = vmul.f32 %v1131_v61, %v1125_v40 }
 0x360   : > { %644 = vadd.xlane.f32.xlu1 %v643_v0 }
 0x361   : > { %v657_v55 = vpack.c.bf16 %v654_v62, %v653_v63 }
 0x380   : > { %v774_v3 = vpop.xlane.xlu2 %773 }
 0x381   : > { %v784_v4 = vsub.f32 %v762_v48, %v774_v3 }
 0x383   : > { %v788_v5 = vmul.f32 1.442695, %v784_v4 }
 0x385   : > { %1132 = vpow2.f32 %v788_v5 }
 0x388   : > { %v777_v7 = vpop.xlane.xlu1 %776 }
 0x389   : > { %v785_v8 = vsub.f32 %v764_v50, %v777_v7 }
 0x38b   : > { %v1133_v9 = vpop.eup %1132  ;;  %v790_v10 = vmul.f32 1.442695, %v785_v8  ;;  %v527_v8 = vpop.f32.mrf.mxu1 }
 0x38c   : > { %v796_v11 = vsel %vm263_vm0, %v1133_v9, 0.0 }
 0x38d   : > { %1134 = vpow2.f32 %v790_v10  ;;  %797 = vadd.xlane.f32.xlu0 %v796_v11 }
 0x390   : > { %v780_v19 = vpop.xlane.xlu1 %779 }
 0x391   : > { %v786_v24 = vsub.f32 %v767_v52, %v780_v19 }
 0x393   : > { %v1135_v12 = vpop.eup %1134  ;;  %v792_v25 = vmul.f32 1.442695, %v786_v24 }
 0x394   : > { %v799_v13 = vsel %vm263_vm0, %v1135_v12, 0.0 }
 0x395   : > { %800 = vadd.xlane.f32.xlu2 %v799_v13 }
 0x398   : > { %v783_v14 = vpop.xlane.xlu0 %782 }
 0x399   : > { %v787_v15 = vsub.f32 %v769_v2, %v783_v14 }
 0x39b   : > { %v794_v18 = vmul.f32 1.442695, %v787_v15 }
 0x39d   : > { %1136 = vpow2.f32 %v794_v18  ;;  %v892_v18 = vld [vmem:[%s1397_s19] sm:$0xff] }
 0x39e   : > { %1138 = vpow2.f32 %v792_v25 }
 0x39f   : > { %1140 = vpow2.f32 %v635_v28 }
 0x3a1   : > { %818 = vrot.lane.b32.xlu0 %v1281_v6, %s1164_s23  ;;  %s217_s23 = scalar_lea.vmem %s1419_s4, %s1063_s14 }
 0x3a3   : > { %v1137_v20 = vpop.eup %1136 }
 0x3a4   : > { %v805_v22 = vsel %vm263_vm0, %v1137_v20, 0.0  ;;  %v1139_v27 = vpop.eup %1138 }
 0x3a5   : > { %806 = vadd.xlane.f32.xlu1 %v805_v22  ;;  %v802_v29 = vsel %vm263_vm0, %v1139_v27, 0.0  ;;  %v1141_v30 = vpop.eup %1140 }
 0x3a6   : > { %v646_v31 = vsel %vm263_vm0, %v1141_v30, 0.0 }
 0x3a8   : > { %v662_v23 = vpop.permute.xlu1 %661 }
 0x3a9   : > { %677 = vmatpush.bf16.msrb.mxu2 %v662_v23 }
 0x3ad   : > { %659 = vrot.lane.b32.xlu2 %v1281_v6, %s1163_s22 }
 0x3cb   : > { %803 = vadd.xlane.f32.xlu0 %v802_v29 }
 0x3d3   : > { %v645_v40 = vpop.xlane.xlu1 %644 }
 0x3d6   : > { %647 = vadd.xlane.f32.xlu2 %v646_v31 }
 0x400   : > { %v798_v32 = vpop.xlane.xlu0 %797 }
 0x408   : > { %v801_v33 = vpop.xlane.xlu2 %800 }
 0x409   : > { %1142 = vrcp.f32 %v801_v33 }
 0x40a   : > { %1144 = vrcp.f32 %v798_v32 }
 0x40f   : > { %v1143_v6 = vpop.eup %1142 }
 0x410   : > { %v1145_v34 = vpop.eup %1144  ;;  %v660_v36 = vpop.permute.xlu2 %659  ;;  %v813_v37 = vmul.f32 %v1143_v6, %v1135_v12  ;;  %v565_v12 = vadd.f32 %v1343_v44, %v527_v8  ;;  %v894_v6 = vld [vmem:[%s1397_s19 + $0x10] sm:$0xff] }
 0x411   : > { %678 = vmatpush.bf16.msrb.mxu2 %v660_v36  ;;  %v812_v35 = vmul.f32 %v1145_v34, %v1133_v9  ;;  %v529_v9 = vpop.f32.mrf.mxu1 }
 0x412   : > { %v567_v23 = vadd.f32 %v1345_v45, %v529_v9 }
 0x413   : > { %v819_v38 = vpop.permute.xlu0 %818  ;;  %v816_v39 = vpack.c.bf16 %v813_v37, %v812_v35 }
 0x414   : > { %1035 = vmatmul.msk.bf16.vlgmr.msrb.gmra.mxu2 %vm263_vm0, %v657_v55  ;;  %837 = vmatpush.bf16.msra.mxu0 %v819_v38 }
 0x415   : > { %875 = vmatpush.bf16.msra.mxu2 %v1076_v21 }
 0x417   : > { %1049 = vmatmul.msk.bf16.vlgmr.msra.gmra.mxu0 %vm263_vm0, %v816_v39 }
 0x418   : > { %v807_v41 = vpop.xlane.xlu1 %806 }
 0x419   : > { %1146 = vrcp.f32 %v807_v41  ;;  %876 = vmatpush.bf16.msra.mxu2 %v1075_v57  ;;  %v532_v10 = vpop.f32.mrf.mxu1  ;;  %v895_v41 = vld [vmem:[%s1397_s19 + $0x18] sm:$0xff] }
 0x41a   : > { %v570_v31 = vadd.f32 %v1347_v46, %v532_v10 }
 0x41f   : > { %v1147_v43 = vpop.eup %1146 }
 0x420   : > { %v815_v50 = vmul.f32 %v1147_v43, %v1137_v20  ;;  %v1089_v20 = vld [vmem:[%s1418_s3] ss:$0 sm:$0xff] }
 0x421   : > { %v534_v11 = vpop.f32.mrf.mxu1 }
 0x422   : > { %v572_v37 = vadd.f32 %v1349_v47, %v534_v11 }
 0x43e   : > { %v804_v42 = vpop.xlane.xlu0 %803 }
 0x43f   : > { %1148 = vrcp.f32 %v804_v42 }
 0x440   : > { %1150 = vrcp.f32 %v645_v40 }
 0x445   : > { %v1149_v48 = vpop.eup %1148 }
 0x446   : > { %v814_v49 = vmul.f32 %v1149_v48, %v1139_v27  ;;  %v1151_v16 = vpop.eup %1150  ;;  %v893_v27 = vld [vmem:[%s1397_s19 + $0x8] sm:$0xff] }
 0x447   : > { %v655_v17 = vmul.f32 %v1151_v16, %v1357_v59 }
 0x448   : > { %v817_v51 = vpack.c.bf16 %v815_v50, %v814_v49 }
 0x449   : > { %v648_v52 = vpop.xlane.xlu2 %647 }
 0x44a   : > { %1152 = vrcp.f32 %v648_v52  ;;  %1050 = vmatmul.msk.bf16.gmra.mxu0 %vm263_vm0, %v817_v51 }
 0x450   : > { %v1153_v2 = vpop.eup %1152 }
 0x451   : > { %v656_v53 = vmul.f32 %v1153_v2, %v1141_v30 }
 0x453   : > { %v658_v54 = vpack.c.bf16 %v656_v53, %v655_v17 }
 0x455   : > { %1036 = vmatmul.msk.bf16.gmra.mxu2 %vm263_vm0, %v658_v54 }
 0x494   : > { %v839_v59 = vpop.f32.mrf.mxu0 }
 0x497   : > { %v680_v60 = vpop.f32.mrf.mxu2 }
 0x49c   : > { %v841_v61 = vpop.f32.mrf.mxu0 }
 0x49d   : > { %v849_v62 = vpack.c.bf16 %v841_v61, %v839_v59 }
 0x49f   : > { %v682_v63 = vpop.f32.mrf.mxu2  ;;  %1059 = vmatmul.msk.bf16.vlgmr.msra.gmra.mxu2 %vm263_vm0, %v849_v62 }
 0x4a0   : > { %v690_v0 = vpack.c.bf16 %v682_v63, %v680_v60 }
 0x4a2   : > { %1045 = vmatmul.msk.bf16.vlgmr.msra.gmra.mxu1 %vm263_vm0, %v690_v0 }
 0x4c7   : > { %v844_v55 = vpop.f32.mrf.mxu0 }
 0x4cf   : > { %v846_v1 = vpop.f32.mrf.mxu0 }
 0x4d0   : > { %v850_v3 = vpack.c.bf16 %v846_v1, %v844_v55 }
 0x4d2   : > { %1060 = vmatmul.msk.bf16.gmra.mxu2 %vm263_vm0, %v850_v3 }
 0x4d8   : > { %v685_v4 = vpop.f32.mrf.mxu2 }
 0x4e0   : > { %v687_v5 = vpop.f32.mrf.mxu2 }
 0x4e1   : > { %v691_v7 = vpack.c.bf16 %v687_v5, %v685_v4 }
 0x4e3   : > { %1046 = vmatmul.msk.bf16.gmra.mxu1 %vm263_vm0, %v691_v7 }
 0x51f   : > { %v719_v13 = vpop.f32.mrf.mxu1 }
 0x520   : > { %v729_v14 = vadd.f32 %v719_v13, %v565_v12 }
 0x522   : > { %v878_v15 = vpop.f32.mrf.mxu2 }
 0x523   : > { %v888_v19 = vadd.f32 %v878_v15, %v729_v14 }
 0x525   : > { %v896_v22 = vadd.f32 %v892_v18, %v888_v19 }
 0x527   : > { %v904_v44 = vadd.f32 %v1089_v20, %v896_v22  ;;  %v721_v24 = vpop.f32.mrf.mxu1 }
 0x528   : > { %v730_v25 = vadd.f32 %v721_v24, %v567_v23 }
 0x529   : > { %908 = vst [vmem:[%s217_s23] sm:$0xff] %v904_v44 }
 0x52a   : > { %v880_v26 = vpop.f32.mrf.mxu2 }
 0x52b   : > { %v889_v28 = vadd.f32 %v880_v26, %v730_v25 }
 0x52d   : > { %v897_v29 = vadd.f32 %v893_v27, %v889_v28 }
 0x52f   : > { %v905_v30 = vadd.f32 %v1089_v20, %v897_v29 }
 0x531   : > { %909 = vst [vmem:[%s217_s23 + $0x8] sm:$0xff] %v905_v30 }
 0x555   : > { %v883_v32 = vpop.f32.mrf.mxu2 }
 0x55d   : > { %v885_v40 = vpop.f32.mrf.mxu2 }
 0x560   : > { %v724_v45 = vpop.f32.mrf.mxu1 }
 0x561   : > { %v731_v33 = vadd.f32 %v724_v45, %v570_v31 }
 0x563   : > { %v890_v34 = vadd.f32 %v883_v32, %v731_v33 }
 0x565   : > { %v898_v36 = vadd.f32 %v894_v6, %v890_v34 }
 0x567   : > { %v906_v35 = vadd.f32 %v1089_v20, %v898_v36 }
 0x568   : > { %v726_v38 = vpop.f32.mrf.mxu1 }
 0x569   : > { %910 = vst [vmem:[%s217_s23 + $0x10] sm:$0xff] %v906_v35  ;;  %v732_v39 = vadd.f32 %v726_v38, %v572_v37 }
 0x56b   : > { %v891_v42 = vadd.f32 %v885_v40, %v732_v39 }
 0x56d   : > { %v899_v43 = vadd.f32 %v895_v41, %v891_v42 }
 0x56f   : > { %v907_v48 = vadd.f32 %v1089_v20, %v899_v43 }
 0x571   : > { %911 = vst [vmem:[%s217_s23 + $0x18] sm:$0xff] %v907_v48 }
 0x572 PF: > { %s14_s15 = sadd.s32 1, %s1160_s15  }
 0x573   : > { %p11_p4 = scmp.ge.s32.totalorder %s14_s15, 4  }
 0x575   :  { %13 = sbr.rel (!%p11_p4) target bundleno = 1 (0x1), region = 69 }

// kernel: muq_forward.10
= control target key start
LH: loop header
LB: loop body
LE: loop exit
PB: predicated region body
PF: predicated region fallthrough
CT: control target
= control target key end

     0   :  { %v1115_v7 = vmov 128.0   ;;  %s1534_s0 = inlined_call_operand.vmem [shape: f32[64,128], index: 0, kind: input, shape index: {}]   ;;  %s1535_s1 = inlined_call_operand.vmem [shape: f32[1,128], index: 1, kind: input, shape index: {}]   ;;  %s1536_s2 = inlined_call_operand.vmem [shape: f32[1,128], index: 2, kind: input, shape index: {}]   ;;  %s1537_s3 = inlined_call_operand.vmem [shape: bf16[128,256], index: 3, kind: input, shape index: {}]   ;;  %s1538_s5 = inlined_call_operand.vmem [shape: bf16[256,128], index: 5, kind: input, shape index: {}]   ;;  %s1539_s4 = inlined_call_operand.vmem [shape: f32[1,256], index: 4, kind: input, shape index: {}]   ;;  %s1540_s6 = inlined_call_operand.vmem [shape: f32[1,128], index: 6, kind: input, shape index: {}]   ;;  %s1541_s7 = inlined_call_operand.vmem [shape: f32[64,128], index: 7, kind: output, shape index: {}]  }
   0x1   :  { %v34_v0 = vld [vmem:[%s1534_s0 + $0x20] sm:$0xff]  ;;  %v32_v1 = vld [vmem:[%s1534_s0 + $0x10] sm:$0xff]  ;;  %v35_v3 = vld [vmem:[%s1534_s0 + $0x28] sm:$0xff]  ;;  %1065 = vrcp.f32 %v1115_v7 }
   0x2   :  { %v30_v2 = vld [vmem:[%s1534_s0] sm:$0xff]  ;;  %48 = vadd.xlane.f32.xlu2 %v34_v0  ;;  %44 = vadd.xlane.f32.xlu1 %v32_v1  ;;  %v33_v4 = vld [vmem:[%s1534_s0 + $0x18] sm:$0xff]  ;;  %v31_v5 = vld [vmem:[%s1534_s0 + $0x8] sm:$0xff] }
   0x3   :  { %40 = vadd.xlane.f32.xlu0 %v30_v2  ;;  %v36_v6 = vld [vmem:[%s1534_s0 + $0x30] sm:$0xff]  ;;  %v1197_v30 = vld [vmem:[%s1534_s0 + $0x38] sm:$0xff]  ;;  %v924_v49 = vld [vmem:[%s1537_s3 + $0x60] sm:$0xf] }
   0x4   :  { %v932_v43 = vld [vmem:[%s1537_s3 + $0x70] sm:$0xf]  ;;  %v1021_v44 = vld [vmem:[%s1537_s3 + $0x74] sm:$0xf0]  ;;  %v1020_v45 = vld [vmem:[%s1537_s3 + $0x74] sm:$0xf] }
   0x5   :  { %v933_v46 = vor.u32 %v1021_v44, %v932_v43  ;;  %v934_v47 = vld [vmem:[%s1537_s3 + $0x78] sm:$0xf0]  ;;  %v1019_v50 = vld [vmem:[%s1537_s3 + $0x64] sm:$0xf0]  ;;  %v1018_v51 = vld [vmem:[%s1537_s3 + $0x64] sm:$0xf] }
   0x6   :  { %v937_v48 = vor.u32 %v1020_v45, %v934_v47  ;;  %v925_v52 = vor.u32 %v1019_v50, %v924_v49  ;;  %v926_v53 = vld [vmem:[%s1537_s3 + $0x68] sm:$0xf0]  ;;  %v916_v55 = vld [vmem:[%s1537_s3 + $0x50] sm:$0xf]  ;;  %v1017_v56 = vld [vmem:[%s1537_s3 + $0x54] sm:$0xf0] }
   0x7   :  { %v1066_v8 = vpop.eup %1065  ;;  %387 = vmatpush.bf16.msra.mxu0 %v933_v46  ;;  %v929_v54 = vor.u32 %v1018_v51, %v926_v53  ;;  %v1016_v57 = vld [vmem:[%s1537_s3 + $0x54] sm:$0xf]  ;;  %v917_v58 = vor.u32 %v1017_v56, %v916_v55  ;;  %v918_v59 = vld [vmem:[%s1537_s3 + $0x58] sm:$0xf0]  ;;  %v908_v61 = vld [vmem:[%s1537_s3 + $0x40] sm:$0xf] }
   0x8   :  { %v57_v9 = vmul.f32 128.0, %v1066_v8  ;;  %vm61_vm0 = vweird.f32 %v1066_v8  ;;  %416 = vmatpush.bf16.msra.mxu1 %v937_v48  ;;  %v921_v60 = vor.u32 %v1016_v57, %v918_v59  ;;  %v1015_v62 = vld [vmem:[%s1537_s3 + $0x44] sm:$0xf0]  ;;  %v1014_v63 = vld [vmem:[%s1537_s3 + $0x44] sm:$0xf] }
   0x9   :  { %v876_v43 = vld [vmem:[%s1537_s3] sm:$0xf]  ;;  %v1007_v44 = vld [vmem:[%s1537_s3 + $0x4] sm:$0xf0]  ;;  %v1006_v46 = vld [vmem:[%s1537_s3 + $0x4] sm:$0xf] }
   0xa   :  { %50 = vadd.xlane.f32.xlu2 %v35_v3  ;;  %46 = vadd.xlane.f32.xlu1 %v33_v4  ;;  %v58_v10 = vsub.f32 1.0, %v57_v9  ;;  %v877_v48 = vor.u32 %v1007_v44, %v876_v43 }
   0xb   :  { %42 = vadd.xlane.f32.xlu0 %v31_v5  ;;  %388 = vmatpush.bf16.msra.mxu0 %v925_v52 }
   0xc   :  { %v59_v11 = vmul.f32 %v1066_v8, %v58_v10  ;;  %417 = vmatpush.bf16.msra.mxu1 %v929_v54 }
   0xe   :  { %v60_v12 = vadd.f32 %v1066_v8, %v59_v11 }
   0xf   :  { %389 = vmatpush.bf16.msra.mxu0 %v917_v58 }
  0x10   :  { %v1177_v13 = vsel %vm61_vm0, %v1066_v8, %v60_v12  ;;  %418 = vmatpush.bf16.msra.mxu1 %v921_v60  ;;  %v902_v8 = vld [vmem:[%s1537_s3 + $0x38] sm:$0xf0]  ;;  %v892_v12 = vld [vmem:[%s1537_s3 + $0x20] sm:$0xf] }
  0x12   :  { %52 = vadd.xlane.f32.xlu2 %v36_v6 }
  0x75   :  { %v49_v14 = vpop.xlane.xlu2 %48  ;;  %v45_v15 = vpop.xlane.xlu1 %44 }
  0x76   :  { %v41_v16 = vpop.xlane.xlu0 %40  ;;  %v67_v26 = vmul.f32 %v1177_v13, %v49_v14  ;;  %v65_v27 = vmul.f32 %v1177_v13, %v45_v15  ;;  %v1011_v14 = vld [vmem:[%s1537_s3 + $0x24] sm:$0xf0] }
  0x77   :  { %v63_v17 = vmul.f32 %v1177_v13, %v41_v16  ;;  %v893_v15 = vor.u32 %v1011_v14, %v892_v12  ;;  %v1010_v16 = vld [vmem:[%s1537_s3 + $0x24] sm:$0xf] }
  0x78   :  { %v1201_v32 = vsub.f32 %v34_v0, %v67_v26  ;;  %v1203_v33 = vsub.f32 %v32_v1, %v65_v27  ;;  %v909_v0 = vor.u32 %v1015_v62, %v908_v61  ;;  %v910_v1 = vld [vmem:[%s1537_s3 + $0x48] sm:$0xf0] }
  0x79   :  { %v1180_v18 = vsub.f32 %v30_v2, %v63_v17  ;;  %v913_v2 = vor.u32 %v1014_v63, %v910_v1  ;;  %v894_v17 = vld [vmem:[%s1537_s3 + $0x28] sm:$0xf0] }
  0x7a   :  { %v83_v38 = vmul.f32 %v1201_v32, %v1201_v32  ;;  %v81_v39 = vmul.f32 %v1203_v33, %v1203_v33  ;;  %390 = vmatpush.bf16.msra.mxu0 %v909_v0 }
  0x7b   :  { %v79_v19 = vmul.f32 %v1180_v18, %v1180_v18  ;;  %419 = vmatpush.bf16.msra.mxu1 %v913_v2 }
  0x7d   :  { %87 = vadd.xlane.f32.xlu0 %v79_v19  ;;  %v51_v20 = vpop.xlane.xlu2 %50  ;;  %v47_v21 = vpop.xlane.xlu1 %46  ;;  %v897_v19 = vor.u32 %v1010_v16, %v894_v17 }
  0x7e   :  { %v66_v22 = vmul.f32 %v1177_v13, %v47_v21  ;;  %v43_v23 = vpop.xlane.xlu0 %42  ;;  %v68_v37 = vmul.f32 %v1177_v13, %v51_v20  ;;  %v884_v21 = vld [vmem:[%s1537_s3 + $0x10] sm:$0xf] }
  0x7f   :  { %v64_v24 = vmul.f32 %v1177_v13, %v43_v23  ;;  %v1008_v23 = vld [vmem:[%s1537_s3 + $0x14] sm:$0xf] }
  0x80   :  { %v1186_v25 = vsub.f32 %v33_v4, %v66_v22  ;;  %v1216_v41 = vsub.f32 %v35_v3, %v68_v37  ;;  %v900_v3 = vld [vmem:[%s1537_s3 + $0x30] sm:$0xf]  ;;  %v1013_v4 = vld [vmem:[%s1537_s3 + $0x34] sm:$0xf0] }
  0x81   :  { %v1190_v28 = vsub.f32 %v31_v5, %v64_v24  ;;  %v1012_v5 = vld [vmem:[%s1537_s3 + $0x34] sm:$0xf]  ;;  %v901_v7 = vor.u32 %v1013_v4, %v900_v3  ;;  %v1009_v22 = vld [vmem:[%s1537_s3 + $0x14] sm:$0xf0] }
  0x82   :  { %v82_v29 = vmul.f32 %v1186_v25, %v1186_v25  ;;  %v84_v42 = vmul.f32 %v1216_v41, %v1216_v41  ;;  %v905_v10 = vor.u32 %v1012_v5, %v902_v8  ;;  %v1331_v8 = vld [vmem:[%s1535_s1] ss:$0 sm:$0xff] }
  0x83   :  { %v80_v31 = vmul.f32 %v1190_v28, %v1190_v28  ;;  %391 = vmatpush.bf16.msra.mxu0 %v901_v7 }
  0x84   :  { %93 = vadd.xlane.f32.xlu2 %v82_v29  ;;  %420 = vmatpush.bf16.msra.mxu1 %v905_v10  ;;  %v885_v29 = vor.u32 %v1009_v22, %v884_v21  ;;  %v1341_v21 = vld [vmem:[%s1536_s2] ss:$0 sm:$0xff] }
  0x85   :  { %54 = vadd.xlane.f32.xlu0 %v1197_v30  ;;  %89 = vadd.xlane.f32.xlu1 %v80_v31  ;;  %v53_v34 = vpop.xlane.xlu2 %52  ;;  %v886_v31 = vld [vmem:[%s1537_s3 + $0x18] sm:$0xf0] }
  0x86   :  { %v69_v35 = vmul.f32 %v1177_v13, %v53_v34  ;;  %v889_v37 = vor.u32 %v1008_v23, %v886_v31 }
  0x87   :  { %392 = vmatpush.bf16.msra.mxu0 %v893_v15 }
  0x88   :  { %v1207_v36 = vsub.f32 %v36_v6, %v69_v35  ;;  %421 = vmatpush.bf16.msra.mxu1 %v897_v19  ;;  %v1037_v19 = vld [vmem:[%s1538_s5 + $0x78] sm:$0xff] }
  0x89   :  { %762 = vmatpush.bf16.msra.mxu3 %v1037_v19 }
  0x8a   :  { %v85_v40 = vmul.f32 %v1207_v36, %v1207_v36 }
  0x8b   :  { %393 = vmatpush.bf16.msra.mxu0 %v885_v29 }
  0x8c   :  { %99 = vadd.xlane.f32.xlu2 %v85_v40  ;;  %422 = vmatpush.bf16.msra.mxu1 %v889_v37 }
  0x8d   :  { %95 = vadd.xlane.f32.xlu0 %v83_v38  ;;  %91 = vadd.xlane.f32.xlu1 %v81_v39 }
  0x8f   :  { %394 = vmatpush.bf16.msra.mxu0 %v877_v48 }
  0x95   :  { %97 = vadd.xlane.f32.xlu1 %v84_v42 }
  0xf0   :  { %v88_v6 = vpop.xlane.xlu0 %87 }
  0xf1   :  { %v103_v9 = vmul.f32 %v88_v6, %v1177_v13 }
  0xf3   :  { %v111_v11 = vadd.f32 1e-05, %v103_v9 }
  0xf5   :  { %1067 = vrsqrt.f32 %v111_v11  ;;  %vm125_vm2 = vweird.f32 %v111_v11 }
  0xf7   :  { %v94_v20 = vpop.xlane.xlu2 %93 }
  0xf8   :  { %v106_v24 = vmul.f32 %v94_v20, %v1177_v13  ;;  %v90_v26 = vpop.xlane.xlu1 %89  ;;  %v55_v27 = vpop.xlane.xlu0 %54 }
  0xf9   :  { %v104_v34 = vmul.f32 %v90_v26, %v1177_v13  ;;  %v70_v35 = vmul.f32 %v1177_v13, %v55_v27 }
  0xfa   :  { %v114_v38 = vadd.f32 1e-05, %v106_v24 }
  0xfb   :  { %v1068_v39 = vpop.eup %1067  ;;  %v112_v40 = vadd.f32 1e-05, %v104_v34  ;;  %v1309_v42 = vsub.f32 %v1197_v30, %v70_v35  ;;  %v878_v30 = vld [vmem:[%s1537_s3 + $0x8] sm:$0xf0] }
  0xfc   :  { %v120_v45 = vmul.f32 %v1068_v39, %v111_v11  ;;  %1069 = vrsqrt.f32 %v114_v38  ;;  %v881_v50 = vor.u32 %v1006_v46, %v878_v30  ;;  %vm126_vm1 = vweird.f32 %v1068_v39 }
  0xfd   :  { %1071 = vrsqrt.f32 %v112_v40  ;;  %v86_v47 = vmul.f32 %v1309_v42, %v1309_v42  ;;  %vm127_vm3 = vmor %vm125_vm2, %vm126_vm1  ;;  %vm135_vm4 = vweird.f32 %v112_v40  ;;  %vm155_vm6 = vweird.f32 %v114_v38 }
  0xfe   :  { %v121_v49 = vmul.f32 %v1068_v39, %v120_v45  ;;  %423 = vmatpush.bf16.msra.mxu1 %v881_v50 }
  0xff   :  { %101 = vadd.xlane.f32.xlu0 %v86_v47 }
 0x100   :  { %v122_v51 = vmul.f32 0.5, %v121_v49  ;;  %v92_v52 = vpop.xlane.xlu1 %91  ;;  %v96_v53 = vpop.xlane.xlu0 %95 }
 0x101   :  { %v105_v54 = vmul.f32 %v92_v52, %v1177_v13  ;;  %v107_v55 = vmul.f32 %v96_v53, %v1177_v13 }
 0x102   :  { %v1070_v56 = vpop.eup %1069  ;;  %v123_v57 = vsub.f32 1.5, %v122_v51 }
 0x103   :  { %v1072_v58 = vpop.eup %1071  ;;  %v150_v59 = vmul.f32 %v1070_v56, %v114_v38  ;;  %v113_v60 = vadd.f32 1e-05, %v105_v54  ;;  %v115_v61 = vadd.f32 1e-05, %v107_v55  ;;  %vm156_vm7 = vweird.f32 %v1070_v56 }
 0x104   :  { %v124_v62 = vmul.f32 %v1068_v39, %v123_v57  ;;  %v130_v63 = vmul.f32 %v1072_v58, %v112_v40  ;;  %vm136_vm5 = vweird.f32 %v1072_v58  ;;  %vm1334_vm9 = vmor %vm155_vm6, %vm156_vm7 }
 0x105   :  { %v151_v0 = vmul.f32 %v1070_v56, %v150_v59  ;;  %1073 = vrsqrt.f32 %v113_v60  ;;  %vm137_vm8 = vmor %vm135_vm4, %vm136_vm5  ;;  %vm145_vm10 = vweird.f32 %v113_v60  ;;  %vm165_vm12 = vweird.f32 %v115_v61 }
 0x106   :  { %v131_v1 = vmul.f32 %v1072_v58, %v130_v63  ;;  %1075 = vrsqrt.f32 %v115_v61  ;;  %v128_v2 = vsel %vm127_vm3, %v1068_v39, %v124_v62 }
 0x107   :  { %v152_v3 = vmul.f32 0.5, %v151_v0  ;;  %v199_v9 = vmul.f32 %v128_v2, %v1180_v18  ;;  %v100_v2 = vpop.xlane.xlu2 %99 }
 0x108   :  { %v132_v4 = vmul.f32 0.5, %v131_v1  ;;  %v98_v5 = vpop.xlane.xlu1 %97 }
 0x109   :  { %v153_v6 = vsub.f32 1.5, %v152_v3  ;;  %v108_v7 = vmul.f32 %v98_v5, %v1177_v13  ;;  %v210_v18 = vmul.f32 %v1331_v8, %v199_v9  ;;  %v109_v3 = vmul.f32 %v100_v2, %v1177_v13 }
 0x10a   :  { %v133_v10 = vsub.f32 1.5, %v132_v4 }
 0x10b   :  { %v1074_v11 = vpop.eup %1073  ;;  %v154_v14 = vmul.f32 %v1070_v56, %v153_v6  ;;  %v116_v17 = vadd.f32 1e-05, %v108_v7  ;;  %v221_v35 = vadd.f32 %v1341_v21, %v210_v18  ;;  %v1036_v18 = vld [vmem:[%s1538_s5 + $0x70] sm:$0xff] }
 0x10c   :  { %v1076_v12 = vpop.eup %1075  ;;  %v134_v15 = vmul.f32 %v1072_v58, %v133_v10  ;;  %v140_v16 = vmul.f32 %v1074_v11, %v113_v60  ;;  %vm146_vm11 = vweird.f32 %v1074_v11  ;;  %763 = vmatpush.bf16.msra.mxu3 %v1036_v18 }
 0x10d   :  { %v160_v20 = vmul.f32 %v1076_v12, %v115_v61  ;;  %1077 = vrsqrt.f32 %v116_v17  ;;  %v158_v27 = vsel %vm1334_vm9, %v1070_v56, %v154_v14  ;;  %vm147_vm13 = vmor %vm145_vm10, %vm146_vm11  ;;  %vm166_vm14 = vweird.f32 %v1076_v12 }
 0x10e   :  { %v138_v22 = vsel %vm137_vm8, %v1072_v58, %v134_v15  ;;  %v141_v23 = vmul.f32 %v1074_v11, %v140_v16  ;;  %v202_v38 = vmul.f32 %v158_v27, %v1186_v25  ;;  %vm167_vm15 = vmor %vm165_vm12, %vm166_vm14  ;;  %vm175_vm0 = vweird.f32 %v116_v17 }
 0x10f   :  { %v200_v24 = vmul.f32 %v138_v22, %v1190_v28  ;;  %v161_v26 = vmul.f32 %v1076_v12, %v160_v20 }
 0x110   :  { %v142_v29 = vmul.f32 0.5, %v141_v23  ;;  %v213_v47 = vmul.f32 %v1331_v8, %v202_v38  ;;  %v1034_v38 = vld [vmem:[%s1538_s5 + $0x60] sm:$0xff] }
 0x111   :  { %v211_v31 = vmul.f32 %v1331_v8, %v200_v24  ;;  %v162_v34 = vmul.f32 0.5, %v161_v26 }
 0x112   :  { %v143_v37 = vsub.f32 1.5, %v142_v29  ;;  %v224_v52 = vadd.f32 %v1341_v21, %v213_v47  ;;  %v1027_v29 = vld [vmem:[%s1538_s5 + $0x28] sm:$0xff] }
 0x113   :  { %v222_v39 = vadd.f32 %v1341_v21, %v211_v31  ;;  %v163_v28 = vsub.f32 1.5, %v162_v34  ;;  %v1078_v40 = vpop.eup %1077  ;;  %v1035_v31 = vld [vmem:[%s1538_s5 + $0x68] sm:$0xff] }
 0x114   :  { %v144_v43 = vmul.f32 %v1074_v11, %v143_v37  ;;  %v170_v46 = vmul.f32 %v1078_v40, %v116_v17  ;;  %vm176_vm1 = vweird.f32 %v1078_v40  ;;  %v1029_v17 = vld [vmem:[%s1538_s5 + $0x38] sm:$0xff]  ;;  %764 = vmatpush.bf16.msra.mxu3 %v1035_v31 }
 0x115   :  { %v1041_v44 = vpack.c.bf16 %v222_v39, %v221_v35  ;;  %v164_v45 = vmul.f32 %v1076_v12, %v163_v28  ;;  %vm177_vm2 = vmor %vm175_vm0, %vm176_vm1  ;;  %733 = vmatpush.bf16.msra.mxu2 %v1029_v17 }
 0x116   :  { %v148_v30 = vsel %vm147_vm13, %v1074_v11, %v144_v43  ;;  %v171_v49 = vmul.f32 %v1078_v40, %v170_v46  ;;  %v1023_v46 = vld [vmem:[%s1538_s5 + $0x8] sm:$0xff] }
 0x117   :  { %1042 = vst [vmem:[#allocation2 + $0x10] sm:$0xff] %v1041_v44   ;;  %v201_v48 = vmul.f32 %v148_v30, %v1203_v33  ;;  %v168_v50 = vsel %vm167_vm15, %v1076_v12, %v164_v45  ;;  %v1033_v44 = vld [vmem:[%s1538_s5 + $0x58] sm:$0xff]  ;;  %v277_v45 = vld [vmem:[%s1539_s4] sm:$0x3]  ;;  %v1031_v30 = vld [vmem:[%s1538_s5 + $0x48] sm:$0xff] }
 0x118   :  { %v172_v51 = vmul.f32 0.5, %v171_v49  ;;  %v203_v55 = vmul.f32 %v168_v50, %v1201_v32  ;;  %765 = vmatpush.bf16.msra.mxu3 %v1034_v38  ;;  %v1030_v49 = vld [vmem:[%s1538_s5 + $0x40] sm:$0xff]  ;;  %v1423_v50 = vperm.slane %v277_v45, 1 }
 0x119   :  { %v212_v25 = vmul.f32 %v1331_v8, %v201_v48  ;;  %v1022_v48 = vld [vmem:[%s1538_s5] sm:$0xff] }
 0x11a   :  { %v173_v54 = vsub.f32 1.5, %v172_v51  ;;  %v214_v59 = vmul.f32 %v1331_v8, %v203_v55 }
 0x11b   :  { %v223_v53 = vadd.f32 %v1341_v21, %v212_v25  ;;  %v1421_v25 = vperm.slane %v277_v45, 0 }
 0x11c   :  { %v174_v57 = vmul.f32 %v1078_v40, %v173_v54  ;;  %v225_v62 = vadd.f32 %v1341_v21, %v214_v59  ;;  %766 = vmatpush.bf16.msra.mxu3 %v1033_v44 }
 0x11d   :  { %v1046_v56 = vpack.c.bf16 %v224_v52, %v223_v53 }
 0x11e   :  { %v1002_v58 = vld [vmem:[#allocation2 + $0x10] sm:$0xff]  ;;  %v178_v33 = vsel %vm177_vm2, %v1078_v40, %v174_v57 }
 0x11f   :  { %1058 = vst [vmem:[#allocation2] sm:$0xff] %v1046_v56   ;;  %v204_v60 = vmul.f32 %v178_v33, %v1216_v41  ;;  %395 = vmatmul.bf16.vlgmr.msra.gmra.mxu0 %v1002_v58  ;;  %424 = vmatmul.bf16.vlgmr.msra.gmra.mxu1 %v1002_v58  ;;  %v117_v41 = vadd.f32 1e-05, %v109_v3 }
 0x121   :  { %v215_v61 = vmul.f32 %v1331_v8, %v204_v60  ;;  %1079 = vrsqrt.f32 %v117_v41  ;;  %vm185_vm3 = vweird.f32 %v117_v41 }
 0x123   :  { %v226_v63 = vadd.f32 %v1341_v21, %v215_v61 }
 0x125   :  { %v1051_v0 = vpack.c.bf16 %v226_v63, %v225_v62 }
 0x126   :  { %v1003_v32 = vld [vmem:[#allocation2] sm:$0xff] }
 0x127   :  { %1059 = vst [vmem:[#allocation2 + $0x18] sm:$0xff] %v1051_v0   ;;  %v1080_v4 = vpop.eup %1079 }
 0x128   :  { %v180_v5 = vmul.f32 %v1080_v4, %v117_v41  ;;  %vm186_vm4 = vweird.f32 %v1080_v4 }
 0x129   :  { %vm187_vm5 = vmor %vm185_vm3, %vm186_vm4 }
 0x12a   :  { %v181_v6 = vmul.f32 %v1080_v4, %v180_v5 }
 0x12c   :  { %v182_v11 = vmul.f32 0.5, %v181_v6 }
 0x12e   :  { %v1004_v1 = vld [vmem:[#allocation2 + $0x18] sm:$0xff]  ;;  %v183_v12 = vsub.f32 1.5, %v182_v11 }
 0x12f   :  { %400 = vmatmul.bf16.gmra.mxu0 %v1003_v32  ;;  %429 = vmatmul.bf16.gmra.mxu1 %v1003_v32 }
 0x130   :  { %v184_v15 = vmul.f32 %v1080_v4, %v183_v12 }
 0x132   :  { %v188_v22 = vsel %vm187_vm5, %v1080_v4, %v184_v15 }
 0x133   :  { %v205_v26 = vmul.f32 %v188_v22, %v1207_v36  ;;  %v1026_v36 = vld [vmem:[%s1538_s5 + $0x20] sm:$0xff] }
 0x135   :  { %v216_v35 = vmul.f32 %v1331_v8, %v205_v26 }
 0x137   :  { %v227_v28 = vadd.f32 %v1341_v21, %v216_v35 }
 0x13f   :  { %405 = vmatmul.bf16.gmra.mxu0 %v1004_v1  ;;  %434 = vmatmul.bf16.gmra.mxu1 %v1004_v1 }
 0x172   :  { %v102_v7 = vpop.xlane.xlu0 %101 }
 0x173   :  { %v110_v9 = vmul.f32 %v102_v7, %v1177_v13  ;;  %v1028_v13 = vld [vmem:[%s1538_s5 + $0x30] sm:$0xff] }
 0x174   :  { %734 = vmatpush.bf16.msra.mxu2 %v1028_v13 }
 0x175   :  { %v118_v10 = vadd.f32 1e-05, %v110_v9 }
 0x177   :  { %1081 = vrsqrt.f32 %v118_v10  ;;  %vm195_vm7 = vweird.f32 %v118_v10 }
 0x178   :  { %735 = vmatpush.bf16.msra.mxu2 %v1027_v29 }
 0x17c   :  { %736 = vmatpush.bf16.msra.mxu2 %v1026_v36 }
 0x17d   :  { %v1082_v14 = vpop.eup %1081 }
 0x17e   :  { %v190_v16 = vmul.f32 %v1082_v14, %v118_v10  ;;  %vm196_vm6 = vweird.f32 %v1082_v14 }
 0x17f   :  { %vm197_vm8 = vmor %vm195_vm7, %vm196_vm6 }
 0x180   :  { %v191_v20 = vmul.f32 %v1082_v14, %v190_v16 }
 0x182   :  { %v192_v23 = vmul.f32 0.5, %v191_v20 }
 0x184   :  { %v193_v24 = vsub.f32 1.5, %v192_v23 }
 0x186   :  { %v194_v27 = vmul.f32 %v1082_v14, %v193_v24 }
 0x188   :  { %v198_v34 = vsel %vm197_vm8, %v1082_v14, %v194_v27 }
 0x189   :  { %v206_v37 = vmul.f32 %v198_v34, %v1309_v42  ;;  %v1025_v42 = vld [vmem:[%s1538_s5 + $0x18] sm:$0xff] }
 0x18a   :  { %737 = vmatpush.bf16.msra.mxu2 %v1025_v42 }
 0x18b   :  { %v217_v39 = vmul.f32 %v1331_v8, %v206_v37  ;;  %v1024_v8 = vld [vmem:[%s1538_s5 + $0x10] sm:$0xff] }
 0x18d   :  { %v228_v40 = vadd.f32 %v1341_v21, %v217_v39  ;;  %v1032_v21 = vld [vmem:[%s1538_s5 + $0x50] sm:$0xff] }
 0x18e   :  { %738 = vmatpush.bf16.msra.mxu2 %v1024_v8  ;;  %767 = vmatpush.bf16.msra.mxu3 %v1032_v21 }
 0x18f   :  { %v1056_v43 = vpack.c.bf16 %v228_v40, %v227_v28 }
 0x191   :  { %1060 = vst [vmem:[#allocation2 + $0x8] sm:$0xff] %v1056_v43  }
 0x192   :  { %739 = vmatpush.bf16.msra.mxu2 %v1023_v46  ;;  %768 = vmatpush.bf16.msra.mxu3 %v1031_v30 }
 0x196   :  { %740 = vmatpush.bf16.msra.mxu2 %v1022_v48  ;;  %769 = vmatpush.bf16.msra.mxu3 %v1030_v49 }
 0x198   :  { %v1005_v47 = vld [vmem:[#allocation2 + $0x8] sm:$0xff] }
 0x199   :  { %410 = vmatmul.bf16.gmra.mxu0 %v1005_v47  ;;  %439 = vmatmul.bf16.gmra.mxu1 %v1005_v47 }
 0x19c   :  { %v396_v51 = vpop.f32.mrf.mxu0  ;;  %v425_v52 = vpop.f32.mrf.mxu1 }
 0x19d   :  { %v397_v53 = vadd.f32 %v396_v51, %v1421_v25  ;;  %v426_v54 = vadd.f32 %v425_v52, %v1423_v50 }
 0x19f   :  { %v461_v55 = vmul.f32 0.044715, %v397_v53  ;;  %v462_v56 = vmul.f32 0.044715, %v426_v54  ;;  %v445_v40 = vmul.f32 0.5, %v397_v53  ;;  %v446_v21 = vmul.f32 0.5, %v426_v54 }
 0x1a1   :  { %v477_v57 = vmul.f32 %v461_v55, %v397_v53  ;;  %v478_v58 = vmul.f32 %v462_v56, %v426_v54 }
 0x1a3   :  { %v493_v33 = vmul.f32 %v477_v57, %v397_v53  ;;  %v494_v59 = vmul.f32 %v478_v58, %v426_v54 }
 0x1a4   :  { %v398_v60 = vpop.f32.mrf.mxu0  ;;  %v427_v61 = vpop.f32.mrf.mxu1 }
 0x1a5   :  { %v399_v62 = vadd.f32 %v398_v60, %v1421_v25  ;;  %v428_v63 = vadd.f32 %v427_v61, %v1423_v50  ;;  %v509_v0 = vadd.f32 %v493_v33, %v397_v53  ;;  %v510_v32 = vadd.f32 %v494_v59, %v426_v54 }
 0x1a7   :  { %v463_v1 = vmul.f32 0.044715, %v399_v62  ;;  %v464_v2 = vmul.f32 0.044715, %v428_v63  ;;  %v525_v3 = vmul.f32 0.7978846, %v509_v0 }
 0x1a8   :  { %v526_v5 = vmul.f32 0.7978846, %v510_v32  ;;  %v447_v44 = vmul.f32 0.5, %v399_v62  ;;  %v448_v46 = vmul.f32 0.5, %v428_v63 }
 0x1a9   :  { %v479_v41 = vmul.f32 %v463_v1, %v399_v62  ;;  %v480_v4 = vmul.f32 %v464_v2, %v428_v63  ;;  %1083 = vtanh.f32 %v525_v3 }
 0x1aa   :  { %1085 = vtanh.f32 %v526_v5 }
 0x1ab   :  { %v495_v6 = vmul.f32 %v479_v41, %v399_v62  ;;  %v496_v7 = vmul.f32 %v480_v4, %v428_v63 }
 0x1ac   :  { %v401_v9 = vpop.f32.mrf.mxu0  ;;  %v430_v10 = vpop.f32.mrf.mxu1 }
 0x1ad   :  { %v1430_v11 = vadd.f32 %v401_v9, %v1421_v25  ;;  %v1433_v12 = vadd.f32 %v430_v10, %v1423_v50  ;;  %v511_v14 = vadd.f32 %v495_v6, %v399_v62  ;;  %v512_v15 = vadd.f32 %v496_v7, %v428_v63 }
 0x1af   :  { %v465_v16 = vmul.f32 0.044715, %v1430_v11  ;;  %v466_v17 = vmul.f32 0.044715, %v1433_v12  ;;  %v527_v19 = vmul.f32 0.7978846, %v511_v14  ;;  %v1084_v22 = vpop.eup %1083 }
 0x1b0   :  { %v528_v20 = vmul.f32 0.7978846, %v512_v15  ;;  %v1086_v26 = vpop.eup %1085  ;;  %v557_v37 = vadd.f32 1.0, %v1084_v22  ;;  %v449_v22 = vmul.f32 0.5, %v1430_v11 }
 0x1b1   :  { %1087 = vtanh.f32 %v527_v19  ;;  %v481_v13 = vmul.f32 %v465_v16, %v1430_v11  ;;  %v482_v18 = vmul.f32 %v466_v17, %v1433_v12  ;;  %v558_v43 = vadd.f32 1.0, %v1086_v26 }
 0x1b2   :  { %1089 = vtanh.f32 %v528_v20  ;;  %v573_v49 = vmul.f32 %v557_v37, %v445_v40 }
 0x1b3   :  { %v497_v23 = vmul.f32 %v481_v13, %v1430_v11  ;;  %v498_v24 = vmul.f32 %v482_v18, %v1433_v12  ;;  %v574_v55 = vmul.f32 %v558_v43, %v446_v21 }
 0x1b4   :  { %v403_v27 = vpop.f32.mrf.mxu0  ;;  %v432_v29 = vpop.f32.mrf.mxu1 }
 0x1b5   :  { %v1442_v31 = vadd.f32 %v403_v27, %v1421_v25  ;;  %v1445_v34 = vadd.f32 %v432_v29, %v1423_v50  ;;  %v513_v35 = vadd.f32 %v497_v23, %v1430_v11  ;;  %v514_v36 = vadd.f32 %v498_v24, %v1433_v12 }
 0x1b6   :  { %v450_v29 = vmul.f32 0.5, %v1433_v12 }
 0x1b7   :  { %v1088_v38 = vpop.eup %1087  ;;  %v467_v39 = vmul.f32 0.044715, %v1442_v31  ;;  %v468_v28 = vmul.f32 0.044715, %v1445_v34  ;;  %v529_v45 = vmul.f32 0.7978846, %v513_v35 }
 0x1b8   :  { %v1090_v42 = vpop.eup %1089  ;;  %v559_v8 = vadd.f32 1.0, %v1088_v38  ;;  %v530_v52 = vmul.f32 0.7978846, %v514_v36  ;;  %v451_v26 = vmul.f32 0.5, %v1442_v31  ;;  %v452_v35 = vmul.f32 0.5, %v1445_v34 }
 0x1b9   :  { %v560_v30 = vadd.f32 1.0, %v1090_v42  ;;  %v483_v47 = vmul.f32 %v467_v39, %v1442_v31  ;;  %v484_v48 = vmul.f32 %v468_v28, %v1445_v34  ;;  %1091 = vtanh.f32 %v529_v45 }
 0x1ba   :  { %v575_v51 = vmul.f32 %v559_v8, %v447_v44  ;;  %1093 = vtanh.f32 %v530_v52 }
 0x1bb   :  { %v576_v56 = vmul.f32 %v560_v30, %v448_v46  ;;  %v499_v57 = vmul.f32 %v483_v47, %v1442_v31  ;;  %v500_v53 = vmul.f32 %v484_v48, %v1445_v34 }
 0x1bc   :  { %v406_v58 = vpop.f32.mrf.mxu0  ;;  %v435_v33 = vpop.f32.mrf.mxu1  ;;  %v597_v59 = vpack.c.bf16 %v575_v51, %v573_v49 }
 0x1bd   :  { %v1456_v54 = vadd.f32 %v406_v58, %v1421_v25  ;;  %v1459_v60 = vadd.f32 %v435_v33, %v1423_v50  ;;  %v598_v61 = vpack.c.bf16 %v576_v56, %v574_v55  ;;  %v515_v62 = vadd.f32 %v499_v57, %v1442_v31 }
 0x1be   :  { %741 = vmatmul.bf16.vlgmr.msra.gmra.mxu2 %v597_v59  ;;  %v516_v63 = vadd.f32 %v500_v53, %v1445_v34 }
 0x1bf   :  { %v469_v0 = vmul.f32 0.044715, %v1456_v54  ;;  %v470_v32 = vmul.f32 0.044715, %v1459_v60  ;;  %770 = vmatmul.bf16.vlgmr.msra.gmra.mxu3 %v598_v61  ;;  %v531_v1 = vmul.f32 0.7978846, %v515_v62  ;;  %v1092_v4 = vpop.eup %1091 }
 0x1c0   :  { %v532_v2 = vmul.f32 0.7978846, %v516_v63  ;;  %v1094_v7 = vpop.eup %1093  ;;  %v561_v17 = vadd.f32 1.0, %v1092_v4  ;;  %v453_v55 = vmul.f32 0.5, %v1456_v54  ;;  %v454_v53 = vmul.f32 0.5, %v1459_v60 }
 0x1c1   :  { %1095 = vtanh.f32 %v531_v1  ;;  %v485_v3 = vmul.f32 %v469_v0, %v1456_v54  ;;  %v486_v41 = vmul.f32 %v470_v32, %v1459_v60  ;;  %v562_v23 = vadd.f32 1.0, %v1094_v7 }
 0x1c2   :  { %1097 = vtanh.f32 %v532_v2  ;;  %v577_v28 = vmul.f32 %v561_v17, %v449_v22 }
 0x1c3   :  { %v501_v5 = vmul.f32 %v485_v3, %v1456_v54  ;;  %v502_v6 = vmul.f32 %v486_v41, %v1459_v60  ;;  %v578_v42 = vmul.f32 %v562_v23, %v450_v29 }
 0x1c4   :  { %v408_v9 = vpop.f32.mrf.mxu0  ;;  %v437_v10 = vpop.f32.mrf.mxu1 }
 0x1c5   :  { %v409_v14 = vadd.f32 %v408_v9, %v1421_v25  ;;  %v438_v15 = vadd.f32 %v437_v10, %v1423_v50  ;;  %v517_v16 = vadd.f32 %v501_v5, %v1456_v54  ;;  %v518_v19 = vadd.f32 %v502_v6, %v1459_v60 }
 0x1c7   :  { %v1096_v20 = vpop.eup %1095  ;;  %v471_v13 = vmul.f32 0.044715, %v409_v14  ;;  %v472_v18 = vmul.f32 0.044715, %v438_v15  ;;  %v533_v38 = vmul.f32 0.7978846, %v517_v16 }
 0x1c8   :  { %v1098_v24 = vpop.eup %1097  ;;  %v563_v27 = vadd.f32 1.0, %v1096_v20  ;;  %v534_v43 = vmul.f32 0.7978846, %v518_v19  ;;  %v455_v56 = vmul.f32 0.5, %v409_v14  ;;  %v456_v58 = vmul.f32 0.5, %v438_v15 }
 0x1c9   :  { %v564_v37 = vadd.f32 1.0, %v1098_v24  ;;  %v487_v36 = vmul.f32 %v471_v13, %v409_v14  ;;  %v488_v39 = vmul.f32 %v472_v18, %v438_v15  ;;  %1099 = vtanh.f32 %v533_v38 }
 0x1ca   :  { %v579_v40 = vmul.f32 %v563_v27, %v451_v26  ;;  %1101 = vtanh.f32 %v534_v43 }
 0x1cb   :  { %v580_v44 = vmul.f32 %v564_v37, %v452_v35  ;;  %v503_v8 = vmul.f32 %v487_v36, %v409_v14  ;;  %v504_v11 = vmul.f32 %v488_v39, %v438_v15 }
 0x1cc   :  { %v599_v21 = vpack.c.bf16 %v579_v40, %v577_v28 }
 0x1cd   :  { %v600_v45 = vpack.c.bf16 %v580_v44, %v578_v42  ;;  %v519_v46 = vadd.f32 %v503_v8, %v409_v14  ;;  %v520_v31 = vadd.f32 %v504_v11, %v438_v15 }
 0x1ce   :  { %746 = vmatmul.bf16.gmra.mxu2 %v599_v21 }
 0x1cf   :  { %775 = vmatmul.bf16.gmra.mxu3 %v600_v45  ;;  %v535_v12 = vmul.f32 0.7978846, %v519_v46  ;;  %v536_v34 = vmul.f32 0.7978846, %v520_v31  ;;  %v1100_v30 = vpop.eup %1099 }
 0x1d0   :  { %v1102_v47 = vpop.eup %1101  ;;  %v565_v48 = vadd.f32 1.0, %v1100_v30 }
 0x1d1   :  { %1103 = vtanh.f32 %v535_v12  ;;  %v566_v51 = vadd.f32 1.0, %v1102_v47 }
 0x1d2   :  { %1105 = vtanh.f32 %v536_v34  ;;  %v581_v59 = vmul.f32 %v565_v48, %v453_v55  ;;  %v810_v48 = vld [vmem:[%s1534_s0] sm:$0xff] }
 0x1d3   :  { %v582_v62 = vmul.f32 %v566_v51, %v454_v53  ;;  %v1064_v51 = vld [vmem:[%s1540_s6] ss:$0 sm:$0xff]  ;;  %v811_v53 = vld [vmem:[%s1534_s0 + $0x8] sm:$0xff] }
 0x1d7   :  { %v1104_v49 = vpop.eup %1103 }
 0x1d8   :  { %v1106_v52 = vpop.eup %1105  ;;  %v567_v57 = vadd.f32 1.0, %v1104_v49 }
 0x1d9   :  { %v568_v33 = vadd.f32 1.0, %v1106_v52 }
 0x1da   :  { %v583_v61 = vmul.f32 %v567_v57, %v455_v56 }
 0x1db   :  { %v584_v63 = vmul.f32 %v568_v33, %v456_v58 }
 0x1dc   :  { %v601_v0 = vpack.c.bf16 %v583_v61, %v581_v59 }
 0x1dd   :  { %v602_v32 = vpack.c.bf16 %v584_v63, %v582_v62  ;;  %v812_v63 = vld [vmem:[%s1534_s0 + $0x10] sm:$0xff] }
 0x1de   :  { %751 = vmatmul.bf16.gmra.mxu2 %v601_v0 }
 0x1df   :  { %780 = vmatmul.bf16.gmra.mxu3 %v602_v32 }
 0x216   :  { %v411_v1 = vpop.f32.mrf.mxu0  ;;  %v440_v2 = vpop.f32.mrf.mxu1 }
 0x217   :  { %v412_v3 = vadd.f32 %v411_v1, %v1421_v25  ;;  %v441_v54 = vadd.f32 %v440_v2, %v1423_v50 }
 0x219   :  { %v473_v41 = vmul.f32 0.044715, %v412_v3  ;;  %v474_v4 = vmul.f32 0.044715, %v441_v54  ;;  %v457_v40 = vmul.f32 0.5, %v412_v3  ;;  %v458_v44 = vmul.f32 0.5, %v441_v54 }
 0x21b   :  { %v489_v5 = vmul.f32 %v473_v41, %v412_v3  ;;  %v490_v60 = vmul.f32 %v474_v4, %v441_v54 }
 0x21d   :  { %v505_v6 = vmul.f32 %v489_v5, %v412_v3  ;;  %v506_v7 = vmul.f32 %v490_v60, %v441_v54 }
 0x21e   :  { %v413_v9 = vpop.f32.mrf.mxu0  ;;  %v442_v10 = vpop.f32.mrf.mxu1 }
 0x21f   :  { %v414_v14 = vadd.f32 %v413_v9, %v1421_v25  ;;  %v443_v15 = vadd.f32 %v442_v10, %v1423_v50  ;;  %v521_v16 = vadd.f32 %v505_v6, %v412_v3  ;;  %v522_v17 = vadd.f32 %v506_v7, %v441_v54  ;;  %v813_v54 = vld [vmem:[%s1534_s0 + $0x18] sm:$0xff]  ;;  %v814_v7 = vld [vmem:[%s1534_s0 + $0x20] sm:$0xff] }
 0x221   :  { %v475_v19 = vmul.f32 0.044715, %v414_v14  ;;  %v476_v20 = vmul.f32 0.044715, %v443_v15  ;;  %v537_v18 = vmul.f32 0.7978846, %v521_v16 }
 0x222   :  { %v538_v23 = vmul.f32 0.7978846, %v522_v17  ;;  %v459_v43 = vmul.f32 0.5, %v414_v14  ;;  %v460_v8 = vmul.f32 0.5, %v443_v15  ;;  %v815_v17 = vld [vmem:[%s1534_s0 + $0x28] sm:$0xff] }
 0x223   :  { %v491_v13 = vmul.f32 %v475_v19, %v414_v14  ;;  %v492_v22 = vmul.f32 %v476_v20, %v443_v15  ;;  %1107 = vtanh.f32 %v537_v18 }
 0x224   :  { %1109 = vtanh.f32 %v538_v23  ;;  %v816_v23 = vld [vmem:[%s1534_s0 + $0x30] sm:$0xff] }
 0x225   :  { %v507_v24 = vmul.f32 %v491_v13, %v414_v14  ;;  %v508_v26 = vmul.f32 %v492_v22, %v443_v15 }
 0x227   :  { %v523_v27 = vadd.f32 %v507_v24, %v414_v14  ;;  %v524_v29 = vadd.f32 %v508_v26, %v443_v15 }
 0x229   :  { %v539_v35 = vmul.f32 0.7978846, %v523_v27  ;;  %v540_v37 = vmul.f32 0.7978846, %v524_v29  ;;  %v1108_v25 = vpop.eup %1107 }
 0x22a   :  { %v1110_v50 = vpop.eup %1109  ;;  %v569_v36 = vadd.f32 1.0, %v1108_v25 }
 0x22b   :  { %1111 = vtanh.f32 %v539_v35  ;;  %v570_v39 = vadd.f32 1.0, %v1110_v50 }
 0x22c   :  { %1113 = vtanh.f32 %v540_v37  ;;  %v585_v21 = vmul.f32 %v569_v36, %v457_v40  ;;  %v817_v37 = vld [vmem:[%s1534_s0 + $0x38] sm:$0xff] }
 0x22d   :  { %v586_v46 = vmul.f32 %v570_v39, %v458_v44 }
 0x231   :  { %v1112_v38 = vpop.eup %1111 }
 0x232   :  { %v1114_v28 = vpop.eup %1113  ;;  %v571_v42 = vadd.f32 1.0, %v1112_v38 }
 0x233   :  { %v572_v11 = vadd.f32 1.0, %v1114_v28 }
 0x234   :  { %v587_v45 = vmul.f32 %v571_v42, %v459_v43 }
 0x235   :  { %v588_v31 = vmul.f32 %v572_v11, %v460_v8 }
 0x236   :  { %v603_v12 = vpack.c.bf16 %v587_v45, %v585_v21 }
 0x237   :  { %v604_v34 = vpack.c.bf16 %v588_v31, %v586_v46 }
 0x238   :  { %756 = vmatmul.bf16.gmra.mxu2 %v603_v12 }
 0x239   :  { %785 = vmatmul.bf16.gmra.mxu3 %v604_v34 }
 0x241   :  { %v742_v30 = vpop.f32.mrf.mxu2 }
 0x242   :  { %v771_v47 = vpop.f32.mrf.mxu3 }
 0x243   :  { %v772_v49 = vadd.f32 %v771_v47, %v742_v30 }
 0x245   :  { %v826_v52 = vadd.f32 %v810_v48, %v772_v49 }
 0x247   :  { %v838_v55 = vadd.f32 %v1064_v51, %v826_v52 }
 0x249   :  { %846 = vst [vmem:[%s1541_s7] sm:$0xff] %v838_v55  ;;  %v744_v56 = vpop.f32.mrf.mxu2 }
 0x24a   :  { %v773_v57 = vpop.f32.mrf.mxu3 }
 0x24b   :  { %v774_v58 = vadd.f32 %v773_v57, %v744_v56 }
 0x24d   :  { %v827_v33 = vadd.f32 %v811_v53, %v774_v58 }
 0x24f   :  { %v839_v59 = vadd.f32 %v1064_v51, %v827_v33 }
 0x251   :  { %847 = vst [vmem:[%s1541_s7 + $0x8] sm:$0xff] %v839_v59  ;;  %v747_v61 = vpop.f32.mrf.mxu2 }
 0x252   :  { %v776_v62 = vpop.f32.mrf.mxu3 }
 0x253   :  { %v777_v0 = vadd.f32 %v776_v62, %v747_v61 }
 0x255   :  { %v828_v32 = vadd.f32 %v812_v63, %v777_v0 }
 0x257   :  { %v840_v1 = vadd.f32 %v1064_v51, %v828_v32 }
 0x259   :  { %848 = vst [vmem:[%s1541_s7 + $0x10] sm:$0xff] %v840_v1  ;;  %v749_v2 = vpop.f32.mrf.mxu2 }
 0x25a   :  { %v778_v3 = vpop.f32.mrf.mxu3 }
 0x25b   :  { %v779_v41 = vadd.f32 %v778_v3, %v749_v2 }
 0x25d   :  { %v829_v4 = vadd.f32 %v813_v54, %v779_v41 }
 0x25f   :  { %v841_v5 = vadd.f32 %v1064_v51, %v829_v4 }
 0x261   :  { %849 = vst [vmem:[%s1541_s7 + $0x18] sm:$0xff] %v841_v5  ;;  %v752_v60 = vpop.f32.mrf.mxu2 }
 0x262   :  { %v781_v6 = vpop.f32.mrf.mxu3 }
 0x263   :  { %v782_v9 = vadd.f32 %v781_v6, %v752_v60 }
 0x265   :  { %v830_v10 = vadd.f32 %v814_v7, %v782_v9 }
 0x267   :  { %v842_v14 = vadd.f32 %v1064_v51, %v830_v10 }
 0x269   :  { %850 = vst [vmem:[%s1541_s7 + $0x20] sm:$0xff] %v842_v14  ;;  %v754_v15 = vpop.f32.mrf.mxu2 }
 0x26a   :  { %v783_v16 = vpop.f32.mrf.mxu3 }
 0x26b   :  { %v784_v19 = vadd.f32 %v783_v16, %v754_v15 }
 0x26d   :  { %v831_v20 = vadd.f32 %v815_v17, %v784_v19 }
 0x26f   :  { %v843_v13 = vadd.f32 %v1064_v51, %v831_v20 }
 0x271   :  { %851 = vst [vmem:[%s1541_s7 + $0x28] sm:$0xff] %v843_v13 }
 0x2bb   :  { %v757_v18 = vpop.f32.mrf.mxu2 }
 0x2bc   :  { %v786_v22 = vpop.f32.mrf.mxu3 }
 0x2bd   :  { %v787_v24 = vadd.f32 %v786_v22, %v757_v18 }
 0x2bf   :  { %v832_v26 = vadd.f32 %v816_v23, %v787_v24 }
 0x2c1   :  { %v844_v27 = vadd.f32 %v1064_v51, %v832_v26 }
 0x2c3   :  { %852 = vst [vmem:[%s1541_s7 + $0x30] sm:$0xff] %v844_v27  ;;  %v759_v29 = vpop.f32.mrf.mxu2 }
 0x2c4   :  { %v788_v35 = vpop.f32.mrf.mxu3 }
 0x2c5   :  { %v789_v25 = vadd.f32 %v788_v35, %v759_v29 }
 0x2c7   :  { %v833_v50 = vadd.f32 %v817_v37, %v789_v25 }
 0x2c9   :  { %v845_v36 = vadd.f32 %v1064_v51, %v833_v50 }
 0x2cb   :  { %853 = vst [vmem:[%s1541_s7 + $0x38] sm:$0xff] %v845_v36 }

</bundles_post_ra>
